<compile_context>
chip_gen: v7x
topology: tpu7x:2x2x1
jax: 0.10.0
libtpu: 0.0.40
codegen_flags: <defaults>
</compile_context>

<pallas_src>
import math
from functools import partial

import jax
import jax.numpy as jnp
from jax.experimental import pallas as pl
from jax.experimental.pallas import tpu as pltpu

LATENT = 128        # configs-fixed latent_dim in Model.__init__
HEADS = 4           # attn_head
N_LAYERS = 2        # n_layers
HEAD_DIM = LATENT // HEADS


def _detect_vmem_bytes():
    try:
        return int(getattr(pltpu.get_tpu_info(), "vmem_capacity_bytes",
                           64 * 1024 * 1024))
    except Exception:
        return 64 * 1024 * 1024


_VMEM_BYTES = _detect_vmem_bytes()
if _VMEM_BYTES >= 100 * 1024 * 1024:      # v5e / v6e: 128 MiB VMEM per core
    _MAX_EDGE_TILE = 4096
    _VMEM_LIMIT = 96 * 1024 * 1024
else:                                     # v7x: 64 MiB VMEM per TensorCore
    _MAX_EDGE_TILE = 2048
    _VMEM_LIMIT = 48 * 1024 * 1024


def _edge_tiling(e):
    """Pick (tile, n_tiles) for the edge axis.

    Single tile: tile = E rounded up to a multiple of 8 (full-dim block).
    Multi tile:  tile is a multiple of 128 so (8,128) BlockSpec rules hold.
    """
    e8 = ((e + 7) // 8) * 8
    if e8 <= _MAX_EDGE_TILE:
        return e8, 1
    n = -(-e8 // _MAX_EDGE_TILE)
    tile = -(-e8 // n)
    tile = ((tile + 127) // 128) * 128
    return tile, n


# --------------------------------------------------------------------------
# In-kernel helpers for one MAB2 attention (flash-style over the edge axis)
# --------------------------------------------------------------------------
def _online_attend(idx_row, kv_b, wkv_ref, bkv_ref, qp_sc, m_sc, l_sc, acc_sc,
                   *, heads, latent):
    """One online-softmax update step for MAB2(Q, K=V=kv, mask from idx_row)."""
    hd = latent // heads
    scale = 1.0 / math.sqrt(latent)               # MAB2 scales by sqrt(dim_V)
    nq = qp_sc.shape[0]
    te = kv_b.shape[0]

    # Fused K/V projection: one K=256, N=256 bf16 MXU pass -> [kp | vp].
    kvp = (jnp.dot(kv_b, wkv_ref[...], preferred_element_type=jnp.float32)
           + bkv_ref[...])
    kvp_b = kvp.astype(jnp.bfloat16)              # one wide cast, sliced per head
    q_b = (qp_sc[...] * scale).astype(jnp.bfloat16)   # scale folded into Q copy

    # query-node id per edge vs. query row id; invalid/padded edges carry -1
    match = jax.lax.broadcasted_iota(jnp.int32, (nq, te), 0) == idx_row

    alpha_l, pv_l = [], []
    for h in range(heads):
        sl = slice(h * hd, (h + 1) * hd)
        att = jax.lax.dot_general(q_b[:, sl], kvp_b[:, sl],
                                  (((1,), (1,)), ((), ())),
                                  preferred_element_type=jnp.float32)
        att = jnp.where(match, att, -1e10)        # masked_fill(mask == 0, -10e9)
        m_prev = m_sc[h]                          # [nq, 1]
        m_new = jnp.maximum(m_prev, jnp.max(att, axis=-1, keepdims=True))
        alpha = jnp.exp(m_prev - m_new)
        p = jnp.exp(att - m_new)
        l_sc[h] = alpha * l_sc[h] + jnp.sum(p, axis=-1, keepdims=True)
        m_sc[h] = m_new
        alpha_l.append(jnp.broadcast_to(alpha, (nq, hd)))
        pv_l.append(jnp.dot(p.astype(jnp.bfloat16),
                            kvp_b[:, latent + h * hd:latent + (h + 1) * hd],
                            preferred_element_type=jnp.float32))
    # Single lane-dense [nq, 128] accumulator update (no per-head partial RMW).
    acc_sc[...] = (jnp.concatenate(alpha_l, axis=-1) * acc_sc[...]
                   + jnp.concatenate(pv_l, axis=-1))


def _attn_finalize(qp_sc, l_sc, acc_sc, wo_ref, bo_ref, *, heads, latent):
    hd = latent // heads
    nq = qp_sc.shape[0]
    inv_full = jnp.concatenate(
        [jnp.broadcast_to(pl.reciprocal(l_sc[h], approx=True), (nq, hd))
         for h in range(heads)], axis=-1)
    o = qp_sc[...] + acc_sc[...] * inv_full       # per-head residual on Q proj
    y = (jnp.dot(o.astype(jnp.bfloat16), wo_ref[...],
                 preferred_element_type=jnp.float32) + bo_ref[...])
    return o + jnp.maximum(y, 0.0)                # O + relu(fc_o(O))


# --------------------------------------------------------------------------
# Fused GraFITi layer: both MAB2 attentions + edge MLP in one pallas_call
# --------------------------------------------------------------------------
def _layer_kernel(c_idx_ref, t_idx_ref, c_g_ref, t_g_ref, u_ref,
                  c_emb_ref, t_emb_ref,
                  wq_c_ref, bq_c_ref, wkv_c_ref, bkv_c_ref, wo_c_ref, bo_c_ref,
                  wq_t_ref, bq_t_ref, wkv_t_ref, bkv_t_ref, wo_t_ref, bo_t_ref,
                  we1_ref, we2_ref, we3_ref, be_ref,
                  c_new_ref, t_new_ref, u_new_ref,
                  qp_c, m_c, l_c, acc_c, qp_t, m_t, l_t, acc_t,
                  *, heads, latent):
    k = pl.program_id(1)
    nk = pl.num_programs(1)

    @pl.when(k == 0)
    def _():
        qp_c[...] = (jnp.dot(c_emb_ref[0].astype(jnp.bfloat16), wq_c_ref[...],
                             preferred_element_type=jnp.float32) + bq_c_ref[...])
        qp_t[...] = (jnp.dot(t_emb_ref[0].astype(jnp.bfloat16), wq_t_ref[...],
                             preferred_element_type=jnp.float32) + bq_t_ref[...])
        for m_sc, l_sc, acc_sc in ((m_c, l_c, acc_c), (m_t, l_t, acc_t)):
            m_sc[...] = jnp.full(m_sc.shape, -jnp.inf, m_sc.dtype)
            l_sc[...] = jnp.zeros(l_sc.shape, l_sc.dtype)
            acc_sc[...] = jnp.zeros(acc_sc.shape, acc_sc.dtype)

    te = u_ref.shape[1]
    n_c = c_emb_ref.shape[1]
    n_t = t_emb_ref.shape[1]

    # In-kernel gather of the per-edge node embeddings from the VMEM-resident
    # node tables via one-hot MXU matmuls (exact: one 1.0 per row, f32 accum).
    oh_t = (jax.lax.broadcasted_iota(jnp.int32, (te, n_t), 1)
            == t_g_ref[0]).astype(jnp.bfloat16)               # [tE, T]
    oh_c = (jax.lax.broadcasted_iota(jnp.int32, (te, n_c), 1)
            == c_g_ref[0]).astype(jnp.bfloat16)               # [tE, D]
    qt_b = jnp.dot(oh_t, t_emb_ref[0].astype(jnp.bfloat16),
                   preferred_element_type=jnp.float32).astype(jnp.bfloat16)
    qc_b = jnp.dot(oh_c, c_emb_ref[0].astype(jnp.bfloat16),
                   preferred_element_type=jnp.float32).astype(jnp.bfloat16)
    u_b = u_ref[0]                                            # [tE, K] bf16

    # channel nodes attend over their edges: Q = C, K = V = cat([q_t, U], -1)
    _online_attend(c_idx_ref[0], jnp.concatenate([qt_b, u_b], axis=-1),
                   wkv_c_ref, bkv_c_ref, qp_c, m_c, l_c, acc_c,
                   heads=heads, latent=latent)
    # time nodes attend over their edges:    Q = T, K = V = cat([q_c, U], -1)
    _online_attend(t_idx_ref[0], jnp.concatenate([qc_b, u_b], axis=-1),
                   wkv_t_ref, bkv_t_ref, qp_t, m_t, l_t, acc_t,
                   heads=heads, latent=latent)

    # edge MLP (row-local): relu(cat([U, q_t, q_c], -1) @ W + b) + U
    y = (jnp.dot(u_b, we1_ref[...], preferred_element_type=jnp.float32)
         + jnp.dot(qt_b, we2_ref[...], preferred_element_type=jnp.float32)
         + jnp.dot(qc_b, we3_ref[...], preferred_element_type=jnp.float32)
         + be_ref[...])
    u_new_ref[0] = (jnp.maximum(y, 0.0)
                    + u_b.astype(jnp.float32)).astype(jnp.bfloat16)

    @pl.when(k == nk - 1)
    def _():
        c_new_ref[0] = _attn_finalize(qp_c, l_c, acc_c, wo_c_ref, bo_c_ref,
                                      heads=heads, latent=latent)
        t_new_ref[0] = _attn_finalize(qp_t, l_t, acc_t, wo_t_ref, bo_t_ref,
                                      heads=heads, latent=latent)


def _prep_attn_params(p):
    """bf16 weights; wk/wv fused into one [256,256] (kp|vp) projection."""
    return (p["wq"].astype(jnp.bfloat16), p["bq"].reshape(1, -1),
            jnp.concatenate([p["wk"], p["wv"]], axis=1).astype(jnp.bfloat16),
            jnp.concatenate([p["bk"], p["bv"]]).reshape(1, -1),
            p["wo"].astype(jnp.bfloat16), p["bo"].reshape(1, -1))


def pallas_grafiti_layer(u_emb, c_emb, t_emb, c_idx, t_idx, c_g, t_g,
                         p_ct, p_tc, p_edge, e_tile, n_e):
    """One GraFITi layer: (C, T, U) -> (C', T', U') with U streamed once."""
    B, e_pad, _ = u_emb.shape
    D = c_emb.shape[1]
    T = t_emb.shape[1]
    wq_c, bq_c, wkv_c, bkv_c, wo_c, bo_c = _prep_attn_params(p_ct)
    wq_t, bq_t, wkv_t, bkv_t, wo_t, bo_t = _prep_attn_params(p_tc)
    we = p_edge["w"]
    we1 = we[:LATENT].astype(jnp.bfloat16)
    we2 = we[LATENT:2 * LATENT].astype(jnp.bfloat16)
    we3 = we[2 * LATENT:].astype(jnp.bfloat16)
    be = p_edge["b"].reshape(1, -1)

    full = lambda s: pl.BlockSpec(s, lambda b, k: (0, 0))
    edge_blk = lambda last: pl.BlockSpec((1, e_tile, last), lambda b, k: (b, k, 0))
    node_blk = lambda n: pl.BlockSpec((1, n, LATENT), lambda b, k: (b, 0, 0))
    idx_blk = pl.BlockSpec((1, 1, e_tile), lambda b, k: (b, 0, k))

    return pl.pallas_call(
        partial(_layer_kernel, heads=HEADS, latent=LATENT),
        out_shape=(jax.ShapeDtypeStruct((B, D, LATENT), jnp.float32),
                   jax.ShapeDtypeStruct((B, T, LATENT), jnp.float32),
                   jax.ShapeDtypeStruct((B, e_pad, LATENT), jnp.bfloat16)),
        grid=(B, n_e),
        in_specs=[
            idx_blk, idx_blk,                       # c_idx, t_idx   (mask ids)
            edge_blk(1), edge_blk(1),               # c_g, t_g       (gather ids)
            edge_blk(LATENT),                       # u_emb (bf16 edge stream)
            node_blk(D), node_blk(T),               # c_emb, t_emb   (resident)
            full((LATENT, LATENT)), full((1, LATENT)),                    # wq_c, bq_c
            full((2 * LATENT, 2 * LATENT)), full((1, 2 * LATENT)),        # wkv_c, bkv_c
            full((LATENT, LATENT)), full((1, LATENT)),                    # wo_c, bo_c
            full((LATENT, LATENT)), full((1, LATENT)),                    # wq_t, bq_t
            full((2 * LATENT, 2 * LATENT)), full((1, 2 * LATENT)),        # wkv_t, bkv_t
            full((LATENT, LATENT)), full((1, LATENT)),                    # wo_t, bo_t
            full((LATENT, LATENT)), full((LATENT, LATENT)),
            full((LATENT, LATENT)), full((1, LATENT)),                    # edge MLP
        ],
        out_specs=(node_blk(D), node_blk(T), edge_blk(LATENT)),
        scratch_shapes=[
            pltpu.VMEM((D, LATENT), jnp.float32),       # qp_c
            pltpu.VMEM((HEADS, D, 1), jnp.float32),     # m_c
            pltpu.VMEM((HEADS, D, 1), jnp.float32),     # l_c
            pltpu.VMEM((D, LATENT), jnp.float32),       # acc_c
            pltpu.VMEM((T, LATENT), jnp.float32),       # qp_t
            pltpu.VMEM((HEADS, T, 1), jnp.float32),     # m_t
            pltpu.VMEM((HEADS, T, 1), jnp.float32),     # l_t
            pltpu.VMEM((T, LATENT), jnp.float32),       # acc_t
        ],
        compiler_params=pltpu.CompilerParams(
            dimension_semantics=("parallel", "arbitrary"),
            vmem_limit_bytes=_VMEM_LIMIT),
    )(c_idx, t_idx, c_g, t_g, u_emb, c_emb, t_emb,
      wq_c, bq_c, wkv_c, bkv_c, wo_c, bo_c,
      wq_t, bq_t, wkv_t, bkv_t, wo_t, bo_t,
      we1, we2, we3, be)


# --------------------------------------------------------------------------
# Parameter init (deterministic, torch.nn.Linear-style uniform)
# --------------------------------------------------------------------------
def _linear_init(key, fin, fout):
    kw, kb = jax.random.split(key)
    bound = 1.0 / math.sqrt(fin)
    return {"w": jax.random.uniform(kw, (fin, fout), jnp.float32, -bound, bound),
            "b": jax.random.uniform(kb, (fout,), jnp.float32, -bound, bound)}


def _mab2_init(key, dim_q, dim_k, dim_v):
    ks = jax.random.split(key, 4)
    pq = _linear_init(ks[0], dim_q, dim_v)
    pk = _linear_init(ks[1], dim_k, dim_v)
    pv = _linear_init(ks[2], dim_k, dim_v)
    po = _linear_init(ks[3], dim_v, dim_v)
    return {"wq": pq["w"], "bq": pq["b"], "wk": pk["w"], "bk": pk["b"],
            "wv": pv["w"], "bv": pv["b"], "wo": po["w"], "bo": po["b"]}


def init_params(key, dim):
    keys = jax.random.split(key, 4 + 3 * N_LAYERS)
    params = {
        "time_init": _linear_init(keys[0], 1, LATENT),
        "chan_init": _linear_init(keys[1], dim, LATENT),
        "edge_init": _linear_init(keys[2], 2, LATENT),
        "output": _linear_init(keys[3], 3 * LATENT, 1),
        "chan_time_attn": [], "time_chan_attn": [], "edge_nn": [],
    }
    for i in range(N_LAYERS):
        params["chan_time_attn"].append(_mab2_init(keys[4 + 3 * i], LATENT, 2 * LATENT, LATENT))
        params["time_chan_attn"].append(_mab2_init(keys[5 + 3 * i], LATENT, 2 * LATENT, LATENT))
        params["edge_nn"].append(_linear_init(keys[6 + 3 * i], 3 * LATENT, LATENT))
    return params


# --------------------------------------------------------------------------
# GraFITi encoder + Model.forward (long_term_forecast, exp_stage='train')
# --------------------------------------------------------------------------
def encoder_forward(params, times, values, mask, target_vals, target_mask):
    B, ttot, d = values.shape
    e = ttot * d
    e_tile, n_e = _edge_tiling(e)
    e_pad = e_tile * n_e

    flat = lambda a: a.reshape(B, e)
    # Compact real edges (mask>0) to the front in row-major order (stable);
    # static E = T*D upper bound replaces torch's per-batch dynamic obs_len.
    order = jnp.argsort(-flat(mask), axis=1, stable=True)
    g = lambda a: jnp.take_along_axis(flat(a), order, axis=1)
    mk = (g(mask) > 0).astype(jnp.float32)
    t_inds = (order // d).astype(jnp.int32)
    c_inds = (order % d).astype(jnp.int32)
    u_vals = g(values) * mk
    target_u = g(target_vals) * mk
    target_m = g(target_mask) * mk

    pad = e_pad - e
    pad_f = lambda a: jnp.pad(a, ((0, 0), (0, pad)))
    pad_i = lambda a, v: jnp.pad(a, ((0, 0), (0, pad)), constant_values=v)

    u_vals_p = pad_f(u_vals)
    target_m_p = pad_f(target_m)
    valid = mk > 0
    t_gather = pad_i(t_inds, 0)[:, :, None]                 # gather idx [B,Ep,1]
    c_gather = pad_i(c_inds, 0)[:, :, None]
    # attention index vectors: query-node id per edge, -1 => masked/padded edge
    t_idx = pad_i(jnp.where(valid, t_inds, -1), -1)[:, None, :]   # [B,1,Ep]
    c_idx = pad_i(jnp.where(valid, c_inds, -1), -1)[:, None, :]

    # Initial node / edge embeddings as VPU broadcast mul-adds (no padded MXU work).
    wt, bt = params["time_init"]["w"], params["time_init"]["b"]
    t_emb = jnp.maximum(times[:, :, None] * wt[0] + bt, 0.0)             # [B,T,K]
    wc, bc = params["chan_init"]["w"], params["chan_init"]["b"]
    c_emb = jnp.broadcast_to(jnp.maximum(wc + bc, 0.0)[None], (B, d, LATENT))
    we, be = params["edge_init"]["w"], params["edge_init"]["b"]
    # TODO(synk): exact GraFITi edge-feature convention (value, target-indicator)
    # reconstructed from the paper / reference repo.
    u_emb = jnp.maximum(u_vals_p[:, :, None] * we[0]
                        + target_m_p[:, :, None] * we[1] + be, 0.0)       # [B,Ep,K]
    u_emb = u_emb.astype(jnp.bfloat16)        # bf16 HBM stream for the edge state

    for i in range(N_LAYERS):
        c_emb, t_emb, u_emb = pallas_grafiti_layer(
            u_emb, c_emb, t_emb, c_idx, t_idx, c_gather, t_gather,
            params["chan_time_attn"][i], params["time_chan_attn"][i],
            params["edge_nn"][i], e_tile, n_e)

    # Final per-edge readout (fout=1): tiny mat-vecs -> plain XLA, no Pallas launch.
    q_t = jnp.take_along_axis(t_emb, t_gather, axis=1)                    # [B,Ep,K]
    q_c = jnp.take_along_axis(c_emb, c_gather, axis=1)
    wo = params["output"]["w"][:, 0]
    bo = params["output"]["b"][0]
    out = (jnp.einsum("bek,k->be", u_emb.astype(jnp.float32), wo[:LATENT])
           + jnp.einsum("bek,k->be", q_t, wo[LATENT:2 * LATENT])
           + jnp.einsum("bek,k->be", q_c, wo[2 * LATENT:]) + bo)
    return out[:, :e], target_u, target_m


def model_forward(params, x, y):
    """Model.forward for task 'long_term_forecast', default marks/masks, exp_stage='train'."""
    B, S, D = x.shape
    Y = y.shape[1]
    dt = x.dtype
    x_mark = jnp.broadcast_to((jnp.arange(S, dtype=dt) / S)[None, :], (B, S))
    y_mark = jnp.broadcast_to((jnp.arange(Y, dtype=dt) / Y)[None, :], (B, Y))
    x_mask = jnp.ones_like(x)
    y_mask = jnp.ones_like(y)
    zeros_y = jnp.zeros((B, Y, D), dt)
    zeros_x = jnp.zeros((B, S, D), dt)

    x_new = jnp.concatenate([x, zeros_y], axis=1)            # [B, S+Y, D]
    x_mask_new = jnp.concatenate([x_mask, zeros_y], axis=1)
    y_new = jnp.concatenate([zeros_x, y], axis=1)
    y_mask_new = jnp.concatenate([zeros_x, y_mask], axis=1)
    marks = jnp.concatenate([x_mark, y_mark], axis=1)        # [B, S+Y]

    # get_extrapolation
    vals = x_new * x_mask_new
    mask = x_mask_new + y_mask_new
    pred, target_u, target_m = encoder_forward(params, marks, vals, mask,
                                               y_new, y_mask_new)
    return {"pred": pred, "true": target_u, "mask": target_m}


# --------------------------------------------------------------------------
if __name__ == "__main__":
    key = jax.random.PRNGKey(0)
    B, S, D = 2, 8, 4          # batch, seq_len, enc_in
    PRED = 8                   # pred_len
    kx, ky, kp = jax.random.split(key, 3)
    x = jax.random.normal(kx, (B, S, D), jnp.float32)
    y = jax.random.normal(ky, (B, PRED, D), jnp.float32)
    params = init_params(kp, D)

    fwd = jax.jit(model_forward)
    out = fwd(params, x, y)
    out = jax.tree_util.tree_map(jax.block_until_ready, out)

    E = (S + PRED) * D
    assert out["pred"].shape == (B, E)
    assert out["true"].shape == (B, E)
    assert out["mask"].shape == (B, E)
    assert bool(jnp.all(jnp.isfinite(out["pred"])))
    print("KERNEL_OK")
</pallas_src>

<mosaic_0001>
module attributes {stable_mosaic.version = 11 : i64} {
  func.func @_layer_kernel(%arg0: i32, %arg1: i32, %arg2: memref<1x1x64xi32, #tpu.memory_space<vmem>>, %arg3: memref<1x1x64xi32, #tpu.memory_space<vmem>>, %arg4: memref<1x64x1xi32, #tpu.memory_space<vmem>>, %arg5: memref<1x64x1xi32, #tpu.memory_space<vmem>>, %arg6: memref<1x64x128xbf16, #tpu.memory_space<vmem>>, %arg7: memref<1x4x128xf32, #tpu.memory_space<vmem>>, %arg8: memref<1x16x128xf32, #tpu.memory_space<vmem>>, %arg9: memref<128x128xbf16, #tpu.memory_space<vmem>>, %arg10: memref<1x128xf32, #tpu.memory_space<vmem>>, %arg11: memref<256x256xbf16, #tpu.memory_space<vmem>>, %arg12: memref<1x256xf32, #tpu.memory_space<vmem>>, %arg13: memref<128x128xbf16, #tpu.memory_space<vmem>>, %arg14: memref<1x128xf32, #tpu.memory_space<vmem>>, %arg15: memref<128x128xbf16, #tpu.memory_space<vmem>>, %arg16: memref<1x128xf32, #tpu.memory_space<vmem>>, %arg17: memref<256x256xbf16, #tpu.memory_space<vmem>>, %arg18: memref<1x256xf32, #tpu.memory_space<vmem>>, %arg19: memref<128x128xbf16, #tpu.memory_space<vmem>>, %arg20: memref<1x128xf32, #tpu.memory_space<vmem>>, %arg21: memref<128x128xbf16, #tpu.memory_space<vmem>>, %arg22: memref<128x128xbf16, #tpu.memory_space<vmem>>, %arg23: memref<128x128xbf16, #tpu.memory_space<vmem>>, %arg24: memref<1x128xf32, #tpu.memory_space<vmem>>, %arg25: memref<1x4x128xf32, #tpu.memory_space<vmem>>, %arg26: memref<1x16x128xf32, #tpu.memory_space<vmem>>, %arg27: memref<1x64x128xbf16, #tpu.memory_space<vmem>>, %arg28: memref<4x128xf32, #tpu.memory_space<vmem>>, %arg29: memref<4x4x1xf32, #tpu.memory_space<vmem>>, %arg30: memref<4x4x1xf32, #tpu.memory_space<vmem>>, %arg31: memref<4x128xf32, #tpu.memory_space<vmem>>, %arg32: memref<16x128xf32, #tpu.memory_space<vmem>>, %arg33: memref<4x16x1xf32, #tpu.memory_space<vmem>>, %arg34: memref<4x16x1xf32, #tpu.memory_space<vmem>>, %arg35: memref<16x128xf32, #tpu.memory_space<vmem>>) attributes {dimension_semantics = [#tpu.dimension_semantics<parallel>, #tpu.dimension_semantics<arbitrary>], iteration_bounds = array<i64: 2, 1>, scalar_prefetch = 0 : i64, scratch_operands = 8 : i64, tpu.core_type = #tpu.core_type<tc>, window_params = [{transform_indices = @transform_0, window_bounds = array<i64: 1, 1, 64>}, {transform_indices = @transform_1, window_bounds = array<i64: 1, 1, 64>}, {transform_indices = @transform_2, window_bounds = array<i64: 1, 64, 1>}, {transform_indices = @transform_3, window_bounds = array<i64: 1, 64, 1>}, {transform_indices = @transform_4, window_bounds = array<i64: 1, 64, 128>}, {transform_indices = @transform_5, window_bounds = array<i64: 1, 4, 128>}, {transform_indices = @transform_6, window_bounds = array<i64: 1, 16, 128>}, {pipeline_mode = #tpu.pipeline_mode<synchronous>, transform_indices = @transform_7, window_bounds = array<i64: 128, 128>}, {pipeline_mode = #tpu.pipeline_mode<synchronous>, transform_indices = @transform_8, window_bounds = array<i64: 1, 128>}, {pipeline_mode = #tpu.pipeline_mode<synchronous>, transform_indices = @transform_9, window_bounds = array<i64: 256, 256>}, {pipeline_mode = #tpu.pipeline_mode<synchronous>, transform_indices = @transform_10, window_bounds = array<i64: 1, 256>}, {pipeline_mode = #tpu.pipeline_mode<synchronous>, transform_indices = @transform_11, window_bounds = array<i64: 128, 128>}, {pipeline_mode = #tpu.pipeline_mode<synchronous>, transform_indices = @transform_12, window_bounds = array<i64: 1, 128>}, {pipeline_mode = #tpu.pipeline_mode<synchronous>, transform_indices = @transform_13, window_bounds = array<i64: 128, 128>}, {pipeline_mode = #tpu.pipeline_mode<synchronous>, transform_indices = @transform_14, window_bounds = array<i64: 1, 128>}, {pipeline_mode = #tpu.pipeline_mode<synchronous>, transform_indices = @transform_15, window_bounds = array<i64: 256, 256>}, {pipeline_mode = #tpu.pipeline_mode<synchronous>, transform_indices = @transform_16, window_bounds = array<i64: 1, 256>}, {pipeline_mode = #tpu.pipeline_mode<synchronous>, transform_indices = @transform_17, window_bounds = array<i64: 128, 128>}, {pipeline_mode = #tpu.pipeline_mode<synchronous>, transform_indices = @transform_18, window_bounds = array<i64: 1, 128>}, {pipeline_mode = #tpu.pipeline_mode<synchronous>, transform_indices = @transform_19, window_bounds = array<i64: 128, 128>}, {pipeline_mode = #tpu.pipeline_mode<synchronous>, transform_indices = @transform_20, window_bounds = array<i64: 128, 128>}, {pipeline_mode = #tpu.pipeline_mode<synchronous>, transform_indices = @transform_21, window_bounds = array<i64: 128, 128>}, {pipeline_mode = #tpu.pipeline_mode<synchronous>, transform_indices = @transform_22, window_bounds = array<i64: 1, 128>}, {transform_indices = @transform_23, window_bounds = array<i64: 1, 4, 128>}, {transform_indices = @transform_24, window_bounds = array<i64: 1, 16, 128>}, {transform_indices = @transform_25, window_bounds = array<i64: 1, 64, 128>}]} {
    %c0_i32 = arith.constant 0 : i32
    %0 = arith.cmpi eq, %arg1, %c0_i32 : i32
    %1 = arith.extui %0 : i1 to i32
    %c0_i32_0 = arith.constant 0 : i32
    %2 = arith.cmpi ne, %1, %c0_i32_0 : i32
    scf.if %2 {
      %c0_196 = arith.constant 0 : index
      %c0_197 = arith.constant 0 : index
      %c0_198 = arith.constant 0 : index
      %353 = vector.load %arg7[%c0_196, %c0_197, %c0_198] : memref<1x4x128xf32, #tpu.memory_space<vmem>>, vector<1x4x128xf32>
      %354 = vector.shape_cast %353 : vector<1x4x128xf32> to vector<4x128xf32>
      %355 = arith.truncf %354 : vector<4x128xf32> to vector<4x128xbf16>
      %c0_199 = arith.constant 0 : index
      %c0_200 = arith.constant 0 : index
      %356 = vector.load %arg9[%c0_199, %c0_200] : memref<128x128xbf16, #tpu.memory_space<vmem>>, vector<128x128xbf16>
      %cst_201 = arith.constant dense<0.000000e+00> : vector<4x128xf32>
      %357 = tpu.matmul %355, %356, %cst_201 {dimension_numbers = #tpu.dot_dimension_numbers<[1], [0], [0], [1], [0, 0, 1, 1], [], []>} : vector<4x128xbf16>, vector<128x128xbf16>, vector<4x128xf32> -> vector<4x128xf32>
      %c0_202 = arith.constant 0 : index
      %c0_203 = arith.constant 0 : index
      %358 = vector.load %arg10[%c0_202, %c0_203] : memref<1x128xf32, #tpu.memory_space<vmem>>, vector<1x128xf32>
      %359 = vector.broadcast %358 : vector<1x128xf32> to vector<4x128xf32>
      %360 = arith.addf %357, %359 : vector<4x128xf32>
      %c0_204 = arith.constant 0 : index
      %c0_205 = arith.constant 0 : index
      %361 = vector.load %arg28[%c0_204, %c0_205] : memref<4x128xf32, #tpu.memory_space<vmem>>, vector<4x128xf32>
      tpu.vector_store %arg28[%c0_204, %c0_205], %360 {strides = array<i32>} : memref<4x128xf32, #tpu.memory_space<vmem>>, vector<4x128xf32>,
      %c0_206 = arith.constant 0 : index
      %c0_207 = arith.constant 0 : index
      %c0_208 = arith.constant 0 : index
      %362 = vector.load %arg8[%c0_206, %c0_207, %c0_208] : memref<1x16x128xf32, #tpu.memory_space<vmem>>, vector<1x16x128xf32>
      %363 = vector.shape_cast %362 : vector<1x16x128xf32> to vector<16x128xf32>
      %364 = arith.truncf %363 : vector<16x128xf32> to vector<16x128xbf16>
      %c0_209 = arith.constant 0 : index
      %c0_210 = arith.constant 0 : index
      %365 = vector.load %arg15[%c0_209, %c0_210] : memref<128x128xbf16, #tpu.memory_space<vmem>>, vector<128x128xbf16>
      %cst_211 = arith.constant dense<0.000000e+00> : vector<16x128xf32>
      %366 = tpu.matmul %364, %365, %cst_211 {dimension_numbers = #tpu.dot_dimension_numbers<[1], [0], [0], [1], [0, 0, 1, 1], [], []>} : vector<16x128xbf16>, vector<128x128xbf16>, vector<16x128xf32> -> vector<16x128xf32>
      %c0_212 = arith.constant 0 : index
      %c0_213 = arith.constant 0 : index
      %367 = vector.load %arg16[%c0_212, %c0_213] : memref<1x128xf32, #tpu.memory_space<vmem>>, vector<1x128xf32>
      %368 = vector.broadcast %367 : vector<1x128xf32> to vector<16x128xf32>
      %369 = arith.addf %366, %368 : vector<16x128xf32>
      %c0_214 = arith.constant 0 : index
      %c0_215 = arith.constant 0 : index
      %370 = vector.load %arg32[%c0_214, %c0_215] : memref<16x128xf32, #tpu.memory_space<vmem>>, vector<16x128xf32>
      tpu.vector_store %arg32[%c0_214, %c0_215], %369 {strides = array<i32>} : memref<16x128xf32, #tpu.memory_space<vmem>>, vector<16x128xf32>,
      %cst_216 = arith.constant 0xFF800000 : f32
      %371 = vector.broadcast %cst_216 : f32 to vector<4x4x1xf32>
      %c0_217 = arith.constant 0 : index
      %c0_218 = arith.constant 0 : index
      %c0_219 = arith.constant 0 : index
      %372 = vector.load %arg29[%c0_217, %c0_218, %c0_219] : memref<4x4x1xf32, #tpu.memory_space<vmem>>, vector<4x4x1xf32>
      tpu.vector_store %arg29[%c0_217, %c0_218, %c0_219], %371 {strides = array<i32>} : memref<4x4x1xf32, #tpu.memory_space<vmem>>, vector<4x4x1xf32>,
      %cst_220 = arith.constant 0.000000e+00 : f32
      %373 = vector.broadcast %cst_220 : f32 to vector<4x4x1xf32>
      %c0_221 = arith.constant 0 : index
      %c0_222 = arith.constant 0 : index
      %c0_223 = arith.constant 0 : index
      %374 = vector.load %arg30[%c0_221, %c0_222, %c0_223] : memref<4x4x1xf32, #tpu.memory_space<vmem>>, vector<4x4x1xf32>
      tpu.vector_store %arg30[%c0_221, %c0_222, %c0_223], %373 {strides = array<i32>} : memref<4x4x1xf32, #tpu.memory_space<vmem>>, vector<4x4x1xf32>,
      %cst_224 = arith.constant 0.000000e+00 : f32
      %375 = vector.broadcast %cst_224 : f32 to vector<4x128xf32>
      %c0_225 = arith.constant 0 : index
      %c0_226 = arith.constant 0 : index
      %376 = vector.load %arg31[%c0_225, %c0_226] : memref<4x128xf32, #tpu.memory_space<vmem>>, vector<4x128xf32>
      tpu.vector_store %arg31[%c0_225, %c0_226], %375 {strides = array<i32>} : memref<4x128xf32, #tpu.memory_space<vmem>>, vector<4x128xf32>,
      %cst_227 = arith.constant 0xFF800000 : f32
      %377 = vector.broadcast %cst_227 : f32 to vector<4x16x1xf32>
      %c0_228 = arith.constant 0 : index
      %c0_229 = arith.constant 0 : index
      %c0_230 = arith.constant 0 : index
      %378 = vector.load %arg33[%c0_228, %c0_229, %c0_230] : memref<4x16x1xf32, #tpu.memory_space<vmem>>, vector<4x16x1xf32>
      tpu.vector_store %arg33[%c0_228, %c0_229, %c0_230], %377 {strides = array<i32>} : memref<4x16x1xf32, #tpu.memory_space<vmem>>, vector<4x16x1xf32>,
      %cst_231 = arith.constant 0.000000e+00 : f32
      %379 = vector.broadcast %cst_231 : f32 to vector<4x16x1xf32>
      %c0_232 = arith.constant 0 : index
      %c0_233 = arith.constant 0 : index
      %c0_234 = arith.constant 0 : index
      %380 = vector.load %arg34[%c0_232, %c0_233, %c0_234] : memref<4x16x1xf32, #tpu.memory_space<vmem>>, vector<4x16x1xf32>
      tpu.vector_store %arg34[%c0_232, %c0_233, %c0_234], %379 {strides = array<i32>} : memref<4x16x1xf32, #tpu.memory_space<vmem>>, vector<4x16x1xf32>,
      %cst_235 = arith.constant 0.000000e+00 : f32
      %381 = vector.broadcast %cst_235 : f32 to vector<16x128xf32>
      %c0_236 = arith.constant 0 : index
      %c0_237 = arith.constant 0 : index
      %382 = vector.load %arg35[%c0_236, %c0_237] : memref<16x128xf32, #tpu.memory_space<vmem>>, vector<16x128xf32>
      tpu.vector_store %arg35[%c0_236, %c0_237], %381 {strides = array<i32>} : memref<16x128xf32, #tpu.memory_space<vmem>>, vector<16x128xf32>,
    } else {
    }
    %3 = tpu.iota {dimensions = array<i32: 1>} : vector<64x16xi32>
    %c0 = arith.constant 0 : index
    %c0_1 = arith.constant 0 : index
    %c0_2 = arith.constant 0 : index
    %4 = vector.load %arg5[%c0, %c0_1, %c0_2] : memref<1x64x1xi32, #tpu.memory_space<vmem>>, vector<1x64x1xi32>
    %5 = vector.shape_cast %4 : vector<1x64x1xi32> to vector<64x1xi32>
    %6 = vector.broadcast %5 : vector<64x1xi32> to vector<64x16xi32>
    %7 = arith.cmpi eq, %3, %6 : vector<64x16xi32>
    %8 = arith.extui %7 : vector<64x16xi1> to vector<64x16xi32>
    %9 = arith.sitofp %8 : vector<64x16xi32> to vector<64x16xf32>
    %10 = arith.truncf %9 : vector<64x16xf32> to vector<64x16xbf16>
    %11 = tpu.iota {dimensions = array<i32: 1>} : vector<64x4xi32>
    %c0_3 = arith.constant 0 : index
    %c0_4 = arith.constant 0 : index
    %c0_5 = arith.constant 0 : index
    %12 = vector.load %arg4[%c0_3, %c0_4, %c0_5] : memref<1x64x1xi32, #tpu.memory_space<vmem>>, vector<1x64x1xi32>
    %13 = vector.shape_cast %12 : vector<1x64x1xi32> to vector<64x1xi32>
    %14 = vector.broadcast %13 : vector<64x1xi32> to vector<64x4xi32>
    %15 = arith.cmpi eq, %11, %14 : vector<64x4xi32>
    %16 = arith.extui %15 : vector<64x4xi1> to vector<64x4xi32>
    %17 = arith.sitofp %16 : vector<64x4xi32> to vector<64x4xf32>
    %18 = arith.truncf %17 : vector<64x4xf32> to vector<64x4xbf16>
    %c0_6 = arith.constant 0 : index
    %c0_7 = arith.constant 0 : index
    %c0_8 = arith.constant 0 : index
    %19 = vector.load %arg8[%c0_6, %c0_7, %c0_8] : memref<1x16x128xf32, #tpu.memory_space<vmem>>, vector<1x16x128xf32>
    %20 = vector.shape_cast %19 : vector<1x16x128xf32> to vector<16x128xf32>
    %21 = arith.truncf %20 : vector<16x128xf32> to vector<16x128xbf16>
    %cst = arith.constant dense<0.000000e+00> : vector<64x128xf32>
    %22 = tpu.matmul %10, %21, %cst {dimension_numbers = #tpu.dot_dimension_numbers<[1], [0], [0], [1], [0, 0, 1, 1], [], []>} : vector<64x16xbf16>, vector<16x128xbf16>, vector<64x128xf32> -> vector<64x128xf32>
    %23 = arith.truncf %22 : vector<64x128xf32> to vector<64x128xbf16>
    %c0_9 = arith.constant 0 : index
    %c0_10 = arith.constant 0 : index
    %c0_11 = arith.constant 0 : index
    %24 = vector.load %arg7[%c0_9, %c0_10, %c0_11] : memref<1x4x128xf32, #tpu.memory_space<vmem>>, vector<1x4x128xf32>
    %25 = vector.shape_cast %24 : vector<1x4x128xf32> to vector<4x128xf32>
    %26 = arith.truncf %25 : vector<4x128xf32> to vector<4x128xbf16>
    %cst_12 = arith.constant dense<0.000000e+00> : vector<64x128xf32>
    %27 = tpu.matmul %18, %26, %cst_12 {dimension_numbers = #tpu.dot_dimension_numbers<[1], [0], [0], [1], [0, 0, 1, 1], [], []>} : vector<64x4xbf16>, vector<4x128xbf16>, vector<64x128xf32> -> vector<64x128xf32>
    %28 = arith.truncf %27 : vector<64x128xf32> to vector<64x128xbf16>
    %c0_13 = arith.constant 0 : index
    %c0_14 = arith.constant 0 : index
    %c0_15 = arith.constant 0 : index
    %29 = vector.load %arg6[%c0_13, %c0_14, %c0_15] : memref<1x64x128xbf16, #tpu.memory_space<vmem>>, vector<1x64x128xbf16>
    %30 = vector.shape_cast %29 : vector<1x64x128xbf16> to vector<64x128xbf16>
    %c0_16 = arith.constant 0 : index
    %c0_17 = arith.constant 0 : index
    %c0_18 = arith.constant 0 : index
    %31 = vector.load %arg2[%c0_16, %c0_17, %c0_18] : memref<1x1x64xi32, #tpu.memory_space<vmem>>, vector<1x1x64xi32>
    %32 = vector.shape_cast %31 : vector<1x1x64xi32> to vector<1x64xi32>
    %33 = tpu.concatenate %23, %30 in 1 : vector<64x128xbf16>, vector<64x128xbf16> -> vector<64x256xbf16>
    %c0_19 = arith.constant 0 : index
    %c0_20 = arith.constant 0 : index
    %34 = vector.load %arg11[%c0_19, %c0_20] : memref<256x256xbf16, #tpu.memory_space<vmem>>, vector<256x256xbf16>
    %cst_21 = arith.constant dense<0.000000e+00> : vector<64x256xf32>
    %35 = tpu.matmul %33, %34, %cst_21 {dimension_numbers = #tpu.dot_dimension_numbers<[1], [0], [0], [1], [0, 0, 1, 1], [], []>} : vector<64x256xbf16>, vector<256x256xbf16>, vector<64x256xf32> -> vector<64x256xf32>
    %c0_22 = arith.constant 0 : index
    %c0_23 = arith.constant 0 : index
    %36 = vector.load %arg12[%c0_22, %c0_23] : memref<1x256xf32, #tpu.memory_space<vmem>>, vector<1x256xf32>
    %37 = vector.broadcast %36 : vector<1x256xf32> to vector<64x256xf32>
    %38 = arith.addf %35, %37 : vector<64x256xf32>
    %39 = arith.truncf %38 : vector<64x256xf32> to vector<64x256xbf16>
    %c0_24 = arith.constant 0 : index
    %c0_25 = arith.constant 0 : index
    %40 = vector.load %arg28[%c0_24, %c0_25] : memref<4x128xf32, #tpu.memory_space<vmem>>, vector<4x128xf32>
    %cst_26 = arith.constant 0.0883883461 : f32
    %41 = vector.broadcast %cst_26 : f32 to vector<4x128xf32>
    %42 = arith.mulf %40, %41 : vector<4x128xf32>
    %43 = arith.truncf %42 : vector<4x128xf32> to vector<4x128xbf16>
    %44 = tpu.iota {dimensions = array<i32: 0>} : vector<4x64xi32>
    %45 = vector.broadcast %32 : vector<1x64xi32> to vector<4x64xi32>
    %46 = arith.cmpi eq, %44, %45 : vector<4x64xi32>
    %47 = vector.extract_strided_slice %43 {offsets = [0, 0], sizes = [4, 32], strides = [1, 1]} : vector<4x128xbf16> to vector<4x32xbf16>
    %48 = vector.extract_strided_slice %39 {offsets = [0, 0], sizes = [64, 32], strides = [1, 1]} : vector<64x256xbf16> to vector<64x32xbf16>
    %cst_27 = arith.constant dense<0.000000e+00> : vector<4x64xf32>
    %49 = tpu.matmul %47, %48, %cst_27 {dimension_numbers = #tpu.dot_dimension_numbers<[1], [1], [0], [0], [0, 0, 1, 0], [], []>} : vector<4x32xbf16>, vector<64x32xbf16>, vector<4x64xf32> -> vector<4x64xf32>
    %cst_28 = arith.constant -1.000000e+10 : f32
    %50 = vector.broadcast %cst_28 : f32 to vector<4x64xf32>
    %51 = arith.select %46, %49, %50 : vector<4x64xi1>, vector<4x64xf32>
    %c0_29 = arith.constant 0 : index
    %c0_30 = arith.constant 0 : index
    %c0_31 = arith.constant 0 : index
    %52 = vector.load %arg29[%c0_29, %c0_30, %c0_31] : memref<4x4x1xf32, #tpu.memory_space<vmem>>, vector<1x4x1xf32>
    %53 = vector.shape_cast %52 : vector<1x4x1xf32> to vector<4x1xf32>
    %cst_32 = arith.constant dense<0xFF800000> : vector<4xf32>
    %54 = vector.multi_reduction <maximumf>, %51, %cst_32 [1] : vector<4x64xf32> to vector<4xf32>
    %55 = vector.shape_cast %54 : vector<4xf32> to vector<4x1xf32>
    %56 = arith.maximumf %53, %55 : vector<4x1xf32>
    %57 = arith.subf %53, %56 : vector<4x1xf32>
    %58 = math.exp %57 : vector<4x1xf32>
    %59 = vector.broadcast %56 : vector<4x1xf32> to vector<4x64xf32>
    %60 = arith.subf %51, %59 : vector<4x64xf32>
    %61 = math.exp %60 : vector<4x64xf32>
    %c0_33 = arith.constant 0 : index
    %c0_34 = arith.constant 0 : index
    %c0_35 = arith.constant 0 : index
    %62 = vector.load %arg30[%c0_33, %c0_34, %c0_35] : memref<4x4x1xf32, #tpu.memory_space<vmem>>, vector<1x4x1xf32>
    %63 = vector.shape_cast %62 : vector<1x4x1xf32> to vector<4x1xf32>
    %64 = arith.mulf %58, %63 : vector<4x1xf32>
    %cst_36 = arith.constant dense<0.000000e+00> : vector<4xf32>
    %65 = vector.multi_reduction <add>, %61, %cst_36 [1] : vector<4x64xf32> to vector<4xf32>
    %66 = vector.shape_cast %65 : vector<4xf32> to vector<4x1xf32>
    %67 = arith.addf %64, %66 : vector<4x1xf32>
    %c0_37 = arith.constant 0 : index
    %c0_38 = arith.constant 0 : index
    %c0_39 = arith.constant 0 : index
    %68 = vector.load %arg30[%c0_37, %c0_38, %c0_39] : memref<4x4x1xf32, #tpu.memory_space<vmem>>, vector<1x4x1xf32>
    %69 = vector.shape_cast %68 : vector<1x4x1xf32> to vector<4x1xf32>
    %70 = vector.shape_cast %67 : vector<4x1xf32> to vector<1x4x1xf32>
    tpu.vector_store %arg30[%c0_37, %c0_38, %c0_39], %70 {strides = array<i32>} : memref<4x4x1xf32, #tpu.memory_space<vmem>>, vector<1x4x1xf32>,
    %c0_40 = arith.constant 0 : index
    %c0_41 = arith.constant 0 : index
    %c0_42 = arith.constant 0 : index
    %71 = vector.load %arg29[%c0_40, %c0_41, %c0_42] : memref<4x4x1xf32, #tpu.memory_space<vmem>>, vector<1x4x1xf32>
    %72 = vector.shape_cast %71 : vector<1x4x1xf32> to vector<4x1xf32>
    %73 = vector.shape_cast %56 : vector<4x1xf32> to vector<1x4x1xf32>
    tpu.vector_store %arg29[%c0_40, %c0_41, %c0_42], %73 {strides = array<i32>} : memref<4x4x1xf32, #tpu.memory_space<vmem>>, vector<1x4x1xf32>,
    %74 = vector.shape_cast %58 : vector<4x1xf32> to vector<4x1xf32>
    %75 = vector.broadcast %74 : vector<4x1xf32> to vector<4x32xf32>
    %76 = arith.truncf %61 : vector<4x64xf32> to vector<4x64xbf16>
    %77 = vector.extract_strided_slice %39 {offsets = [0, 128], sizes = [64, 32], strides = [1, 1]} : vector<64x256xbf16> to vector<64x32xbf16>
    %cst_43 = arith.constant dense<0.000000e+00> : vector<4x32xf32>
    %78 = tpu.matmul %76, %77, %cst_43 {dimension_numbers = #tpu.dot_dimension_numbers<[1], [0], [0], [1], [0, 0, 1, 1], [], []>} : vector<4x64xbf16>, vector<64x32xbf16>, vector<4x32xf32> -> vector<4x32xf32>
    %79 = vector.extract_strided_slice %43 {offsets = [0, 32], sizes = [4, 32], strides = [1, 1]} : vector<4x128xbf16> to vector<4x32xbf16>
    %80 = vector.extract_strided_slice %39 {offsets = [0, 32], sizes = [64, 32], strides = [1, 1]} : vector<64x256xbf16> to vector<64x32xbf16>
    %cst_44 = arith.constant dense<0.000000e+00> : vector<4x64xf32>
    %81 = tpu.matmul %79, %80, %cst_44 {dimension_numbers = #tpu.dot_dimension_numbers<[1], [1], [0], [0], [0, 0, 1, 0], [], []>} : vector<4x32xbf16>, vector<64x32xbf16>, vector<4x64xf32> -> vector<4x64xf32>
    %cst_45 = arith.constant -1.000000e+10 : f32
    %82 = vector.broadcast %cst_45 : f32 to vector<4x64xf32>
    %83 = arith.select %46, %81, %82 : vector<4x64xi1>, vector<4x64xf32>
    %c1 = arith.constant 1 : index
    %c0_46 = arith.constant 0 : index
    %c0_47 = arith.constant 0 : index
    %84 = vector.load %arg29[%c1, %c0_46, %c0_47] : memref<4x4x1xf32, #tpu.memory_space<vmem>>, vector<1x4x1xf32>
    %85 = vector.shape_cast %84 : vector<1x4x1xf32> to vector<4x1xf32>
    %cst_48 = arith.constant dense<0xFF800000> : vector<4xf32>
    %86 = vector.multi_reduction <maximumf>, %83, %cst_48 [1] : vector<4x64xf32> to vector<4xf32>
    %87 = vector.shape_cast %86 : vector<4xf32> to vector<4x1xf32>
    %88 = arith.maximumf %85, %87 : vector<4x1xf32>
    %89 = arith.subf %85, %88 : vector<4x1xf32>
    %90 = math.exp %89 : vector<4x1xf32>
    %91 = vector.broadcast %88 : vector<4x1xf32> to vector<4x64xf32>
    %92 = arith.subf %83, %91 : vector<4x64xf32>
    %93 = math.exp %92 : vector<4x64xf32>
    %c1_49 = arith.constant 1 : index
    %c0_50 = arith.constant 0 : index
    %c0_51 = arith.constant 0 : index
    %94 = vector.load %arg30[%c1_49, %c0_50, %c0_51] : memref<4x4x1xf32, #tpu.memory_space<vmem>>, vector<1x4x1xf32>
    %95 = vector.shape_cast %94 : vector<1x4x1xf32> to vector<4x1xf32>
    %96 = arith.mulf %90, %95 : vector<4x1xf32>
    %cst_52 = arith.constant dense<0.000000e+00> : vector<4xf32>
    %97 = vector.multi_reduction <add>, %93, %cst_52 [1] : vector<4x64xf32> to vector<4xf32>
    %98 = vector.shape_cast %97 : vector<4xf32> to vector<4x1xf32>
    %99 = arith.addf %96, %98 : vector<4x1xf32>
    %c1_53 = arith.constant 1 : index
    %c0_54 = arith.constant 0 : index
    %c0_55 = arith.constant 0 : index
    %100 = vector.load %arg30[%c1_53, %c0_54, %c0_55] : memref<4x4x1xf32, #tpu.memory_space<vmem>>, vector<1x4x1xf32>
    %101 = vector.shape_cast %100 : vector<1x4x1xf32> to vector<4x1xf32>
    %102 = vector.shape_cast %99 : vector<4x1xf32> to vector<1x4x1xf32>
    tpu.vector_store %arg30[%c1_53, %c0_54, %c0_55], %102 {strides = array<i32>} : memref<4x4x1xf32, #tpu.memory_space<vmem>>, vector<1x4x1xf32>,
    %c1_56 = arith.constant 1 : index
    %c0_57 = arith.constant 0 : index
    %c0_58 = arith.constant 0 : index
    %103 = vector.load %arg29[%c1_56, %c0_57, %c0_58] : memref<4x4x1xf32, #tpu.memory_space<vmem>>, vector<1x4x1xf32>
    %104 = vector.shape_cast %103 : vector<1x4x1xf32> to vector<4x1xf32>
    %105 = vector.shape_cast %88 : vector<4x1xf32> to vector<1x4x1xf32>
    tpu.vector_store %arg29[%c1_56, %c0_57, %c0_58], %105 {strides = array<i32>} : memref<4x4x1xf32, #tpu.memory_space<vmem>>, vector<1x4x1xf32>,
    %106 = vector.shape_cast %90 : vector<4x1xf32> to vector<4x1xf32>
    %107 = vector.broadcast %106 : vector<4x1xf32> to vector<4x32xf32>
    %108 = arith.truncf %93 : vector<4x64xf32> to vector<4x64xbf16>
    %109 = vector.extract_strided_slice %39 {offsets = [0, 160], sizes = [64, 32], strides = [1, 1]} : vector<64x256xbf16> to vector<64x32xbf16>
    %cst_59 = arith.constant dense<0.000000e+00> : vector<4x32xf32>
    %110 = tpu.matmul %108, %109, %cst_59 {dimension_numbers = #tpu.dot_dimension_numbers<[1], [0], [0], [1], [0, 0, 1, 1], [], []>} : vector<4x64xbf16>, vector<64x32xbf16>, vector<4x32xf32> -> vector<4x32xf32>
    %111 = vector.extract_strided_slice %43 {offsets = [0, 64], sizes = [4, 32], strides = [1, 1]} : vector<4x128xbf16> to vector<4x32xbf16>
    %112 = vector.extract_strided_slice %39 {offsets = [0, 64], sizes = [64, 32], strides = [1, 1]} : vector<64x256xbf16> to vector<64x32xbf16>
    %cst_60 = arith.constant dense<0.000000e+00> : vector<4x64xf32>
    %113 = tpu.matmul %111, %112, %cst_60 {dimension_numbers = #tpu.dot_dimension_numbers<[1], [1], [0], [0], [0, 0, 1, 0], [], []>} : vector<4x32xbf16>, vector<64x32xbf16>, vector<4x64xf32> -> vector<4x64xf32>
    %cst_61 = arith.constant -1.000000e+10 : f32
    %114 = vector.broadcast %cst_61 : f32 to vector<4x64xf32>
    %115 = arith.select %46, %113, %114 : vector<4x64xi1>, vector<4x64xf32>
    %c2 = arith.constant 2 : index
    %c0_62 = arith.constant 0 : index
    %c0_63 = arith.constant 0 : index
    %116 = vector.load %arg29[%c2, %c0_62, %c0_63] : memref<4x4x1xf32, #tpu.memory_space<vmem>>, vector<1x4x1xf32>
    %117 = vector.shape_cast %116 : vector<1x4x1xf32> to vector<4x1xf32>
    %cst_64 = arith.constant dense<0xFF800000> : vector<4xf32>
    %118 = vector.multi_reduction <maximumf>, %115, %cst_64 [1] : vector<4x64xf32> to vector<4xf32>
    %119 = vector.shape_cast %118 : vector<4xf32> to vector<4x1xf32>
    %120 = arith.maximumf %117, %119 : vector<4x1xf32>
    %121 = arith.subf %117, %120 : vector<4x1xf32>
    %122 = math.exp %121 : vector<4x1xf32>
    %123 = vector.broadcast %120 : vector<4x1xf32> to vector<4x64xf32>
    %124 = arith.subf %115, %123 : vector<4x64xf32>
    %125 = math.exp %124 : vector<4x64xf32>
    %c2_65 = arith.constant 2 : index
    %c0_66 = arith.constant 0 : index
    %c0_67 = arith.constant 0 : index
    %126 = vector.load %arg30[%c2_65, %c0_66, %c0_67] : memref<4x4x1xf32, #tpu.memory_space<vmem>>, vector<1x4x1xf32>
    %127 = vector.shape_cast %126 : vector<1x4x1xf32> to vector<4x1xf32>
    %128 = arith.mulf %122, %127 : vector<4x1xf32>
    %cst_68 = arith.constant dense<0.000000e+00> : vector<4xf32>
    %129 = vector.multi_reduction <add>, %125, %cst_68 [1] : vector<4x64xf32> to vector<4xf32>
    %130 = vector.shape_cast %129 : vector<4xf32> to vector<4x1xf32>
    %131 = arith.addf %128, %130 : vector<4x1xf32>
    %c2_69 = arith.constant 2 : index
    %c0_70 = arith.constant 0 : index
    %c0_71 = arith.constant 0 : index
    %132 = vector.load %arg30[%c2_69, %c0_70, %c0_71] : memref<4x4x1xf32, #tpu.memory_space<vmem>>, vector<1x4x1xf32>
    %133 = vector.shape_cast %132 : vector<1x4x1xf32> to vector<4x1xf32>
    %134 = vector.shape_cast %131 : vector<4x1xf32> to vector<1x4x1xf32>
    tpu.vector_store %arg30[%c2_69, %c0_70, %c0_71], %134 {strides = array<i32>} : memref<4x4x1xf32, #tpu.memory_space<vmem>>, vector<1x4x1xf32>,
    %c2_72 = arith.constant 2 : index
    %c0_73 = arith.constant 0 : index
    %c0_74 = arith.constant 0 : index
    %135 = vector.load %arg29[%c2_72, %c0_73, %c0_74] : memref<4x4x1xf32, #tpu.memory_space<vmem>>, vector<1x4x1xf32>
    %136 = vector.shape_cast %135 : vector<1x4x1xf32> to vector<4x1xf32>
    %137 = vector.shape_cast %120 : vector<4x1xf32> to vector<1x4x1xf32>
    tpu.vector_store %arg29[%c2_72, %c0_73, %c0_74], %137 {strides = array<i32>} : memref<4x4x1xf32, #tpu.memory_space<vmem>>, vector<1x4x1xf32>,
    %138 = vector.shape_cast %122 : vector<4x1xf32> to vector<4x1xf32>
    %139 = vector.broadcast %138 : vector<4x1xf32> to vector<4x32xf32>
    %140 = arith.truncf %125 : vector<4x64xf32> to vector<4x64xbf16>
    %141 = vector.extract_strided_slice %39 {offsets = [0, 192], sizes = [64, 32], strides = [1, 1]} : vector<64x256xbf16> to vector<64x32xbf16>
    %cst_75 = arith.constant dense<0.000000e+00> : vector<4x32xf32>
    %142 = tpu.matmul %140, %141, %cst_75 {dimension_numbers = #tpu.dot_dimension_numbers<[1], [0], [0], [1], [0, 0, 1, 1], [], []>} : vector<4x64xbf16>, vector<64x32xbf16>, vector<4x32xf32> -> vector<4x32xf32>
    %143 = vector.extract_strided_slice %43 {offsets = [0, 96], sizes = [4, 32], strides = [1, 1]} : vector<4x128xbf16> to vector<4x32xbf16>
    %144 = vector.extract_strided_slice %39 {offsets = [0, 96], sizes = [64, 32], strides = [1, 1]} : vector<64x256xbf16> to vector<64x32xbf16>
    %cst_76 = arith.constant dense<0.000000e+00> : vector<4x64xf32>
    %145 = tpu.matmul %143, %144, %cst_76 {dimension_numbers = #tpu.dot_dimension_numbers<[1], [1], [0], [0], [0, 0, 1, 0], [], []>} : vector<4x32xbf16>, vector<64x32xbf16>, vector<4x64xf32> -> vector<4x64xf32>
    %cst_77 = arith.constant -1.000000e+10 : f32
    %146 = vector.broadcast %cst_77 : f32 to vector<4x64xf32>
    %147 = arith.select %46, %145, %146 : vector<4x64xi1>, vector<4x64xf32>
    %c3 = arith.constant 3 : index
    %c0_78 = arith.constant 0 : index
    %c0_79 = arith.constant 0 : index
    %148 = vector.load %arg29[%c3, %c0_78, %c0_79] : memref<4x4x1xf32, #tpu.memory_space<vmem>>, vector<1x4x1xf32>
    %149 = vector.shape_cast %148 : vector<1x4x1xf32> to vector<4x1xf32>
    %cst_80 = arith.constant dense<0xFF800000> : vector<4xf32>
    %150 = vector.multi_reduction <maximumf>, %147, %cst_80 [1] : vector<4x64xf32> to vector<4xf32>
    %151 = vector.shape_cast %150 : vector<4xf32> to vector<4x1xf32>
    %152 = arith.maximumf %149, %151 : vector<4x1xf32>
    %153 = arith.subf %149, %152 : vector<4x1xf32>
    %154 = math.exp %153 : vector<4x1xf32>
    %155 = vector.broadcast %152 : vector<4x1xf32> to vector<4x64xf32>
    %156 = arith.subf %147, %155 : vector<4x64xf32>
    %157 = math.exp %156 : vector<4x64xf32>
    %c3_81 = arith.constant 3 : index
    %c0_82 = arith.constant 0 : index
    %c0_83 = arith.constant 0 : index
    %158 = vector.load %arg30[%c3_81, %c0_82, %c0_83] : memref<4x4x1xf32, #tpu.memory_space<vmem>>, vector<1x4x1xf32>
    %159 = vector.shape_cast %158 : vector<1x4x1xf32> to vector<4x1xf32>
    %160 = arith.mulf %154, %159 : vector<4x1xf32>
    %cst_84 = arith.constant dense<0.000000e+00> : vector<4xf32>
    %161 = vector.multi_reduction <add>, %157, %cst_84 [1] : vector<4x64xf32> to vector<4xf32>
    %162 = vector.shape_cast %161 : vector<4xf32> to vector<4x1xf32>
    %163 = arith.addf %160, %162 : vector<4x1xf32>
    %c3_85 = arith.constant 3 : index
    %c0_86 = arith.constant 0 : index
    %c0_87 = arith.constant 0 : index
    %164 = vector.load %arg30[%c3_85, %c0_86, %c0_87] : memref<4x4x1xf32, #tpu.memory_space<vmem>>, vector<1x4x1xf32>
    %165 = vector.shape_cast %164 : vector<1x4x1xf32> to vector<4x1xf32>
    %166 = vector.shape_cast %163 : vector<4x1xf32> to vector<1x4x1xf32>
    tpu.vector_store %arg30[%c3_85, %c0_86, %c0_87], %166 {strides = array<i32>} : memref<4x4x1xf32, #tpu.memory_space<vmem>>, vector<1x4x1xf32>,
    %c3_88 = arith.constant 3 : index
    %c0_89 = arith.constant 0 : index
    %c0_90 = arith.constant 0 : index
    %167 = vector.load %arg29[%c3_88, %c0_89, %c0_90] : memref<4x4x1xf32, #tpu.memory_space<vmem>>, vector<1x4x1xf32>
    %168 = vector.shape_cast %167 : vector<1x4x1xf32> to vector<4x1xf32>
    %169 = vector.shape_cast %152 : vector<4x1xf32> to vector<1x4x1xf32>
    tpu.vector_store %arg29[%c3_88, %c0_89, %c0_90], %169 {strides = array<i32>} : memref<4x4x1xf32, #tpu.memory_space<vmem>>, vector<1x4x1xf32>,
    %170 = vector.shape_cast %154 : vector<4x1xf32> to vector<4x1xf32>
    %171 = vector.broadcast %170 : vector<4x1xf32> to vector<4x32xf32>
    %172 = arith.truncf %157 : vector<4x64xf32> to vector<4x64xbf16>
    %173 = vector.extract_strided_slice %39 {offsets = [0, 224], sizes = [64, 32], strides = [1, 1]} : vector<64x256xbf16> to vector<64x32xbf16>
    %cst_91 = arith.constant dense<0.000000e+00> : vector<4x32xf32>
    %174 = tpu.matmul %172, %173, %cst_91 {dimension_numbers = #tpu.dot_dimension_numbers<[1], [0], [0], [1], [0, 0, 1, 1], [], []>} : vector<4x64xbf16>, vector<64x32xbf16>, vector<4x32xf32> -> vector<4x32xf32>
    %175 = tpu.concatenate %75, %107, %139, %171 in 1 : vector<4x32xf32>, vector<4x32xf32>, vector<4x32xf32>, vector<4x32xf32> -> vector<4x128xf32>
    %c0_92 = arith.constant 0 : index
    %c0_93 = arith.constant 0 : index
    %176 = vector.load %arg31[%c0_92, %c0_93] : memref<4x128xf32, #tpu.memory_space<vmem>>, vector<4x128xf32>
    %177 = arith.mulf %175, %176 : vector<4x128xf32>
    %178 = tpu.concatenate %78, %110, %142, %174 in 1 : vector<4x32xf32>, vector<4x32xf32>, vector<4x32xf32>, vector<4x32xf32> -> vector<4x128xf32>
    %179 = arith.addf %177, %178 : vector<4x128xf32>
    %c0_94 = arith.constant 0 : index
    %c0_95 = arith.constant 0 : index
    %180 = vector.load %arg31[%c0_94, %c0_95] : memref<4x128xf32, #tpu.memory_space<vmem>>, vector<4x128xf32>
    tpu.vector_store %arg31[%c0_94, %c0_95], %179 {strides = array<i32>} : memref<4x128xf32, #tpu.memory_space<vmem>>, vector<4x128xf32>,
    %c0_96 = arith.constant 0 : index
    %c0_97 = arith.constant 0 : index
    %c0_98 = arith.constant 0 : index
    %181 = vector.load %arg3[%c0_96, %c0_97, %c0_98] : memref<1x1x64xi32, #tpu.memory_space<vmem>>, vector<1x1x64xi32>
    %182 = vector.shape_cast %181 : vector<1x1x64xi32> to vector<1x64xi32>
    %183 = tpu.concatenate %28, %30 in 1 : vector<64x128xbf16>, vector<64x128xbf16> -> vector<64x256xbf16>
    %c0_99 = arith.constant 0 : index
    %c0_100 = arith.constant 0 : index
    %184 = vector.load %arg17[%c0_99, %c0_100] : memref<256x256xbf16, #tpu.memory_space<vmem>>, vector<256x256xbf16>
    %cst_101 = arith.constant dense<0.000000e+00> : vector<64x256xf32>
    %185 = tpu.matmul %183, %184, %cst_101 {dimension_numbers = #tpu.dot_dimension_numbers<[1], [0], [0], [1], [0, 0, 1, 1], [], []>} : vector<64x256xbf16>, vector<256x256xbf16>, vector<64x256xf32> -> vector<64x256xf32>
    %c0_102 = arith.constant 0 : index
    %c0_103 = arith.constant 0 : index
    %186 = vector.load %arg18[%c0_102, %c0_103] : memref<1x256xf32, #tpu.memory_space<vmem>>, vector<1x256xf32>
    %187 = vector.broadcast %186 : vector<1x256xf32> to vector<64x256xf32>
    %188 = arith.addf %185, %187 : vector<64x256xf32>
    %189 = arith.truncf %188 : vector<64x256xf32> to vector<64x256xbf16>
    %c0_104 = arith.constant 0 : index
    %c0_105 = arith.constant 0 : index
    %190 = vector.load %arg32[%c0_104, %c0_105] : memref<16x128xf32, #tpu.memory_space<vmem>>, vector<16x128xf32>
    %cst_106 = arith.constant 0.0883883461 : f32
    %191 = vector.broadcast %cst_106 : f32 to vector<16x128xf32>
    %192 = arith.mulf %190, %191 : vector<16x128xf32>
    %193 = arith.truncf %192 : vector<16x128xf32> to vector<16x128xbf16>
    %194 = tpu.iota {dimensions = array<i32: 0>} : vector<16x64xi32>
    %195 = vector.broadcast %182 : vector<1x64xi32> to vector<16x64xi32>
    %196 = arith.cmpi eq, %194, %195 : vector<16x64xi32>
    %197 = vector.extract_strided_slice %193 {offsets = [0, 0], sizes = [16, 32], strides = [1, 1]} : vector<16x128xbf16> to vector<16x32xbf16>
    %198 = vector.extract_strided_slice %189 {offsets = [0, 0], sizes = [64, 32], strides = [1, 1]} : vector<64x256xbf16> to vector<64x32xbf16>
    %cst_107 = arith.constant dense<0.000000e+00> : vector<16x64xf32>
    %199 = tpu.matmul %197, %198, %cst_107 {dimension_numbers = #tpu.dot_dimension_numbers<[1], [1], [0], [0], [0, 0, 1, 0], [], []>} : vector<16x32xbf16>, vector<64x32xbf16>, vector<16x64xf32> -> vector<16x64xf32>
    %cst_108 = arith.constant -1.000000e+10 : f32
    %200 = vector.broadcast %cst_108 : f32 to vector<16x64xf32>
    %201 = arith.select %196, %199, %200 : vector<16x64xi1>, vector<16x64xf32>
    %c0_109 = arith.constant 0 : index
    %c0_110 = arith.constant 0 : index
    %c0_111 = arith.constant 0 : index
    %202 = vector.load %arg33[%c0_109, %c0_110, %c0_111] : memref<4x16x1xf32, #tpu.memory_space<vmem>>, vector<1x16x1xf32>
    %203 = vector.shape_cast %202 : vector<1x16x1xf32> to vector<16x1xf32>
    %cst_112 = arith.constant dense<0xFF800000> : vector<16xf32>
    %204 = vector.multi_reduction <maximumf>, %201, %cst_112 [1] : vector<16x64xf32> to vector<16xf32>
    %205 = vector.shape_cast %204 : vector<16xf32> to vector<16x1xf32>
    %206 = arith.maximumf %203, %205 : vector<16x1xf32>
    %207 = arith.subf %203, %206 : vector<16x1xf32>
    %208 = math.exp %207 : vector<16x1xf32>
    %209 = vector.broadcast %206 : vector<16x1xf32> to vector<16x64xf32>
    %210 = arith.subf %201, %209 : vector<16x64xf32>
    %211 = math.exp %210 : vector<16x64xf32>
    %c0_113 = arith.constant 0 : index
    %c0_114 = arith.constant 0 : index
    %c0_115 = arith.constant 0 : index
    %212 = vector.load %arg34[%c0_113, %c0_114, %c0_115] : memref<4x16x1xf32, #tpu.memory_space<vmem>>, vector<1x16x1xf32>
    %213 = vector.shape_cast %212 : vector<1x16x1xf32> to vector<16x1xf32>
    %214 = arith.mulf %208, %213 : vector<16x1xf32>
    %cst_116 = arith.constant dense<0.000000e+00> : vector<16xf32>
    %215 = vector.multi_reduction <add>, %211, %cst_116 [1] : vector<16x64xf32> to vector<16xf32>
    %216 = vector.shape_cast %215 : vector<16xf32> to vector<16x1xf32>
    %217 = arith.addf %214, %216 : vector<16x1xf32>
    %c0_117 = arith.constant 0 : index
    %c0_118 = arith.constant 0 : index
    %c0_119 = arith.constant 0 : index
    %218 = vector.load %arg34[%c0_117, %c0_118, %c0_119] : memref<4x16x1xf32, #tpu.memory_space<vmem>>, vector<1x16x1xf32>
    %219 = vector.shape_cast %218 : vector<1x16x1xf32> to vector<16x1xf32>
    %220 = vector.shape_cast %217 : vector<16x1xf32> to vector<1x16x1xf32>
    tpu.vector_store %arg34[%c0_117, %c0_118, %c0_119], %220 {strides = array<i32>} : memref<4x16x1xf32, #tpu.memory_space<vmem>>, vector<1x16x1xf32>,
    %c0_120 = arith.constant 0 : index
    %c0_121 = arith.constant 0 : index
    %c0_122 = arith.constant 0 : index
    %221 = vector.load %arg33[%c0_120, %c0_121, %c0_122] : memref<4x16x1xf32, #tpu.memory_space<vmem>>, vector<1x16x1xf32>
    %222 = vector.shape_cast %221 : vector<1x16x1xf32> to vector<16x1xf32>
    %223 = vector.shape_cast %206 : vector<16x1xf32> to vector<1x16x1xf32>
    tpu.vector_store %arg33[%c0_120, %c0_121, %c0_122], %223 {strides = array<i32>} : memref<4x16x1xf32, #tpu.memory_space<vmem>>, vector<1x16x1xf32>,
    %224 = vector.shape_cast %208 : vector<16x1xf32> to vector<16x1xf32>
    %225 = vector.broadcast %224 : vector<16x1xf32> to vector<16x32xf32>
    %226 = arith.truncf %211 : vector<16x64xf32> to vector<16x64xbf16>
    %227 = vector.extract_strided_slice %189 {offsets = [0, 128], sizes = [64, 32], strides = [1, 1]} : vector<64x256xbf16> to vector<64x32xbf16>
    %cst_123 = arith.constant dense<0.000000e+00> : vector<16x32xf32>
    %228 = tpu.matmul %226, %227, %cst_123 {dimension_numbers = #tpu.dot_dimension_numbers<[1], [0], [0], [1], [0, 0, 1, 1], [], []>} : vector<16x64xbf16>, vector<64x32xbf16>, vector<16x32xf32> -> vector<16x32xf32>
    %229 = vector.extract_strided_slice %193 {offsets = [0, 32], sizes = [16, 32], strides = [1, 1]} : vector<16x128xbf16> to vector<16x32xbf16>
    %230 = vector.extract_strided_slice %189 {offsets = [0, 32], sizes = [64, 32], strides = [1, 1]} : vector<64x256xbf16> to vector<64x32xbf16>
    %cst_124 = arith.constant dense<0.000000e+00> : vector<16x64xf32>
    %231 = tpu.matmul %229, %230, %cst_124 {dimension_numbers = #tpu.dot_dimension_numbers<[1], [1], [0], [0], [0, 0, 1, 0], [], []>} : vector<16x32xbf16>, vector<64x32xbf16>, vector<16x64xf32> -> vector<16x64xf32>
    %cst_125 = arith.constant -1.000000e+10 : f32
    %232 = vector.broadcast %cst_125 : f32 to vector<16x64xf32>
    %233 = arith.select %196, %231, %232 : vector<16x64xi1>, vector<16x64xf32>
    %c1_126 = arith.constant 1 : index
    %c0_127 = arith.constant 0 : index
    %c0_128 = arith.constant 0 : index
    %234 = vector.load %arg33[%c1_126, %c0_127, %c0_128] : memref<4x16x1xf32, #tpu.memory_space<vmem>>, vector<1x16x1xf32>
    %235 = vector.shape_cast %234 : vector<1x16x1xf32> to vector<16x1xf32>
    %cst_129 = arith.constant dense<0xFF800000> : vector<16xf32>
    %236 = vector.multi_reduction <maximumf>, %233, %cst_129 [1] : vector<16x64xf32> to vector<16xf32>
    %237 = vector.shape_cast %236 : vector<16xf32> to vector<16x1xf32>
    %238 = arith.maximumf %235, %237 : vector<16x1xf32>
    %239 = arith.subf %235, %238 : vector<16x1xf32>
    %240 = math.exp %239 : vector<16x1xf32>
    %241 = vector.broadcast %238 : vector<16x1xf32> to vector<16x64xf32>
    %242 = arith.subf %233, %241 : vector<16x64xf32>
    %243 = math.exp %242 : vector<16x64xf32>
    %c1_130 = arith.constant 1 : index
    %c0_131 = arith.constant 0 : index
    %c0_132 = arith.constant 0 : index
    %244 = vector.load %arg34[%c1_130, %c0_131, %c0_132] : memref<4x16x1xf32, #tpu.memory_space<vmem>>, vector<1x16x1xf32>
    %245 = vector.shape_cast %244 : vector<1x16x1xf32> to vector<16x1xf32>
    %246 = arith.mulf %240, %245 : vector<16x1xf32>
    %cst_133 = arith.constant dense<0.000000e+00> : vector<16xf32>
    %247 = vector.multi_reduction <add>, %243, %cst_133 [1] : vector<16x64xf32> to vector<16xf32>
    %248 = vector.shape_cast %247 : vector<16xf32> to vector<16x1xf32>
    %249 = arith.addf %246, %248 : vector<16x1xf32>
    %c1_134 = arith.constant 1 : index
    %c0_135 = arith.constant 0 : index
    %c0_136 = arith.constant 0 : index
    %250 = vector.load %arg34[%c1_134, %c0_135, %c0_136] : memref<4x16x1xf32, #tpu.memory_space<vmem>>, vector<1x16x1xf32>
    %251 = vector.shape_cast %250 : vector<1x16x1xf32> to vector<16x1xf32>
    %252 = vector.shape_cast %249 : vector<16x1xf32> to vector<1x16x1xf32>
    tpu.vector_store %arg34[%c1_134, %c0_135, %c0_136], %252 {strides = array<i32>} : memref<4x16x1xf32, #tpu.memory_space<vmem>>, vector<1x16x1xf32>,
    %c1_137 = arith.constant 1 : index
    %c0_138 = arith.constant 0 : index
    %c0_139 = arith.constant 0 : index
    %253 = vector.load %arg33[%c1_137, %c0_138, %c0_139] : memref<4x16x1xf32, #tpu.memory_space<vmem>>, vector<1x16x1xf32>
    %254 = vector.shape_cast %253 : vector<1x16x1xf32> to vector<16x1xf32>
    %255 = vector.shape_cast %238 : vector<16x1xf32> to vector<1x16x1xf32>
    tpu.vector_store %arg33[%c1_137, %c0_138, %c0_139], %255 {strides = array<i32>} : memref<4x16x1xf32, #tpu.memory_space<vmem>>, vector<1x16x1xf32>,
    %256 = vector.shape_cast %240 : vector<16x1xf32> to vector<16x1xf32>
    %257 = vector.broadcast %256 : vector<16x1xf32> to vector<16x32xf32>
    %258 = arith.truncf %243 : vector<16x64xf32> to vector<16x64xbf16>
    %259 = vector.extract_strided_slice %189 {offsets = [0, 160], sizes = [64, 32], strides = [1, 1]} : vector<64x256xbf16> to vector<64x32xbf16>
    %cst_140 = arith.constant dense<0.000000e+00> : vector<16x32xf32>
    %260 = tpu.matmul %258, %259, %cst_140 {dimension_numbers = #tpu.dot_dimension_numbers<[1], [0], [0], [1], [0, 0, 1, 1], [], []>} : vector<16x64xbf16>, vector<64x32xbf16>, vector<16x32xf32> -> vector<16x32xf32>
    %261 = vector.extract_strided_slice %193 {offsets = [0, 64], sizes = [16, 32], strides = [1, 1]} : vector<16x128xbf16> to vector<16x32xbf16>
    %262 = vector.extract_strided_slice %189 {offsets = [0, 64], sizes = [64, 32], strides = [1, 1]} : vector<64x256xbf16> to vector<64x32xbf16>
    %cst_141 = arith.constant dense<0.000000e+00> : vector<16x64xf32>
    %263 = tpu.matmul %261, %262, %cst_141 {dimension_numbers = #tpu.dot_dimension_numbers<[1], [1], [0], [0], [0, 0, 1, 0], [], []>} : vector<16x32xbf16>, vector<64x32xbf16>, vector<16x64xf32> -> vector<16x64xf32>
    %cst_142 = arith.constant -1.000000e+10 : f32
    %264 = vector.broadcast %cst_142 : f32 to vector<16x64xf32>
    %265 = arith.select %196, %263, %264 : vector<16x64xi1>, vector<16x64xf32>
    %c2_143 = arith.constant 2 : index
    %c0_144 = arith.constant 0 : index
    %c0_145 = arith.constant 0 : index
    %266 = vector.load %arg33[%c2_143, %c0_144, %c0_145] : memref<4x16x1xf32, #tpu.memory_space<vmem>>, vector<1x16x1xf32>
    %267 = vector.shape_cast %266 : vector<1x16x1xf32> to vector<16x1xf32>
    %cst_146 = arith.constant dense<0xFF800000> : vector<16xf32>
    %268 = vector.multi_reduction <maximumf>, %265, %cst_146 [1] : vector<16x64xf32> to vector<16xf32>
    %269 = vector.shape_cast %268 : vector<16xf32> to vector<16x1xf32>
    %270 = arith.maximumf %267, %269 : vector<16x1xf32>
    %271 = arith.subf %267, %270 : vector<16x1xf32>
    %272 = math.exp %271 : vector<16x1xf32>
    %273 = vector.broadcast %270 : vector<16x1xf32> to vector<16x64xf32>
    %274 = arith.subf %265, %273 : vector<16x64xf32>
    %275 = math.exp %274 : vector<16x64xf32>
    %c2_147 = arith.constant 2 : index
    %c0_148 = arith.constant 0 : index
    %c0_149 = arith.constant 0 : index
    %276 = vector.load %arg34[%c2_147, %c0_148, %c0_149] : memref<4x16x1xf32, #tpu.memory_space<vmem>>, vector<1x16x1xf32>
    %277 = vector.shape_cast %276 : vector<1x16x1xf32> to vector<16x1xf32>
    %278 = arith.mulf %272, %277 : vector<16x1xf32>
    %cst_150 = arith.constant dense<0.000000e+00> : vector<16xf32>
    %279 = vector.multi_reduction <add>, %275, %cst_150 [1] : vector<16x64xf32> to vector<16xf32>
    %280 = vector.shape_cast %279 : vector<16xf32> to vector<16x1xf32>
    %281 = arith.addf %278, %280 : vector<16x1xf32>
    %c2_151 = arith.constant 2 : index
    %c0_152 = arith.constant 0 : index
    %c0_153 = arith.constant 0 : index
    %282 = vector.load %arg34[%c2_151, %c0_152, %c0_153] : memref<4x16x1xf32, #tpu.memory_space<vmem>>, vector<1x16x1xf32>
    %283 = vector.shape_cast %282 : vector<1x16x1xf32> to vector<16x1xf32>
    %284 = vector.shape_cast %281 : vector<16x1xf32> to vector<1x16x1xf32>
    tpu.vector_store %arg34[%c2_151, %c0_152, %c0_153], %284 {strides = array<i32>} : memref<4x16x1xf32, #tpu.memory_space<vmem>>, vector<1x16x1xf32>,
    %c2_154 = arith.constant 2 : index
    %c0_155 = arith.constant 0 : index
    %c0_156 = arith.constant 0 : index
    %285 = vector.load %arg33[%c2_154, %c0_155, %c0_156] : memref<4x16x1xf32, #tpu.memory_space<vmem>>, vector<1x16x1xf32>
    %286 = vector.shape_cast %285 : vector<1x16x1xf32> to vector<16x1xf32>
    %287 = vector.shape_cast %270 : vector<16x1xf32> to vector<1x16x1xf32>
    tpu.vector_store %arg33[%c2_154, %c0_155, %c0_156], %287 {strides = array<i32>} : memref<4x16x1xf32, #tpu.memory_space<vmem>>, vector<1x16x1xf32>,
    %288 = vector.shape_cast %272 : vector<16x1xf32> to vector<16x1xf32>
    %289 = vector.broadcast %288 : vector<16x1xf32> to vector<16x32xf32>
    %290 = arith.truncf %275 : vector<16x64xf32> to vector<16x64xbf16>
    %291 = vector.extract_strided_slice %189 {offsets = [0, 192], sizes = [64, 32], strides = [1, 1]} : vector<64x256xbf16> to vector<64x32xbf16>
    %cst_157 = arith.constant dense<0.000000e+00> : vector<16x32xf32>
    %292 = tpu.matmul %290, %291, %cst_157 {dimension_numbers = #tpu.dot_dimension_numbers<[1], [0], [0], [1], [0, 0, 1, 1], [], []>} : vector<16x64xbf16>, vector<64x32xbf16>, vector<16x32xf32> -> vector<16x32xf32>
    %293 = vector.extract_strided_slice %193 {offsets = [0, 96], sizes = [16, 32], strides = [1, 1]} : vector<16x128xbf16> to vector<16x32xbf16>
    %294 = vector.extract_strided_slice %189 {offsets = [0, 96], sizes = [64, 32], strides = [1, 1]} : vector<64x256xbf16> to vector<64x32xbf16>
    %cst_158 = arith.constant dense<0.000000e+00> : vector<16x64xf32>
    %295 = tpu.matmul %293, %294, %cst_158 {dimension_numbers = #tpu.dot_dimension_numbers<[1], [1], [0], [0], [0, 0, 1, 0], [], []>} : vector<16x32xbf16>, vector<64x32xbf16>, vector<16x64xf32> -> vector<16x64xf32>
    %cst_159 = arith.constant -1.000000e+10 : f32
    %296 = vector.broadcast %cst_159 : f32 to vector<16x64xf32>
    %297 = arith.select %196, %295, %296 : vector<16x64xi1>, vector<16x64xf32>
    %c3_160 = arith.constant 3 : index
    %c0_161 = arith.constant 0 : index
    %c0_162 = arith.constant 0 : index
    %298 = vector.load %arg33[%c3_160, %c0_161, %c0_162] : memref<4x16x1xf32, #tpu.memory_space<vmem>>, vector<1x16x1xf32>
    %299 = vector.shape_cast %298 : vector<1x16x1xf32> to vector<16x1xf32>
    %cst_163 = arith.constant dense<0xFF800000> : vector<16xf32>
    %300 = vector.multi_reduction <maximumf>, %297, %cst_163 [1] : vector<16x64xf32> to vector<16xf32>
    %301 = vector.shape_cast %300 : vector<16xf32> to vector<16x1xf32>
    %302 = arith.maximumf %299, %301 : vector<16x1xf32>
    %303 = arith.subf %299, %302 : vector<16x1xf32>
    %304 = math.exp %303 : vector<16x1xf32>
    %305 = vector.broadcast %302 : vector<16x1xf32> to vector<16x64xf32>
    %306 = arith.subf %297, %305 : vector<16x64xf32>
    %307 = math.exp %306 : vector<16x64xf32>
    %c3_164 = arith.constant 3 : index
    %c0_165 = arith.constant 0 : index
    %c0_166 = arith.constant 0 : index
    %308 = vector.load %arg34[%c3_164, %c0_165, %c0_166] : memref<4x16x1xf32, #tpu.memory_space<vmem>>, vector<1x16x1xf32>
    %309 = vector.shape_cast %308 : vector<1x16x1xf32> to vector<16x1xf32>
    %310 = arith.mulf %304, %309 : vector<16x1xf32>
    %cst_167 = arith.constant dense<0.000000e+00> : vector<16xf32>
    %311 = vector.multi_reduction <add>, %307, %cst_167 [1] : vector<16x64xf32> to vector<16xf32>
    %312 = vector.shape_cast %311 : vector<16xf32> to vector<16x1xf32>
    %313 = arith.addf %310, %312 : vector<16x1xf32>
    %c3_168 = arith.constant 3 : index
    %c0_169 = arith.constant 0 : index
    %c0_170 = arith.constant 0 : index
    %314 = vector.load %arg34[%c3_168, %c0_169, %c0_170] : memref<4x16x1xf32, #tpu.memory_space<vmem>>, vector<1x16x1xf32>
    %315 = vector.shape_cast %314 : vector<1x16x1xf32> to vector<16x1xf32>
    %316 = vector.shape_cast %313 : vector<16x1xf32> to vector<1x16x1xf32>
    tpu.vector_store %arg34[%c3_168, %c0_169, %c0_170], %316 {strides = array<i32>} : memref<4x16x1xf32, #tpu.memory_space<vmem>>, vector<1x16x1xf32>,
    %c3_171 = arith.constant 3 : index
    %c0_172 = arith.constant 0 : index
    %c0_173 = arith.constant 0 : index
    %317 = vector.load %arg33[%c3_171, %c0_172, %c0_173] : memref<4x16x1xf32, #tpu.memory_space<vmem>>, vector<1x16x1xf32>
    %318 = vector.shape_cast %317 : vector<1x16x1xf32> to vector<16x1xf32>
    %319 = vector.shape_cast %302 : vector<16x1xf32> to vector<1x16x1xf32>
    tpu.vector_store %arg33[%c3_171, %c0_172, %c0_173], %319 {strides = array<i32>} : memref<4x16x1xf32, #tpu.memory_space<vmem>>, vector<1x16x1xf32>,
    %320 = vector.shape_cast %304 : vector<16x1xf32> to vector<16x1xf32>
    %321 = vector.broadcast %320 : vector<16x1xf32> to vector<16x32xf32>
    %322 = arith.truncf %307 : vector<16x64xf32> to vector<16x64xbf16>
    %323 = vector.extract_strided_slice %189 {offsets = [0, 224], sizes = [64, 32], strides = [1, 1]} : vector<64x256xbf16> to vector<64x32xbf16>
    %cst_174 = arith.constant dense<0.000000e+00> : vector<16x32xf32>
    %324 = tpu.matmul %322, %323, %cst_174 {dimension_numbers = #tpu.dot_dimension_numbers<[1], [0], [0], [1], [0, 0, 1, 1], [], []>} : vector<16x64xbf16>, vector<64x32xbf16>, vector<16x32xf32> -> vector<16x32xf32>
    %325 = tpu.concatenate %225, %257, %289, %321 in 1 : vector<16x32xf32>, vector<16x32xf32>, vector<16x32xf32>, vector<16x32xf32> -> vector<16x128xf32>
    %c0_175 = arith.constant 0 : index
    %c0_176 = arith.constant 0 : index
    %326 = vector.load %arg35[%c0_175, %c0_176] : memref<16x128xf32, #tpu.memory_space<vmem>>, vector<16x128xf32>
    %327 = arith.mulf %325, %326 : vector<16x128xf32>
    %328 = tpu.concatenate %228, %260, %292, %324 in 1 : vector<16x32xf32>, vector<16x32xf32>, vector<16x32xf32>, vector<16x32xf32> -> vector<16x128xf32>
    %329 = arith.addf %327, %328 : vector<16x128xf32>
    %c0_177 = arith.constant 0 : index
    %c0_178 = arith.constant 0 : index
    %330 = vector.load %arg35[%c0_177, %c0_178] : memref<16x128xf32, #tpu.memory_space<vmem>>, vector<16x128xf32>
    tpu.vector_store %arg35[%c0_177, %c0_178], %329 {strides = array<i32>} : memref<16x128xf32, #tpu.memory_space<vmem>>, vector<16x128xf32>,
    %c0_179 = arith.constant 0 : index
    %c0_180 = arith.constant 0 : index
    %331 = vector.load %arg21[%c0_179, %c0_180] : memref<128x128xbf16, #tpu.memory_space<vmem>>, vector<128x128xbf16>
    %cst_181 = arith.constant dense<0.000000e+00> : vector<64x128xf32>
    %332 = tpu.matmul %30, %331, %cst_181 {dimension_numbers = #tpu.dot_dimension_numbers<[1], [0], [0], [1], [0, 0, 1, 1], [], []>} : vector<64x128xbf16>, vector<128x128xbf16>, vector<64x128xf32> -> vector<64x128xf32>
    %c0_182 = arith.constant 0 : index
    %c0_183 = arith.constant 0 : index
    %333 = vector.load %arg22[%c0_182, %c0_183] : memref<128x128xbf16, #tpu.memory_space<vmem>>, vector<128x128xbf16>
    %cst_184 = arith.constant dense<0.000000e+00> : vector<64x128xf32>
    %334 = tpu.matmul %23, %333, %cst_184 {dimension_numbers = #tpu.dot_dimension_numbers<[1], [0], [0], [1], [0, 0, 1, 1], [], []>} : vector<64x128xbf16>, vector<128x128xbf16>, vector<64x128xf32> -> vector<64x128xf32>
    %335 = arith.addf %332, %334 : vector<64x128xf32>
    %c0_185 = arith.constant 0 : index
    %c0_186 = arith.constant 0 : index
    %336 = vector.load %arg23[%c0_185, %c0_186] : memref<128x128xbf16, #tpu.memory_space<vmem>>, vector<128x128xbf16>
    %cst_187 = arith.constant dense<0.000000e+00> : vector<64x128xf32>
    %337 = tpu.matmul %28, %336, %cst_187 {dimension_numbers = #tpu.dot_dimension_numbers<[1], [0], [0], [1], [0, 0, 1, 1], [], []>} : vector<64x128xbf16>, vector<128x128xbf16>, vector<64x128xf32> -> vector<64x128xf32>
    %338 = arith.addf %335, %337 : vector<64x128xf32>
    %c0_188 = arith.constant 0 : index
    %c0_189 = arith.constant 0 : index
    %339 = vector.load %arg24[%c0_188, %c0_189] : memref<1x128xf32, #tpu.memory_space<vmem>>, vector<1x128xf32>
    %340 = vector.broadcast %339 : vector<1x128xf32> to vector<64x128xf32>
    %341 = arith.addf %338, %340 : vector<64x128xf32>
    %cst_190 = arith.constant 0.000000e+00 : f32
    %342 = vector.broadcast %cst_190 : f32 to vector<64x128xf32>
    %343 = arith.maximumf %341, %342 : vector<64x128xf32>
    %344 = arith.extf %30 : vector<64x128xbf16> to vector<64x128xf32>
    %345 = arith.addf %343, %344 : vector<64x128xf32>
    %346 = arith.truncf %345 : vector<64x128xf32> to vector<64x128xbf16>
    %c0_191 = arith.constant 0 : index
    %c0_192 = arith.constant 0 : index
    %c0_193 = arith.constant 0 : index
    %347 = vector.load %arg27[%c0_191, %c0_192, %c0_193] : memref<1x64x128xbf16, #tpu.memory_space<vmem>>, vector<1x64x128xbf16>
    %348 = vector.shape_cast %347 : vector<1x64x128xbf16> to vector<64x128xbf16>
    %349 = vector.shape_cast %346 : vector<64x128xbf16> to vector<1x64x128xbf16>
    tpu.vector_store %arg27[%c0_191, %c0_192, %c0_193], %349 {strides = array<i32>} : memref<1x64x128xbf16, #tpu.memory_space<vmem>>, vector<1x64x128xbf16>,
    %c0_i32_194 = arith.constant 0 : i32
    %350 = arith.cmpi eq, %arg1, %c0_i32_194 : i32
    %351 = arith.extui %350 : i1 to i32
    %c0_i32_195 = arith.constant 0 : i32
    %352 = arith.cmpi ne, %351, %c0_i32_195 : i32
    scf.if %352 {
      %c0_196 = arith.constant 0 : index
      %c0_197 = arith.constant 0 : index
      %c0_198 = arith.constant 0 : index
      %353 = vector.load %arg30[%c0_196, %c0_197, %c0_198] : memref<4x4x1xf32, #tpu.memory_space<vmem>>, vector<1x4x1xf32>
      %354 = vector.shape_cast %353 : vector<1x4x1xf32> to vector<4x1xf32>
      %355 = tpu.reciprocal %354 {approx = true} : vector<4x1xf32> -> vector<4x1xf32>
      %356 = vector.shape_cast %355 : vector<4x1xf32> to vector<4x1xf32>
      %357 = vector.broadcast %356 : vector<4x1xf32> to vector<4x32xf32>
      %c1_199 = arith.constant 1 : index
      %c0_200 = arith.constant 0 : index
      %c0_201 = arith.constant 0 : index
      %358 = vector.load %arg30[%c1_199, %c0_200, %c0_201] : memref<4x4x1xf32, #tpu.memory_space<vmem>>, vector<1x4x1xf32>
      %359 = vector.shape_cast %358 : vector<1x4x1xf32> to vector<4x1xf32>
      %360 = tpu.reciprocal %359 {approx = true} : vector<4x1xf32> -> vector<4x1xf32>
      %361 = vector.shape_cast %360 : vector<4x1xf32> to vector<4x1xf32>
      %362 = vector.broadcast %361 : vector<4x1xf32> to vector<4x32xf32>
      %c2_202 = arith.constant 2 : index
      %c0_203 = arith.constant 0 : index
      %c0_204 = arith.constant 0 : index
      %363 = vector.load %arg30[%c2_202, %c0_203, %c0_204] : memref<4x4x1xf32, #tpu.memory_space<vmem>>, vector<1x4x1xf32>
      %364 = vector.shape_cast %363 : vector<1x4x1xf32> to vector<4x1xf32>
      %365 = tpu.reciprocal %364 {approx = true} : vector<4x1xf32> -> vector<4x1xf32>
      %366 = vector.shape_cast %365 : vector<4x1xf32> to vector<4x1xf32>
      %367 = vector.broadcast %366 : vector<4x1xf32> to vector<4x32xf32>
      %c3_205 = arith.constant 3 : index
      %c0_206 = arith.constant 0 : index
      %c0_207 = arith.constant 0 : index
      %368 = vector.load %arg30[%c3_205, %c0_206, %c0_207] : memref<4x4x1xf32, #tpu.memory_space<vmem>>, vector<1x4x1xf32>
      %369 = vector.shape_cast %368 : vector<1x4x1xf32> to vector<4x1xf32>
      %370 = tpu.reciprocal %369 {approx = true} : vector<4x1xf32> -> vector<4x1xf32>
      %371 = vector.shape_cast %370 : vector<4x1xf32> to vector<4x1xf32>
      %372 = vector.broadcast %371 : vector<4x1xf32> to vector<4x32xf32>
      %373 = tpu.concatenate %357, %362, %367, %372 in 1 : vector<4x32xf32>, vector<4x32xf32>, vector<4x32xf32>, vector<4x32xf32> -> vector<4x128xf32>
      %c0_208 = arith.constant 0 : index
      %c0_209 = arith.constant 0 : index
      %374 = vector.load %arg28[%c0_208, %c0_209] : memref<4x128xf32, #tpu.memory_space<vmem>>, vector<4x128xf32>
      %c0_210 = arith.constant 0 : index
      %c0_211 = arith.constant 0 : index
      %375 = vector.load %arg31[%c0_210, %c0_211] : memref<4x128xf32, #tpu.memory_space<vmem>>, vector<4x128xf32>
      %376 = arith.mulf %375, %373 : vector<4x128xf32>
      %377 = arith.addf %374, %376 : vector<4x128xf32>
      %378 = arith.truncf %377 : vector<4x128xf32> to vector<4x128xbf16>
      %c0_212 = arith.constant 0 : index
      %c0_213 = arith.constant 0 : index
      %379 = vector.load %arg13[%c0_212, %c0_213] : memref<128x128xbf16, #tpu.memory_space<vmem>>, vector<128x128xbf16>
      %cst_214 = arith.constant dense<0.000000e+00> : vector<4x128xf32>
      %380 = tpu.matmul %378, %379, %cst_214 {dimension_numbers = #tpu.dot_dimension_numbers<[1], [0], [0], [1], [0, 0, 1, 1], [], []>} : vector<4x128xbf16>, vector<128x128xbf16>, vector<4x128xf32> -> vector<4x128xf32>
      %c0_215 = arith.constant 0 : index
      %c0_216 = arith.constant 0 : index
      %381 = vector.load %arg14[%c0_215, %c0_216] : memref<1x128xf32, #tpu.memory_space<vmem>>, vector<1x128xf32>
      %382 = vector.broadcast %381 : vector<1x128xf32> to vector<4x128xf32>
      %383 = arith.addf %380, %382 : vector<4x128xf32>
      %cst_217 = arith.constant 0.000000e+00 : f32
      %384 = vector.broadcast %cst_217 : f32 to vector<4x128xf32>
      %385 = arith.maximumf %383, %384 : vector<4x128xf32>
      %386 = arith.addf %377, %385 : vector<4x128xf32>
      %c0_218 = arith.constant 0 : index
      %c0_219 = arith.constant 0 : index
      %c0_220 = arith.constant 0 : index
      %387 = vector.load %arg25[%c0_218, %c0_219, %c0_220] : memref<1x4x128xf32, #tpu.memory_space<vmem>>, vector<1x4x128xf32>
      %388 = vector.shape_cast %387 : vector<1x4x128xf32> to vector<4x128xf32>
      %389 = vector.shape_cast %386 : vector<4x128xf32> to vector<1x4x128xf32>
      tpu.vector_store %arg25[%c0_218, %c0_219, %c0_220], %389 {strides = array<i32>} : memref<1x4x128xf32, #tpu.memory_space<vmem>>, vector<1x4x128xf32>,
      %c0_221 = arith.constant 0 : index
      %c0_222 = arith.constant 0 : index
      %c0_223 = arith.constant 0 : index
      %390 = vector.load %arg34[%c0_221, %c0_222, %c0_223] : memref<4x16x1xf32, #tpu.memory_space<vmem>>, vector<1x16x1xf32>
      %391 = vector.shape_cast %390 : vector<1x16x1xf32> to vector<16x1xf32>
      %392 = tpu.reciprocal %391 {approx = true} : vector<16x1xf32> -> vector<16x1xf32>
      %393 = vector.shape_cast %392 : vector<16x1xf32> to vector<16x1xf32>
      %394 = vector.broadcast %393 : vector<16x1xf32> to vector<16x32xf32>
      %c1_224 = arith.constant 1 : index
      %c0_225 = arith.constant 0 : index
      %c0_226 = arith.constant 0 : index
      %395 = vector.load %arg34[%c1_224, %c0_225, %c0_226] : memref<4x16x1xf32, #tpu.memory_space<vmem>>, vector<1x16x1xf32>
      %396 = vector.shape_cast %395 : vector<1x16x1xf32> to vector<16x1xf32>
      %397 = tpu.reciprocal %396 {approx = true} : vector<16x1xf32> -> vector<16x1xf32>
      %398 = vector.shape_cast %397 : vector<16x1xf32> to vector<16x1xf32>
      %399 = vector.broadcast %398 : vector<16x1xf32> to vector<16x32xf32>
      %c2_227 = arith.constant 2 : index
      %c0_228 = arith.constant 0 : index
      %c0_229 = arith.constant 0 : index
      %400 = vector.load %arg34[%c2_227, %c0_228, %c0_229] : memref<4x16x1xf32, #tpu.memory_space<vmem>>, vector<1x16x1xf32>
      %401 = vector.shape_cast %400 : vector<1x16x1xf32> to vector<16x1xf32>
      %402 = tpu.reciprocal %401 {approx = true} : vector<16x1xf32> -> vector<16x1xf32>
      %403 = vector.shape_cast %402 : vector<16x1xf32> to vector<16x1xf32>
      %404 = vector.broadcast %403 : vector<16x1xf32> to vector<16x32xf32>
      %c3_230 = arith.constant 3 : index
      %c0_231 = arith.constant 0 : index
      %c0_232 = arith.constant 0 : index
      %405 = vector.load %arg34[%c3_230, %c0_231, %c0_232] : memref<4x16x1xf32, #tpu.memory_space<vmem>>, vector<1x16x1xf32>
      %406 = vector.shape_cast %405 : vector<1x16x1xf32> to vector<16x1xf32>
      %407 = tpu.reciprocal %406 {approx = true} : vector<16x1xf32> -> vector<16x1xf32>
      %408 = vector.shape_cast %407 : vector<16x1xf32> to vector<16x1xf32>
      %409 = vector.broadcast %408 : vector<16x1xf32> to vector<16x32xf32>
      %410 = tpu.concatenate %394, %399, %404, %409 in 1 : vector<16x32xf32>, vector<16x32xf32>, vector<16x32xf32>, vector<16x32xf32> -> vector<16x128xf32>
      %c0_233 = arith.constant 0 : index
      %c0_234 = arith.constant 0 : index
      %411 = vector.load %arg32[%c0_233, %c0_234] : memref<16x128xf32, #tpu.memory_space<vmem>>, vector<16x128xf32>
      %c0_235 = arith.constant 0 : index
      %c0_236 = arith.constant 0 : index
      %412 = vector.load %arg35[%c0_235, %c0_236] : memref<16x128xf32, #tpu.memory_space<vmem>>, vector<16x128xf32>
      %413 = arith.mulf %412, %410 : vector<16x128xf32>
      %414 = arith.addf %411, %413 : vector<16x128xf32>
      %415 = arith.truncf %414 : vector<16x128xf32> to vector<16x128xbf16>
      %c0_237 = arith.constant 0 : index
      %c0_238 = arith.constant 0 : index
      %416 = vector.load %arg19[%c0_237, %c0_238] : memref<128x128xbf16, #tpu.memory_space<vmem>>, vector<128x128xbf16>
      %cst_239 = arith.constant dense<0.000000e+00> : vector<16x128xf32>
      %417 = tpu.matmul %415, %416, %cst_239 {dimension_numbers = #tpu.dot_dimension_numbers<[1], [0], [0], [1], [0, 0, 1, 1], [], []>} : vector<16x128xbf16>, vector<128x128xbf16>, vector<16x128xf32> -> vector<16x128xf32>
      %c0_240 = arith.constant 0 : index
      %c0_241 = arith.constant 0 : index
      %418 = vector.load %arg20[%c0_240, %c0_241] : memref<1x128xf32, #tpu.memory_space<vmem>>, vector<1x128xf32>
      %419 = vector.broadcast %418 : vector<1x128xf32> to vector<16x128xf32>
      %420 = arith.addf %417, %419 : vector<16x128xf32>
      %cst_242 = arith.constant 0.000000e+00 : f32
      %421 = vector.broadcast %cst_242 : f32 to vector<16x128xf32>
      %422 = arith.maximumf %420, %421 : vector<16x128xf32>
      %423 = arith.addf %414, %422 : vector<16x128xf32>
      %c0_243 = arith.constant 0 : index
      %c0_244 = arith.constant 0 : index
      %c0_245 = arith.constant 0 : index
      %424 = vector.load %arg26[%c0_243, %c0_244, %c0_245] : memref<1x16x128xf32, #tpu.memory_space<vmem>>, vector<1x16x128xf32>
      %425 = vector.shape_cast %424 : vector<1x16x128xf32> to vector<16x128xf32>
      %426 = vector.shape_cast %423 : vector<16x128xf32> to vector<1x16x128xf32>
      tpu.vector_store %arg26[%c0_243, %c0_244, %c0_245], %426 {strides = array<i32>} : memref<1x16x128xf32, #tpu.memory_space<vmem>>, vector<1x16x128xf32>,
    } else {
    }
    return
  }
  func.func @transform_0(%arg0: i32, %arg1: i32) -> (i32, i32, i32) {
    %c0_i32 = arith.constant 0 : i32
    %c0_i32_0 = arith.constant 0 : i32
    return %arg0, %c0_i32, %arg1 : i32, i32, i32
  }
  func.func @transform_1(%arg0: i32, %arg1: i32) -> (i32, i32, i32) {
    %c0_i32 = arith.constant 0 : i32
    %c0_i32_0 = arith.constant 0 : i32
    return %arg0, %c0_i32, %arg1 : i32, i32, i32
  }
  func.func @transform_2(%arg0: i32, %arg1: i32) -> (i32, i32, i32) {
    %c0_i32 = arith.constant 0 : i32
    %c0_i32_0 = arith.constant 0 : i32
    return %arg0, %arg1, %c0_i32 : i32, i32, i32
  }
  func.func @transform_3(%arg0: i32, %arg1: i32) -> (i32, i32, i32) {
    %c0_i32 = arith.constant 0 : i32
    %c0_i32_0 = arith.constant 0 : i32
    return %arg0, %arg1, %c0_i32 : i32, i32, i32
  }
  func.func @transform_4(%arg0: i32, %arg1: i32) -> (i32, i32, i32) {
    %c0_i32 = arith.constant 0 : i32
    %c0_i32_0 = arith.constant 0 : i32
    return %arg0, %arg1, %c0_i32 : i32, i32, i32
  }
  func.func @transform_5(%arg0: i32, %arg1: i32) -> (i32, i32, i32) {
    %c0_i32 = arith.constant 0 : i32
    %c0_i32_0 = arith.constant 0 : i32
    %c0_i32_1 = arith.constant 0 : i32
    return %arg0, %c0_i32, %c0_i32_0 : i32, i32, i32
  }
  func.func @transform_6(%arg0: i32, %arg1: i32) -> (i32, i32, i32) {
    %c0_i32 = arith.constant 0 : i32
    %c0_i32_0 = arith.constant 0 : i32
    %c0_i32_1 = arith.constant 0 : i32
    return %arg0, %c0_i32, %c0_i32_0 : i32, i32, i32
  }
  func.func @transform_7(%arg0: i32, %arg1: i32) -> (i32, i32) {
    %c0_i32 = arith.constant 0 : i32
    %c0_i32_0 = arith.constant 0 : i32
    %c0_i32_1 = arith.constant 0 : i32
    return %c0_i32, %c0_i32_0 : i32, i32
  }
  func.func @transform_8(%arg0: i32, %arg1: i32) -> (i32, i32) {
    %c0_i32 = arith.constant 0 : i32
    %c0_i32_0 = arith.constant 0 : i32
    %c0_i32_1 = arith.constant 0 : i32
    return %c0_i32, %c0_i32_0 : i32, i32
  }
  func.func @transform_9(%arg0: i32, %arg1: i32) -> (i32, i32) {
    %c0_i32 = arith.constant 0 : i32
    %c0_i32_0 = arith.constant 0 : i32
    %c0_i32_1 = arith.constant 0 : i32
    return %c0_i32, %c0_i32_0 : i32, i32
  }
  func.func @transform_10(%arg0: i32, %arg1: i32) -> (i32, i32) {
    %c0_i32 = arith.constant 0 : i32
    %c0_i32_0 = arith.constant 0 : i32
    %c0_i32_1 = arith.constant 0 : i32
    return %c0_i32, %c0_i32_0 : i32, i32
  }
  func.func @transform_11(%arg0: i32, %arg1: i32) -> (i32, i32) {
    %c0_i32 = arith.constant 0 : i32
    %c0_i32_0 = arith.constant 0 : i32
    %c0_i32_1 = arith.constant 0 : i32
    return %c0_i32, %c0_i32_0 : i32, i32
  }
  func.func @transform_12(%arg0: i32, %arg1: i32) -> (i32, i32) {
    %c0_i32 = arith.constant 0 : i32
    %c0_i32_0 = arith.constant 0 : i32
    %c0_i32_1 = arith.constant 0 : i32
    return %c0_i32, %c0_i32_0 : i32, i32
  }
  func.func @transform_13(%arg0: i32, %arg1: i32) -> (i32, i32) {
    %c0_i32 = arith.constant 0 : i32
    %c0_i32_0 = arith.constant 0 : i32
    %c0_i32_1 = arith.constant 0 : i32
    return %c0_i32, %c0_i32_0 : i32, i32
  }
  func.func @transform_14(%arg0: i32, %arg1: i32) -> (i32, i32) {
    %c0_i32 = arith.constant 0 : i32
    %c0_i32_0 = arith.constant 0 : i32
    %c0_i32_1 = arith.constant 0 : i32
    return %c0_i32, %c0_i32_0 : i32, i32
  }
  func.func @transform_15(%arg0: i32, %arg1: i32) -> (i32, i32) {
    %c0_i32 = arith.constant 0 : i32
    %c0_i32_0 = arith.constant 0 : i32
    %c0_i32_1 = arith.constant 0 : i32
    return %c0_i32, %c0_i32_0 : i32, i32
  }
  func.func @transform_16(%arg0: i32, %arg1: i32) -> (i32, i32) {
    %c0_i32 = arith.constant 0 : i32
    %c0_i32_0 = arith.constant 0 : i32
    %c0_i32_1 = arith.constant 0 : i32
    return %c0_i32, %c0_i32_0 : i32, i32
  }
  func.func @transform_17(%arg0: i32, %arg1: i32) -> (i32, i32) {
    %c0_i32 = arith.constant 0 : i32
    %c0_i32_0 = arith.constant 0 : i32
    %c0_i32_1 = arith.constant 0 : i32
    return %c0_i32, %c0_i32_0 : i32, i32
  }
  func.func @transform_18(%arg0: i32, %arg1: i32) -> (i32, i32) {
    %c0_i32 = arith.constant 0 : i32
    %c0_i32_0 = arith.constant 0 : i32
    %c0_i32_1 = arith.constant 0 : i32
    return %c0_i32, %c0_i32_0 : i32, i32
  }
  func.func @transform_19(%arg0: i32, %arg1: i32) -> (i32, i32) {
    %c0_i32 = arith.constant 0 : i32
    %c0_i32_0 = arith.constant 0 : i32
    %c0_i32_1 = arith.constant 0 : i32
    return %c0_i32, %c0_i32_0 : i32, i32
  }
  func.func @transform_20(%arg0: i32, %arg1: i32) -> (i32, i32) {
    %c0_i32 = arith.constant 0 : i32
    %c0_i32_0 = arith.constant 0 : i32
    %c0_i32_1 = arith.constant 0 : i32
    return %c0_i32, %c0_i32_0 : i32, i32
  }
  func.func @transform_21(%arg0: i32, %arg1: i32) -> (i32, i32) {
    %c0_i32 = arith.constant 0 : i32
    %c0_i32_0 = arith.constant 0 : i32
    %c0_i32_1 = arith.constant 0 : i32
    return %c0_i32, %c0_i32_0 : i32, i32
  }
  func.func @transform_22(%arg0: i32, %arg1: i32) -> (i32, i32) {
    %c0_i32 = arith.constant 0 : i32
    %c0_i32_0 = arith.constant 0 : i32
    %c0_i32_1 = arith.constant 0 : i32
    return %c0_i32, %c0_i32_0 : i32, i32
  }
  func.func @transform_23(%arg0: i32, %arg1: i32) -> (i32, i32, i32) {
    %c0_i32 = arith.constant 0 : i32
    %c0_i32_0 = arith.constant 0 : i32
    %c0_i32_1 = arith.constant 0 : i32
    return %arg0, %c0_i32, %c0_i32_0 : i32, i32, i32
  }
  func.func @transform_24(%arg0: i32, %arg1: i32) -> (i32, i32, i32) {
    %c0_i32 = arith.constant 0 : i32
    %c0_i32_0 = arith.constant 0 : i32
    %c0_i32_1 = arith.constant 0 : i32
    return %arg0, %c0_i32, %c0_i32_0 : i32, i32, i32
  }
  func.func @transform_25(%arg0: i32, %arg1: i32) -> (i32, i32, i32) {
    %c0_i32 = arith.constant 0 : i32
    %c0_i32_0 = arith.constant 0 : i32
    return %arg0, %arg1, %c0_i32 : i32, i32, i32
  }
}

</mosaic_0001>

<bundles_post_ra>
// kernel: neg.1
= control target key start
LH: loop header
LB: loop body
LE: loop exit
PB: predicated region body
PF: predicated region fallthrough
CT: control target
= control target key end

     0   :  { %s62_s0 = inlined_call_operand.<no memory space> [shape: f32[], index: 0, kind: input, shape index: {}]   ;;  %s63_s1 = inlined_call_operand.vmem [shape: f32[2,64], index: 1, kind: output, shape index: {}]  }
   0x1   :  { %v2_v0 = vstv %s62_s0 }
   0x2   :  { %3 = vst [vmem:[%s63_s1] sm:$0xff] %v2_v0  ;;  %18 = vst [vmem:[%s63_s1 + $0x8] sm:$0xff] %v2_v0 }
   0x3   :  { %19 = vst [vmem:[%s63_s1 + $0x10] sm:$0xff] %v2_v0  ;;  %20 = vst [vmem:[%s63_s1 + $0x18] sm:$0xff] %v2_v0 }
   0x4   :  { %21 = vst [vmem:[%s63_s1 + $0x20] sm:$0xff] %v2_v0  ;;  %22 = vst [vmem:[%s63_s1 + $0x28] sm:$0xff] %v2_v0 }
   0x5   :  { %23 = vst [vmem:[%s63_s1 + $0x30] sm:$0xff] %v2_v0  ;;  %24 = vst [vmem:[%s63_s1 + $0x38] sm:$0xff] %v2_v0 }

// kernel: model_forward.2
= control target key start
LH: loop header
LB: loop body
LE: loop exit
PB: predicated region body
PF: predicated region fallthrough
CT: control target
= control target key end

     0   :  { %s5827_s29 = smov 0   ;;  %s7272_s0 = inlined_call_operand.vmem [shape: s32[2,1,64], index: 0, kind: input, shape index: {}]   ;;  %s7273_s1 = inlined_call_operand.vmem [shape: s32[2,1,64], index: 1, kind: input, shape index: {}]   ;;  %s7274_s2 = inlined_call_operand.vmem [shape: s32[2,64,1], index: 2, kind: input, shape index: {}]   ;;  %s7275_s3 = inlined_call_operand.vmem [shape: s32[2,64,1], index: 3, kind: input, shape index: {}]   ;;  %s7276_s4 = inlined_call_operand.vmem [shape: bf16[2,64,128], index: 4, kind: input, shape index: {}]   ;;  %s7277_s5 = inlined_call_operand.vmem [shape: f32[2,4,128], index: 5, kind: input, shape index: {}]   ;;  %s7278_s6 = inlined_call_operand.vmem [shape: f32[2,16,128], index: 6, kind: input, shape index: {}]   ;;  %s7279_s7 = inlined_call_operand.vmem [shape: bf16[128,128], index: 7, kind: input, shape index: {}]   ;;  %s7280_s8 = inlined_call_operand.vmem [shape: f32[1,128], index: 8, kind: input, shape index: {}]   ;;  %s7281_s9 = inlined_call_operand.vmem [shape: bf16[256,256], index: 9, kind: input, shape index: {}]   ;;  %s7282_s10 = inlined_call_operand.vmem [shape: f32[1,256], index: 10, kind: input, shape index: {}]   ;;  %s7283_s11 = inlined_call_operand.vmem [shape: bf16[128,128], index: 11, kind: input, shape index: {}]   ;;  %s7284_s12 = inlined_call_operand.vmem [shape: f32[1,128], index: 12, kind: input, shape index: {}]   ;;  %s7285_s13 = inlined_call_operand.vmem [shape: bf16[128,128], index: 13, kind: input, shape index: {}]   ;;  %s7286_s14 = inlined_call_operand.vmem [shape: f32[1,128], index: 14, kind: input, shape index: {}]   ;;  %s7287_s15 = inlined_call_operand.vmem [shape: bf16[256,256], index: 15, kind: input, shape index: {}]   ;;  %s7288_s16 = inlined_call_operand.vmem [shape: f32[1,256], index: 16, kind: input, shape index: {}]   ;;  %s7289_s17 = inlined_call_operand.vmem [shape: bf16[128,128], index: 17, kind: input, shape index: {}]   ;;  %s7290_s18 = inlined_call_operand.vmem [shape: f32[1,128], index: 18, kind: input, shape index: {}]   ;;  %s7291_s19 = inlined_call_operand.vmem [shape: bf16[128,128], index: 19, kind: input, shape index: {}]   ;;  %s7292_s20 = inlined_call_operand.vmem [shape: bf16[128,128], index: 20, kind: input, shape index: {}]   ;;  %s7293_s21 = inlined_call_operand.vmem [shape: bf16[128,128], index: 21, kind: input, shape index: {}]   ;;  %s7294_s22 = inlined_call_operand.vmem [shape: f32[1,128], index: 22, kind: input, shape index: {}]   ;;  %s7295_s23 = inlined_call_operand.vmem [shape: f32[2,4,128], index: 23, kind: output, shape index: {0}]   ;;  %s7296_s24 = inlined_call_operand.vmem [shape: f32[2,16,128], index: 24, kind: output, shape index: {1}]   ;;  %s7297_s25 = inlined_call_operand.vmem [shape: bf16[2,64,128], index: 25, kind: output, shape index: {2}]  }
   0x1   :  { %7318 = sst [smem:[#allocation22_spill]] %s7272_s0 }
   0x2   :  { %7319 = sst [smem:[#allocation23_spill]] %s7273_s1 }
   0x3   :  { %7320 = sst [smem:[#allocation24_spill]] %s7274_s2  ;;  %s5829_s2 = smov 0  }
   0x4   :  { %7321 = sst [smem:[#allocation25_spill]] %s7275_s3 }
   0x5   :  { %7322 = sst [smem:[#allocation26_spill]] %s7276_s4 }
   0x6   :  { %7323 = sst [smem:[#allocation27_spill]] %s7277_s5 }
   0x7   :  { %7324 = sst [smem:[#allocation28_spill]] %s7278_s6  ;;  %s5831_s6 = smov 0  }
   0x8   :  { %7325 = sst [smem:[#allocation29_spill]] %s7279_s7 }
   0x9   :  { %7326 = sst [smem:[#allocation30_spill]] %s7280_s8 }
   0xa   :  { %7327 = sst [smem:[#allocation31_spill]] %s7281_s9 }
   0xb LB: > { %7328 = sst [smem:[#allocation10_spill]] %s5684_s2  ;;  %s48_s30 = sadd.s32 1, %s5684_s2  ;;  %s5688_s6 = sphi %s5831_s6, %s36_s6   ;;  %s5684_s2 = sphi %s5829_s2, %s7378_s2   ;;  %s5680_s29 = sphi %s5827_s29, %s7377_s29  }
   0xc   : > { %p4621_p0 = scmp.ge.s32.totalorder %s5688_s6, 1  ;;  %p50_p1 = scmp.ge.s32.totalorder %s48_s30, 2 }
   0xd   : > { %p792_p2 = scmp.lt.s32.totalorder %s5688_s6, 3 }
   0xe   : > { %s7380_s30 = smov (%p50_p1, %s48_s30), 0 }
   0xf   : > { %7329 = sst [smem:[#allocation11_spill]] %s7380_s30  ;;  %p793_p3 = pnand %p4621_p0, %p792_p2 }
  0x11   : > { %796 = sbr.rel (%p793_p3) target bundleno = 4736 (0x1280), region = 112 }
  0x18   : > { %p916_p4 = scmp.lt.s32.totalorder %s5680_s29, 1  ;;  %s7330_s26 = sld [smem:[#allocation29_spill]]  ;;  %v5690_v1 = vmov 0   ;;  %v7310_v2 = vmov 0.0   ;;  %vm5692_vm0 = vmmov 0   ;;  %v5435_v11 = vld [vmem:[%s7285_s13] sm:$0xff]   ;;  %v1251_v43 = vlaneseq }
  0x19   : > { %5429 = vset.pattern.permute.xlu1 %v5690_v1  ;;  %5428 = vset.pattern.permute.xlu0 %v5690_v1  ;;  %1231 = vst [vmem:[#allocation5] sm:$0xf] %v7310_v2  ;;  %s7331_s9 = sld [smem:[#allocation25_spill]]  ;;  %v5437_v13 = vld [vmem:[%s7285_s13 + $0x8] sm:$0xff]   ;;  %s7332_s27 = sld [smem:[#allocation24_spill]]  ;;  %v5439_v17 = vld [vmem:[%s7285_s13 + $0x10] sm:$0xff]  }
  0x1a   : > { %s7382_s29 = smov (!%p916_p4, %s5680_s29), 1  ;;  %5016 = vmatprep.subr.bf16.mxu0 %v7310_v2  ;;  %5036 = vmatprep.subr.bf16.mxu1 %v7310_v2  ;;  %v5441_v21 = vld [vmem:[%s7285_s13 + $0x18] sm:$0xff]   ;;  %v5442_v25 = vld [vmem:[%s7285_s13 + $0x20] sm:$0xff]   ;;  %s7334_s28 = sld [smem:[#allocation27_spill]]  ;;  %v5443_v32 = vld [vmem:[%s7285_s13 + $0x28] sm:$0xff]   ;;  %vm1473_vm1 = vcmask 1041408  }
  0x1b   : > { %s4817_s1 = sshll.u32 %s7382_s29, 6  ;;  %5032 = vmatprep.mubr.msk.bf16.mxu0 %vm5692_vm0, %v7310_v2  ;;  %5052 = vmatprep.mubr.msk.bf16.mxu1 %vm5692_vm0, %v7310_v2  ;;  %s7302_s8 = sshll.u32 %s7382_s29, 2  ;;  %v5444_v36 = vld [vmem:[%s7285_s13 + $0x30] sm:$0xff]   ;;  %v5445_v39 = vld [vmem:[%s7285_s13 + $0x38] sm:$0xff]   ;;  %v5954_v44 = vand.u32 127, %v1251_v43  ;;  %vm1376_vm6 = vcmask 130048  }
  0x1c   : > { %5037 = vmatpush3.bf16.msra.mxu1 %v5435_v11  ;;  %vm1460_vm13 = vcmask 31744   ;;  %s7336_s2 = sld [smem:[#allocation26_spill]]  ;;  %s7337_s0 = sld [smem:[#allocation30_spill]] }
  0x1d   : > { %5038 = vmatprep.subr.bf16.mxu1 %v7310_v2  ;;  %s7350_s7 = smov 32  }
  0x1e   : > { %v5430_v0 = vld [vmem:[%s7330_s26] sm:$0xff]   ;;  %v5431_v3 = vld [vmem:[%s7330_s26 + $0x8] sm:$0xff]   ;;  %v5432_v8 = vld [vmem:[%s7330_s26 + $0x10] sm:$0xff]  }
  0x1f   : > { %5017 = vmatpush3.bf16.msra.mxu0 %v5430_v0  ;;  %s946_s5 = scalar_lea.vmem %s7331_s9, %s4817_s1  ;;  %v5433_v9 = vld [vmem:[%s7330_s26 + $0x18] sm:$0xff]   ;;  %v5434_v14 = vld [vmem:[%s7330_s26 + $0x20] sm:$0xff]   ;;  %s5890_s4 = scalar_lea.vmem %s7332_s27, %s4817_s1  ;;  %v5436_v20 = vld [vmem:[%s7330_s26 + $0x28] sm:$0xff]  }
  0x20   : > { %5018 = vmatprep.subr.bf16.mxu0 %v7310_v2  ;;  %v1255_v4 = vld [vmem:[%s946_s5 + $0x10] sm:$0xff]  ;;  %v1253_v5 = vld [vmem:[%s946_s5] sm:$0xff]  ;;  %v1256_v6 = vld [vmem:[%s946_s5 + $0x18] sm:$0xff]  ;;  %5039 = vmatpush3.bf16.msra.mxu1 %v5437_v13  ;;  %s7333_s9 = sld [smem:[#allocation28_spill]]  ;;  %s7308_s1 = smov 96  }
  0x21   : > { %1268 = vperm.xlu1 %5429, %v1255_v4   ;;  %1262 = vperm.xlu0 %5428, %v1253_v5   ;;  %v1254_v7 = vld [vmem:[%s946_s5 + $0x8] sm:$0xff]  ;;  %v1257_v12 = vld [vmem:[%s946_s5 + $0x20] sm:$0xff]  ;;  %v1260_v15 = vld [vmem:[%s946_s5 + $0x38] sm:$0xff] }
  0x22   : > { %v1258_v10 = vld [vmem:[%s946_s5 + $0x28] sm:$0xff]  ;;  %v1259_v16 = vld [vmem:[%s946_s5 + $0x30] sm:$0xff]  ;;  %5040 = vmatprep.subr.bf16.mxu1 %v7310_v2  ;;  %s7301_s5 = sshll.u32 %s7382_s29, 4  ;;  %v1313_v19 = vld [vmem:[%s5890_s4] sm:$0xff] }
  0x23   : > { %5019 = vmatpush3.bf16.msra.mxu0 %v5431_v3  ;;  %v1314_v18 = vld [vmem:[%s5890_s4 + $0x8] sm:$0xff]  ;;  %v1316_v22 = vld [vmem:[%s5890_s4 + $0x18] sm:$0xff]  ;;  %v1315_v23 = vld [vmem:[%s5890_s4 + $0x10] sm:$0xff] }
  0x24   : > { %5020 = vmatprep.subr.bf16.mxu0 %v7310_v2  ;;  %5041 = vmatpush3.bf16.msra.mxu1 %v5439_v17  ;;  %v5438_v24 = vld [vmem:[%s7330_s26 + $0x30] sm:$0xff]   ;;  %v1318_v28 = vld [vmem:[%s5890_s4 + $0x28] sm:$0xff]  ;;  %v1317_v29 = vld [vmem:[%s5890_s4 + $0x20] sm:$0xff] }
  0x25   : > { %1271 = vperm.xlu1 %5429, %v1256_v6   ;;  %1265 = vperm.xlu0 %5428, %v1254_v7   ;;  %v5440_v30 = vld [vmem:[%s7330_s26 + $0x38] sm:$0xff]   ;;  %v1319_v35 = vld [vmem:[%s5890_s4 + $0x30] sm:$0xff] }
  0x26   : > { %s966_s30 = scalar_lea.vmem %s7333_s9, %s7301_s5  ;;  %5042 = vmatprep.subr.bf16.mxu1 %v7310_v2  ;;  %s961_s9 = scalar_lea.vmem %s7334_s28, %s7302_s8  ;;  %v1320_v34 = vld [vmem:[%s5890_s4 + $0x38] sm:$0xff] }
  0x27   : > { %5021 = vmatpush3.bf16.msra.mxu0 %v5432_v8  ;;  %v1373_v26 = vld [vmem:[%s966_s30] sm:$0xff]  ;;  %v1374_v27 = vld [vmem:[%s966_s30 + $0x8] sm:$0xff]  ;;  %s7303_s30 = sshll.u32 %s7382_s29, 5  ;;  %s7341_s4 = sld [smem:[#allocation22_spill]] }
  0x28   : > { %5022 = vmatprep.subr.bf16.mxu0 %v7310_v2  ;;  %5043 = vmatpush3.bf16.msra.mxu1 %v5441_v21  ;;  %v991_v31 = vld [vmem:[%s961_s9] sm:$0xf]  ;;  %v1375_v33 = vpack.c.bf16 %v1374_v27, %v1373_v26  ;;  %s6097_s8 = scalar_lea.vmem %s7336_s2, %s7303_s30  ;;  %s7306_s5 = smov 64  }
  0x29   : > { %1277 = vperm.xlu1 %5429, %v1258_v10   ;;  %1274 = vperm.xlu0 %5428, %v1257_v12   ;;  %v992_v37 = vpack.c.bf16 %v991_v31, %v991_v31  ;;  %v1458_v38 = vld [vmem:[%s961_s9] sm:$0xf]  ;;  %s7335_s9 = sld [smem:[#allocation31_spill]] }
  0x2a   : > { %5044 = vmatprep.subr.bf16.mxu1 %v7310_v2  ;;  %v1459_v40 = vpack.c.bf16 %v1458_v38, %v1458_v38  ;;  %s7345_s30 = sld [smem:[#allocation23_spill]] }
  0x2b   : > { %5023 = vmatpush3.bf16.msra.mxu0 %v5433_v9 }
  0x2c   : > { %5024 = vmatprep.subr.bf16.mxu0 %v7310_v2  ;;  %5045 = vmatpush3.bf16.msra.mxu1 %v5442_v25  ;;  %v1475_v42 = vsel %vm1473_vm1, %v1459_v40, 0 }
  0x2d   : > { %1283 = vperm.xlu1 %5429, %v1260_v15   ;;  %1280 = vperm.xlu0 %5428, %v1259_v16   ;;  %s921_s2 = scalar_lea.vmem %s7341_s4, %s7382_s29  ;;  %s7346_s4 = smov 96  }
  0x2e   : > { %5046 = vmatprep.subr.bf16.mxu1 %v7310_v2 }
  0x2f   : > { %5025 = vmatpush3.bf16.msra.mxu0 %v5434_v14  ;;  %v5448_v41 = vld [vmem:[%s7335_s9 + $0x4] ss:$8 sps:$4 sm:$0xff]   ;;  %v5446_v55 = vld [vmem:[%s7335_s9] ss:$8 sps:$4 sm:$0xff]   ;;  %v5451_v58 = vld [vmem:[%s7335_s9 + $0x14] ss:$8 sps:$4 sm:$0xff]  }
  0x30   : > { %5026 = vmatprep.subr.bf16.mxu0 %v7310_v2  ;;  %5047 = vmatpush3.bf16.msra.mxu1 %v5443_v32  ;;  %v5449_v62 = vld [vmem:[%s7335_s9 + $0x10] ss:$8 sps:$4 sm:$0xff]   ;;  %v5454_v1 = vld [vmem:[%s7335_s9 + $0x24] ss:$8 sps:$4 sm:$0xff]   ;;  %v5452_v6 = vld [vmem:[%s7335_s9 + $0x20] ss:$8 sps:$4 sm:$0xff]  }
  0x31   : > { %1325 = vperm.xlu1 %5429, %v1314_v18   ;;  %1322 = vperm.xlu0 %5428, %v1313_v19   ;;  %v5457_v9 = vld [vmem:[%s7335_s9 + $0x34] ss:$8 sps:$4 sm:$0xff]   ;;  %v5455_v13 = vld [vmem:[%s7335_s9 + $0x30] ss:$8 sps:$4 sm:$0xff]   ;;  %v5460_v16 = vld [vmem:[%s7335_s9 + $0x44] ss:$8 sps:$4 sm:$0xff]  }
  0x32   : > { %5048 = vmatprep.subr.bf16.mxu1 %v7310_v2  ;;  %v5461_v27 = vld [vmem:[%s7335_s9 + $0x50] ss:$8 sps:$4 sm:$0xff]   ;;  %v5470_v38 = vld [vmem:[%s7335_s9 + $0x80] ss:$8 sps:$4 sm:$0xff]  }
  0x33   : > { %5027 = vmatpush3.bf16.msra.mxu0 %v5436_v20  ;;  %v5458_v20 = vld [vmem:[%s7335_s9 + $0x40] ss:$8 sps:$4 sm:$0xff]  }
  0x34   : > { %5028 = vmatprep.subr.bf16.mxu0 %v7310_v2  ;;  %5049 = vmatpush3.bf16.msra.mxu1 %v5444_v36  ;;  %v5467_v36 = vld [vmem:[%s7335_s9 + $0x70] ss:$8 sps:$4 sm:$0xff]  }
  0x35   : > { %1331 = vperm.xlu1 %5429, %v1316_v22   ;;  %1328 = vperm.xlu0 %5428, %v1315_v23   ;;  %v5463_v23 = vld [vmem:[%s7335_s9 + $0x54] ss:$8 sps:$4 sm:$0xff]  }
  0x36   : > { %5050 = vmatprep.subr.bf16.mxu1 %v7310_v2 }
  0x37   : > { %5029 = vmatpush3.bf16.msra.mxu0 %v5438_v24 }
  0x38   : > { %5030 = vmatprep.subr.bf16.mxu0 %v7310_v2  ;;  %5051 = vmatpush3.bf16.msra.mxu1 %v5445_v39  ;;  %v5475_v39 = vld [vmem:[%s7335_s9 + $0x94] ss:$8 sps:$4 sm:$0xff]  }
  0x39   : > { %1337 = vperm.xlu1 %5429, %v1318_v28   ;;  %1334 = vperm.xlu0 %5428, %v1317_v29  }
  0x3a   : > { %5396 = vmatprep.subr.msk.bf16.mxu1 %vm1473_vm1, %v1459_v40  ;;  %v5473_v40 = vld [vmem:[%s7335_s9 + $0x90] ss:$8 sps:$4 sm:$0xff]  }
  0x3b   : > { %5031 = vmatpush3.bf16.msra.mxu0 %v5440_v30  ;;  %5053 = vmatmul.mubr.bf16.vlgmr.msra.gmra.mrb[0].mxu1 %v1375_v33  ;;  %v5466_v30 = vld [vmem:[%s7335_s9 + $0x64] ss:$8 sps:$4 sm:$0xff]  }
  0x3c   : > { %5056 = vmatprep.subr.bf16.mxu0 %v1375_v33  ;;  %5067 = vmatpush3.bf16.msra.mxu1 %v1475_v42  ;;  %v5476_v42 = vld [vmem:[%s7335_s9 + $0xa0] ss:$8 sps:$4 sm:$0xff]  }
  0x3d   : > { %1343 = vperm.xlu1 %5429, %v1320_v34   ;;  %1340 = vperm.xlu0 %5428, %v1319_v35   ;;  %v5464_v34 = vld [vmem:[%s7335_s9 + $0x60] ss:$8 sps:$4 sm:$0xff]   ;;  %v5469_v35 = vld [vmem:[%s7335_s9 + $0x74] ss:$8 sps:$4 sm:$0xff]  }
  0x3e   : > { %5033 = vmatmul.mubr.bf16.vlgmr.msra.gmra.mrb[0].mxu0 %v992_v37  ;;  %5076 = vmatprep.subr.bf16.mxu1 %v7310_v2  ;;  %v5472_v37 = vld [vmem:[%s7335_s9 + $0x84] ss:$8 sps:$4 sm:$0xff]  }
  0x3f   : > { %5057 = vmatpush3.bf16.msra.mxu0 %v1375_v33 }
  0x40   : > { %1783 = vmatprep.subr.bf16.mxu0 %v5448_v41  ;;  %v5478_v41 = vld [vmem:[%s7335_s9 + $0xa4] ss:$8 sps:$4 sm:$0xff]  }
  0xa0   : > { %v1269_v45 = vpop.permute.xlu1 %1268  ;;  %v1263_v46 = vpop.permute.xlu0 %1262 }
  0xa1   : > { %vm1287_vm2 = vcmp.eq.s32.totalorder %v5954_v44, %v1269_v45  ;;  %vm1285_vm3 = vcmp.eq.s32.totalorder %v5954_v44, %v1263_v46  ;;  %v5479_v45 = vld [vmem:[%s7335_s9 + $0xb0] ss:$8 sps:$4 sm:$0xff]   ;;  %v5484_v46 = vld [vmem:[%s7335_s9 + $0xc4] ss:$8 sps:$4 sm:$0xff]  }
  0xa2   : > { %v4656_v49 = vsel %vm1287_vm2, 1.0, %v7310_v2  ;;  %v4654_v50 = vsel %vm1285_vm3, 1.0, %v7310_v2 }
  0xa4   : > { %v1272_v47 = vpop.permute.xlu1 %1271  ;;  %v1266_v48 = vpop.permute.xlu0 %1265 }
  0xa5   : > { %vm1288_vm4 = vcmp.eq.s32.totalorder %v5954_v44, %v1272_v47  ;;  %vm1286_vm5 = vcmp.eq.s32.totalorder %v5954_v44, %v1266_v48  ;;  %v5482_v47 = vld [vmem:[%s7335_s9 + $0xc0] ss:$8 sps:$4 sm:$0xff]   ;;  %v5487_v48 = vld [vmem:[%s7335_s9 + $0xd4] ss:$8 sps:$4 sm:$0xff]  }
  0xa6   : > { %v4657_v51 = vsel %vm1288_vm4, 1.0, %v7310_v2  ;;  %v4655_v52 = vsel %vm1286_vm5, 1.0, %v7310_v2  ;;  %vm1874_vm5 = vcmask 261120  }
  0xa7   : > { %v1310_v53 = vpack.c.bf16 %v4657_v51, %v4656_v49  ;;  %v1309_v54 = vpack.c.bf16 %v4655_v52, %v4654_v50  ;;  %v5485_v49 = vld [vmem:[%s7335_s9 + $0xd0] ss:$8 sps:$4 sm:$0xff]   ;;  %v5490_v50 = vld [vmem:[%s7335_s9 + $0xe4] ss:$8 sps:$4 sm:$0xff]   ;;  %v5488_v51 = vld [vmem:[%s7335_s9 + $0xe0] ss:$8 sps:$4 sm:$0xff]  }
  0xa8   : > { %v1278_v56 = vpop.permute.xlu1 %1277  ;;  %v1275_v57 = vpop.permute.xlu0 %1274  ;;  %v5493_v52 = vld [vmem:[%s7335_s9 + $0xf4] ss:$8 sps:$4 sm:$0xff]  }
  0xa9   : > { %vm1290_vm7 = vcmp.eq.s32.totalorder %v5954_v44, %v1278_v56  ;;  %vm1289_vm8 = vcmp.eq.s32.totalorder %v5954_v44, %v1275_v57  ;;  %5058 = vmatprep.mubr.msk.bf16.mxu0 %vm1376_vm6, %v1309_v54  ;;  %v6100_v54 = vld [vmem:[%s6097_s8] sm:$0xff]  }
  0xaa   : > { %v4659_v59 = vsel %vm1290_vm7, 1.0, %v7310_v2  ;;  %v4658_v60 = vsel %vm1289_vm8, 1.0, %v7310_v2  ;;  %5059 = vmatmul.mubr.msk.bf16.vlgmr.msra.gmra.mrb[4].mxu0 %vm1376_vm6, %v1310_v53  ;;  %v5491_v53 = vld [vmem:[%s7335_s9 + $0xf0] ss:$8 sps:$4 sm:$0xff]   ;;  %vm1932_vm8 = vcmask 519168  }
  0xab   : > { %v1311_v61 = vpack.c.bf16 %v4659_v59, %v4658_v60  ;;  %1784 = vmatpush1.bf16.msra.mxu0 %v5446_v55  ;;  %v4636_v55 = vld [vmem:[%s7337_s0] ss:$0 sm:$0xff]  ;;  %s7304_s0 = smov 32  }
  0xac   : > { %v1284_v63 = vpop.permute.xlu1 %1283  ;;  %v1281_v0 = vpop.permute.xlu0 %1280  ;;  %1785 = vmatprep.subr.bf16.mxu0 %v5451_v58 }
  0xad   : > { %vm1292_vm9 = vcmp.eq.s32.totalorder %v5954_v44, %v1284_v63  ;;  %vm1291_vm10 = vcmp.eq.s32.totalorder %v5954_v44, %v1281_v0  ;;  %5062 = vmatprep.mubr.msk.bf16.mxu0 %vm1376_vm6, %v1311_v61 }
  0xae   : > { %v4661_v3 = vsel %vm1292_vm9, 1.0, %v7310_v2  ;;  %v4660_v4 = vsel %vm1291_vm10, 1.0, %v7310_v2  ;;  %vm1963_vm9 = vcmask 523264   ;;  %vm1232_vm10 = vcmask 7168  }
  0xaf   : > { %v1312_v5 = vpack.c.bf16 %v4661_v3, %v4660_v4  ;;  %1786 = vmatpush1.bf16.msra.mxu0 %v5449_v62  ;;  %v6112_v3 = vld [vmem:[%s6097_s8 + $0x8] sm:$0xff]   ;;  %1241 = vst.msk [vmem:[#allocation8] sm:$0xff] %vm1232_vm10, %v7310_v2  ;;  %1242 = vst.msk [vmem:[#allocation8 + $0x8] sm:$0xff] %vm1232_vm10, %v7310_v2 }
  0xb0   : > { %v1326_v7 = vpop.permute.xlu1 %1325  ;;  %v1323_v8 = vpop.permute.xlu0 %1322  ;;  %1787 = vmatprep.subr.bf16.mxu0 %v5454_v1  ;;  %1243 = vst.msk [vmem:[#allocation8 + $0x10] sm:$0xff] %vm1232_vm10, %v7310_v2  ;;  %1244 = vst.msk [vmem:[#allocation8 + $0x18] sm:$0xff] %vm1232_vm10, %v7310_v2 }
  0xb1   : > { %vm1346_vm11 = vcmp.eq.s32.totalorder %v5954_v44, %v1326_v7  ;;  %vm1345_vm12 = vcmp.eq.s32.totalorder %v5954_v44, %v1323_v8  ;;  %1245 = vst.msk [vmem:[#allocation8 + $0x20] sm:$0xff] %vm1232_vm10, %v7310_v2  ;;  %1246 = vst.msk [vmem:[#allocation8 + $0x28] sm:$0xff] %vm1232_vm10, %v7310_v2 }
  0xb2   : > { %v4663_v10 = vsel %vm1346_vm11, 1.0, %v7310_v2  ;;  %v4662_v11 = vsel %vm1345_vm12, 1.0, %v7310_v2  ;;  %5063 = vmatmul.mubr.msk.bf16.gmra.mrb[8].mxu0 %vm1376_vm6, %v1312_v5  ;;  %vm1222_vm6 = vcmask 3072   ;;  %1247 = vst.msk [vmem:[#allocation8 + $0x30] sm:$0xff] %vm1232_vm10, %v7310_v2  ;;  %1248 = vst.msk [vmem:[#allocation8 + $0x38] sm:$0xff] %vm1232_vm10, %v7310_v2 }
  0xb3   : > { %v1369_v12 = vpack.c.bf16 %v4663_v10, %v4662_v11  ;;  %1788 = vmatpush1.bf16.msra.mxu0 %v5452_v6  ;;  %1815 = vmatprep.mubr.bf16.mxu0 %v6100_v54  ;;  %v6121_v10 = vld [vmem:[%s6097_s8 + $0x10] sm:$0xff]   ;;  %1227 = vst.msk [vmem:[#allocation4] sm:$0xf] %vm1222_vm6, %v7310_v2  ;;  %1228 = vst.msk [vmem:[#allocation4 + $0x4] sm:$0xf] %vm1222_vm6, %v7310_v2 }
  0xb4   : > { %v1332_v14 = vpop.permute.xlu1 %1331  ;;  %v1329_v15 = vpop.permute.xlu0 %1328  ;;  %1789 = vmatprep.subr.bf16.mxu0 %v5457_v9  ;;  %1229 = vst.msk [vmem:[#allocation4 + $0x8] sm:$0xf] %vm1222_vm6, %v7310_v2  ;;  %1230 = vst.msk [vmem:[#allocation4 + $0xc] sm:$0xf] %vm1222_vm6, %v7310_v2 }
  0xb5   : > { %vm1348_vm14 = vcmp.eq.s32.totalorder %v5954_v44, %v1332_v14  ;;  %vm1347_vm15 = vcmp.eq.s32.totalorder %v5954_v44, %v1329_v15  ;;  %5068 = vmatprep.mubr.msk.bf16.mxu1 %vm1460_vm13, %v1369_v12 }
  0xb6   : > { %v4665_v17 = vsel %vm1348_vm14, 1.0, %v7310_v2  ;;  %v4664_v18 = vsel %vm1347_vm15, 1.0, %v7310_v2 }
  0xb7   : > { %v1370_v19 = vpack.c.bf16 %v4665_v17, %v4664_v18  ;;  %1790 = vmatpush1.bf16.msra.mxu0 %v5455_v13  ;;  %v6130_v18 = vld [vmem:[%s6097_s8 + $0x18] sm:$0xff]  }
  0xb8   : > { %v1338_v21 = vpop.permute.xlu1 %1337  ;;  %v1335_v22 = vpop.permute.xlu0 %1334  ;;  %1791 = vmatprep.subr.bf16.mxu0 %v5460_v16 }
  0xb9   : > { %vm1350_vm1 = vcmp.eq.s32.totalorder %v5954_v44, %v1338_v21  ;;  %vm1349_vm2 = vcmp.eq.s32.totalorder %v5954_v44, %v1335_v22  ;;  %5069 = vmatmul.mubr.msk.bf16.vlgmr.msra.gmra.mrb[4].mxu1 %vm1460_vm13, %v1370_v19 }
  0xba   : > { %v4667_v24 = vsel %vm1350_vm1, 1.0, %v7310_v2  ;;  %v4666_v25 = vsel %vm1349_vm2, 1.0, %v7310_v2 }
  0xbb   : > { %v1371_v26 = vpack.c.bf16 %v4667_v24, %v4666_v25  ;;  %1792 = vmatpush1.bf16.msra.mxu0 %v5458_v20 }
  0xbc   : > { %v1344_v28 = vpop.permute.xlu1 %1343  ;;  %v1341_v29 = vpop.permute.xlu0 %1340  ;;  %1793 = vmatprep.subr.bf16.mxu0 %v5463_v23 }
  0xbd   : > { %vm1352_vm3 = vcmp.eq.s32.totalorder %v5954_v44, %v1344_v28  ;;  %vm1351_vm4 = vcmp.eq.s32.totalorder %v5954_v44, %v1341_v29  ;;  %5072 = vmatprep.mubr.msk.bf16.mxu1 %vm1460_vm13, %v1371_v26  ;;  %v5481_v44 = vld [vmem:[%s7335_s9 + $0xb4] ss:$8 sps:$4 sm:$0xff]   ;;  %v6146_v29 = vshrl.u32 %v1251_v43, 7 }
  0xbe   : > { %v4669_v31 = vsel %vm1352_vm3, 1.0, %v7310_v2  ;;  %v4668_v32 = vsel %vm1351_vm4, 1.0, %v7310_v2 }
  0xbf   : > { %v1372_v33 = vpack.c.bf16 %v4669_v31, %v4668_v32  ;;  %1794 = vmatpush1.bf16.msra.mxu0 %v5461_v27  ;;  %v1611_v31 = vld [vmem:[%s7282_s10] sm:$0x3]  ;;  %v1619_v32 = vsub.s32 1, %v6146_v29 }
  0xc0   : > { %1795 = vmatprep.subr.bf16.mxu0 %v5466_v30  ;;  %v1615_v30 = vsub.s32 0, %v6146_v29 }
  0xc1   : > { %5073 = vmatmul.mubr.msk.bf16.gmra.mrb[8].mxu1 %vm1460_vm13, %v1372_v33  ;;  %vm2477_vm13 = vcmask 785408  }
  0xc2   : > { %5084 = vmatprep.mubr.msk.bf16.mxu1 %vm5692_vm0, %v7310_v2  ;;  %v1616_v33 = vrot.slane %v1611_v31, %v1615_v30 }
  0xc3   : > { %1796 = vmatpush1.bf16.msra.mxu0 %v5464_v34 }
  0xc4   : > { %1797 = vmatprep.subr.bf16.mxu0 %v5469_v35  ;;  %v1620_v35 = vrot.slane %v1611_v31, %v1619_v32 }
  0xc7   : > { %1798 = vmatpush1.bf16.msra.mxu0 %v5467_v36 }
  0xc8   : > { %1799 = vmatprep.subr.bf16.mxu0 %v5472_v37 }
  0xcb   : > { %1800 = vmatpush1.bf16.msra.mxu0 %v5470_v38 }
  0xcc   : > { %1801 = vmatprep.subr.bf16.mxu0 %v5475_v39 }
  0xcf   : > { %1802 = vmatpush1.bf16.msra.mxu0 %v5473_v40 }
  0xd0   : > { %1803 = vmatprep.subr.bf16.mxu0 %v5478_v41 }
  0xd3   : > { %1804 = vmatpush1.bf16.msra.mxu0 %v5476_v42 }
  0xd4   : > { %1805 = vmatprep.subr.bf16.mxu0 %v5481_v44 }
  0xd7   : > { %1806 = vmatpush1.bf16.msra.mxu0 %v5479_v45 }
  0xd8   : > { %1807 = vmatprep.subr.bf16.mxu0 %v5484_v46 }
  0xdb   : > { %1808 = vmatpush1.bf16.msra.mxu0 %v5482_v47 }
  0xdc   : > { %1809 = vmatprep.subr.bf16.mxu0 %v5487_v48 }
  0xdf   : > { %1810 = vmatpush1.bf16.msra.mxu0 %v5485_v49 }
  0xe0   : > { %1811 = vmatprep.subr.bf16.mxu0 %v5490_v50 }
  0xe3   : > { %1812 = vmatpush1.bf16.msra.mxu0 %v5488_v51 }
  0xe4   : > { %1813 = vmatprep.subr.bf16.mxu0 %v5493_v52 }
  0xe7   : > { %1814 = vmatpush1.bf16.msra.mxu0 %v5491_v53 }
  0xe8   : > { %5112 = vmatprep.subr.bf16.mxu0 %v7310_v2 }
 0x10e   : > { %v6107_v61 = vpop.f32.mrb[0].mxu1 }
 0x10f   : > { %v5054_v62 = vpop.f32.mrb[1].mxu1 }
 0x110   : > { %v6109_v63 = vpop.f32.mrb[2].mxu1 }
 0x111   : > { %v1098_v56 = vpop.f32.mrb[0].mxu0  ;;  %v5055_v0 = vpop.f32.mrb[3].mxu1 }
 0x112   : > { %v1099_v57 = vadd.f32 %v4636_v55, %v1098_v56  ;;  %v5034_v58 = vpop.f32.mrb[1].mxu0 }
 0x113   : > { %v1101_v59 = vpop.f32.mrb[2].mxu0 }
 0x114   : > { %1104 = vst [vmem:[#allocation2] sm:$0xf] %v1099_v57  ;;  %v5035_v60 = vpop.f32.mrb[3].mxu0 }
 0x11b   : > { %v1864_v31 = vld [vmem:[#allocation2] sm:$0xf] }
 0x17d   : > { %v5060_v1 = vpop.f32.mrb[4].mxu0 }
 0x17e   : > { %v1423_v4 = vpop.f32.mrb[5].mxu0 }
 0x17f   : > { %v5061_v5 = vpop.f32.mrb[6].mxu0 }
 0x180   : > { %v6114_v6 = vpack.c.bf16 %v5061_v5, %v5060_v1  ;;  %v1426_v7 = vpop.f32.mrb[7].mxu0 }
 0x181   : > { %v6116_v8 = vpack.c.bf16 %v1426_v7, %v1423_v4 }
 0x183   : > { %1816 = vmatmul.mubr.bf16.vlgmr.msra.gmra.mrb[12].mxu0 %v6116_v8 }
 0x184   : > { %1825 = vmatprep.mubr.bf16.mxu0 %v6112_v3 }
 0x185   : > { %v5064_v9 = vpop.f32.mrb[8].mxu0 }
 0x186   : > { %v1439_v11 = vpop.f32.mrb[9].mxu0 }
 0x187   : > { %v5065_v12 = vpop.f32.mrb[10].mxu0 }
 0x188   : > { %v6123_v13 = vpack.c.bf16 %v5065_v12, %v5064_v9  ;;  %v1442_v14 = vpop.f32.mrb[11].mxu0 }
 0x189   : > { %v6125_v15 = vpack.c.bf16 %v1442_v14, %v1439_v11 }
 0x18b   : > { %1826 = vmatmul.mubr.bf16.gmra.mrb[16].mxu0 %v6114_v6 }
 0x18c   : > { %v5070_v16 = vpop.f32.mrb[4].mxu1  ;;  %1835 = vmatprep.mubr.bf16.mxu0 %v6121_v10 }
 0x18d   : > { %v1511_v17 = vpop.f32.mrb[5].mxu1 }
 0x18e   : > { %v5071_v19 = vpop.f32.mrb[6].mxu1 }
 0x18f   : > { %v6132_v20 = vpack.c.bf16 %v5071_v19, %v5070_v16  ;;  %v1514_v21 = vpop.f32.mrb[7].mxu1 }
 0x190   : > { %v6134_v22 = vpack.c.bf16 %v1514_v21, %v1511_v17 }
 0x191   : > { %7338 = vst [vmem:[#allocation12_spill] sm:$0xff] %v6132_v20 }
 0x193   : > { %1836 = vmatmul.mubr.bf16.gmra.mrb[20].mxu0 %v6125_v15 }
 0x194   : > { %v5074_v23 = vpop.f32.mrb[8].mxu1  ;;  %1845 = vmatprep.mubr.bf16.mxu0 %v6130_v18 }
 0x195   : > { %v1527_v24 = vpop.f32.mrb[9].mxu1 }
 0x196   : > { %v5075_v25 = vpop.f32.mrb[10].mxu1 }
 0x197   : > { %v6138_v26 = vpack.c.bf16 %v5075_v25, %v5074_v23  ;;  %v1530_v27 = vpop.f32.mrb[11].mxu1 }
 0x198   : > { %v6140_v28 = vpack.c.bf16 %v1530_v27, %v1527_v24 }
 0x199   : > { %7339 = vst [vmem:[#allocation13_spill] sm:$0xff] %v6138_v26 }
 0x19a   : > { %7340 = vst [vmem:[#allocation14_spill] sm:$0xff] %v6140_v28 }
 0x19b   : > { %1846 = vmatmul.mubr.bf16.gmra.mrb[24].mxu0 %v6123_v13 }
 0x19c   : > { %5120 = vmatprep.mubr.msk.bf16.mxu0 %vm5692_vm0, %v7310_v2 }
 0x256   : > { %v1817_v34 = vpop.f32.mrb[12].mxu0 }
 0x257   : > { %v1819_v36 = vpop.f32.mrb[13].mxu0  ;;  %v1818_v38 = vadd.f32 %v1817_v34, %v1616_v33 }
 0x258   : > { %v1821_v37 = vpop.f32.mrb[14].mxu0  ;;  %v1820_v40 = vadd.f32 %v1819_v36, %v1620_v35  ;;  %v1865_v36 = vmul.f32 0.088388346, %v1864_v31 }
 0x259   : > { %v1822_v43 = vadd.f32 %v1821_v37, %v1616_v33  ;;  %v1823_v39 = vpop.f32.mrb[15].mxu0 }
 0x25a   : > { %v1824_v41 = vadd.f32 %v1823_v39, %v1620_v35  ;;  %v6185_v37 = vpack.c.bf16 %v1865_v36, %v1865_v36 }
 0x25b   : > { %v6157_v42 = vpack.c.bf16 %v1822_v43, %v1818_v38 }
 0x25c   : > { %v6159_v44 = vpack.c.bf16 %v1824_v41, %v1820_v40 }
 0x25d   : > { %v1879_v45 = vsel %vm1874_vm5, %v6157_v42, 0 }
 0x25e   : > { %v1827_v46 = vpop.f32.mrb[16].mxu0  ;;  %5077 = vmatpush3.bf16.xpose.msra.mxu1 %v1879_v45 }
 0x25f   : > { %v1829_v47 = vpop.f32.mrb[17].mxu0  ;;  %5078 = vmatprep.subr.bf16.mxu1 %v7310_v2  ;;  %v1828_v49 = vadd.f32 %v1827_v46, %v1616_v33 }
 0x260   : > { %v1831_v48 = vpop.f32.mrb[18].mxu0  ;;  %v1830_v52 = vadd.f32 %v1829_v47, %v1620_v35 }
 0x261   : > { %v1832_v50 = vadd.f32 %v1831_v48, %v1616_v33  ;;  %v1833_v51 = vpop.f32.mrb[19].mxu0 }
 0x262   : > { %v1834_v53 = vadd.f32 %v1833_v51, %v1620_v35 }
 0x263   : > { %v6164_v55 = vpack.c.bf16 %v1832_v50, %v1828_v49 }
 0x264   : > { %v6166_v56 = vpack.c.bf16 %v1834_v53, %v1830_v52 }
 0x265   : > { %v1882_v57 = vsel %vm1874_vm5, %v6164_v55, 0 }
 0x266   : > { %v1837_v58 = vpop.f32.mrb[20].mxu0  ;;  %5079 = vmatpush3.bf16.xpose.msra.mxu1 %v1882_v57 }
 0x267   : > { %v1839_v59 = vpop.f32.mrb[21].mxu0  ;;  %5080 = vmatprep.subr.bf16.mxu1 %v7310_v2  ;;  %v1838_v62 = vadd.f32 %v1837_v58, %v1616_v33 }
 0x268   : > { %v1841_v60 = vpop.f32.mrb[22].mxu0  ;;  %v1840_v4 = vadd.f32 %v1839_v59, %v1620_v35 }
 0x269   : > { %v1842_v0 = vadd.f32 %v1841_v60, %v1616_v33  ;;  %v1843_v1 = vpop.f32.mrb[23].mxu0 }
 0x26a   : > { %v1844_v5 = vadd.f32 %v1843_v1, %v1620_v35 }
 0x26b   : > { %v6171_v7 = vpack.c.bf16 %v1842_v0, %v1838_v62 }
 0x26c   : > { %v6173_v9 = vpack.c.bf16 %v1844_v5, %v1840_v4 }
 0x26d   : > { %v1885_v11 = vsel %vm1874_vm5, %v6171_v7, 0 }
 0x26e   : > { %v1847_v12 = vpop.f32.mrb[24].mxu0  ;;  %5081 = vmatpush3.bf16.xpose.msra.mxu1 %v1885_v11 }
 0x26f   : > { %v1849_v14 = vpop.f32.mrb[25].mxu0  ;;  %5082 = vmatprep.subr.bf16.mxu1 %v7310_v2  ;;  %v1848_v17 = vadd.f32 %v1847_v12, %v1616_v33 }
 0x270   : > { %v1851_v16 = vpop.f32.mrb[26].mxu0  ;;  %v1850_v23 = vadd.f32 %v1849_v14, %v1620_v35 }
 0x271   : > { %v1852_v19 = vadd.f32 %v1851_v16, %v1616_v33  ;;  %v1853_v21 = vpop.f32.mrb[27].mxu0  ;;  %v5693_v33 = vmov -inf  }
 0x272   : > { %v1854_v24 = vadd.f32 %v1853_v21, %v1620_v35  ;;  %1223 = vst.msk [vmem:[#allocation3] sm:$0xf] %vm1222_vm6, %v5693_v33  ;;  %1224 = vst.msk [vmem:[#allocation3 + $0x4] sm:$0xf] %vm1222_vm6, %v5693_v33  ;;  %v6219_v35 = vld [vmem:[%s921_s2] ss:$0 sm:$0xff] }
 0x273   : > { %v6178_v25 = vpack.c.bf16 %v1852_v19, %v1848_v17  ;;  %1225 = vst.msk [vmem:[#allocation3 + $0x8] sm:$0xf] %vm1222_vm6, %v5693_v33  ;;  %1226 = vst.msk [vmem:[#allocation3 + $0xc] sm:$0xf] %vm1222_vm6, %v5693_v33  ;;  %vm1873_vm7 = vcmp.eq.s32.totalorder %v6146_v29, %v6219_v35  ;;  %s7347_s2 = smov 64  }
 0x274   : > { %v6180_v27 = vpack.c.bf16 %v1854_v24, %v1850_v23  ;;  %1233 = vst.msk [vmem:[#allocation7] sm:$0xff] %vm1232_vm10, %v5693_v33  ;;  %1234 = vst.msk [vmem:[#allocation7 + $0x8] sm:$0xff] %vm1232_vm10, %v5693_v33 }
 0x275   : > { %v1888_v34 = vsel %vm1874_vm5, %v6178_v25, 0  ;;  %1235 = vst.msk [vmem:[#allocation7 + $0x10] sm:$0xff] %vm1232_vm10, %v5693_v33  ;;  %1236 = vst.msk [vmem:[#allocation7 + $0x18] sm:$0xff] %vm1232_vm10, %v5693_v33 }
 0x276   : > { %5083 = vmatpush3.bf16.xpose.msra.mxu1 %v1888_v34  ;;  %1237 = vst.msk [vmem:[#allocation7 + $0x20] sm:$0xff] %vm1232_vm10, %v5693_v33  ;;  %1238 = vst.msk [vmem:[#allocation7 + $0x28] sm:$0xff] %vm1232_vm10, %v5693_v33 }
 0x277   : > { %5088 = vmatprep.subr.bf16.mxu1 %v7310_v2  ;;  %1239 = vst.msk [vmem:[#allocation7 + $0x30] sm:$0xff] %vm1232_vm10, %v5693_v33  ;;  %1240 = vst.msk [vmem:[#allocation7 + $0x38] sm:$0xff] %vm1232_vm10, %v5693_v33  ;;  %v6617_v33 = vadd.s32 8, %v6146_v29 }
 0x279   : > { %v6229_v46 = vld [vmem:[#allocation3] sm:$0xf] }
 0x27d   : > { %5085 = vmatmul.mubr.msk.bf16.vlgmr.msra.gmra.mrb[12].mxu1 %vm1874_vm5, %v6185_v37 }
 0x27e   : > { %5089 = vmatpush3.bf16.msra.mxu1 %v6159_v44  ;;  %5096 = vmatprep.mubr.msk.bf16.mxu1 %vm5692_vm0, %v7310_v2 }
 0x27f   : > { %5090 = vmatprep.subr.bf16.mxu1 %v7310_v2 }
 0x282   : > { %5091 = vmatpush3.bf16.msra.mxu1 %v6166_v56 }
 0x283   : > { %5092 = vmatprep.subr.bf16.mxu1 %v7310_v2 }
 0x286   : > { %5093 = vmatpush3.bf16.msra.mxu1 %v6173_v9 }
 0x287   : > { %5094 = vmatprep.subr.bf16.mxu1 %v7310_v2 }
 0x28a   : > { %5095 = vmatpush3.bf16.msra.mxu1 %v6180_v27 }
 0x28b   : > { %5100 = vmatprep.subr.bf16.mxu1 %v7310_v2 }
 0x350   : > { %v1924_v38 = vpop.f32.mrb[12].mxu1 }
 0x351   : > { %v1930_v43 = vsel %vm1873_vm7, %v1924_v38, -1e+10  ;;  %v5086_v39 = vpop.f32.mrb[13].mxu1 }
 0x352   : > { %v1927_v40 = vpop.f32.mrb[14].mxu1  ;;  %v1933_v41 = vsel %vm1932_vm8, %v1930_v43, -inf }
 0x353   : > { %v5087_v45 = vpop.f32.mrb[15].mxu1  ;;  %1934 = vmax.xlane.f32.xlu0 %v1933_v41 }
 0x369   : > { %2175 = vrot.lane.b32.xlu0 %v6171_v7, %s7306_s5 }
 0x3e0   : > { %v1935_v47 = vpop.xlane.xlu0 %1934 }
 0x3e1   : > { %v6232_v48 = vmax.f32 %v6229_v46, %v1935_v47 }
 0x3e3   : > { %1956 = vst.msk [vmem:[#allocation3] sm:$0xf] %vm1222_vm6, %v6232_v48  ;;  %1942 = vperm.xlu1 %5429, %v6232_v48  }
 0x3e4   : > { %v2176_v19 = vpop.permute.xlu0 %2175 }
 0x3e5   : > { %v2189_v21 = vsel %vm1874_vm5, %v2176_v19, 0 }
 0x3e7   : > { %2014 = vrot.lane.b32.xlu1 %v6157_v42, %s7308_s1 }
 0x3eb   : > { %2016 = vrot.lane.b32.xlu1 %v6164_v55, %s7308_s1 }
 0x3ef   : > { %2018 = vrot.lane.b32.xlu1 %v6171_v7, %s7308_s1 }
 0x3f3   : > { %2020 = vrot.lane.b32.xlu1 %v6178_v25, %s7308_s1 }
 0x3f7   : > { %2171 = vrot.lane.b32.xlu1 %v6157_v42, %s7306_s5 }
 0x3fb   : > { %2008 = vrot.lane.b32.xlu1 %v6185_v37, %s7308_s1 }
 0x3ff   : > { %2173 = vrot.lane.b32.xlu1 %v6164_v55, %s7306_s5 }
 0x403   : > { %2177 = vrot.lane.b32.xlu1 %v6178_v25, %s7306_s5 }
 0x407   : > { %2169 = vrot.lane.b32.xlu1 %v6185_v37, %s7306_s5 }
 0x462   : > { %v1943_v50 = vpop.permute.xlu1 %1942 }
 0x463   : > { %v1945_v51 = vsub.f32 %v1930_v43, %v1943_v50 }
 0x465   : > { %v1946_v52 = vmul.f32 1.442695, %v1945_v51 }
 0x466   : > { %v2015_v57 = vpop.permute.xlu1 %2014 }
 0x467   : > { %5590 = vpow2.f32 %v1946_v52  ;;  %v2026_v59 = vsel %vm1874_vm5, %v2015_v57, 0 }
 0x46a   : > { %v2017_v60 = vpop.permute.xlu1 %2016 }
 0x46b   : > { %v2029_v62 = vsel %vm1874_vm5, %v2017_v60, 0 }
 0x46e   : > { %v2019_v0 = vpop.permute.xlu1 %2018 }
 0x46f   : > { %v2032_v1 = vsel %vm1874_vm5, %v2019_v0, 0 }
 0x471   : > { %v6257_v53 = vpop.eup %5590 }
 0x472   : > { %v1962_v58 = vpack.c.bf16 %v6257_v53, %v6257_v53  ;;  %v2021_v4 = vpop.permute.xlu1 %2020 }
 0x473   : > { %v2035_v5 = vsel %vm1874_vm5, %v2021_v4, 0 }
 0x474   : > { %5097 = vmatmul.mubr.msk.bf16.vlgmr.msra.gmra.mrb[16].mxu1 %vm1963_vm9, %v1962_v58 }
 0x475   : > { %5101 = vmatpush3.bf16.xpose.msra.mxu1 %v2026_v59  ;;  %5108 = vmatprep.mubr.msk.bf16.mxu1 %vm5692_vm0, %v7310_v2 }
 0x476   : > { %5102 = vmatprep.subr.bf16.mxu1 %v7310_v2  ;;  %v2172_v11 = vpop.permute.xlu1 %2171 }
 0x477   : > { %v2183_v14 = vsel %vm1874_vm5, %v2172_v11, 0 }
 0x47a   : > { %v2009_v12 = vpop.permute.xlu1 %2008 }
 0x47d   : > { %5103 = vmatpush3.bf16.xpose.msra.mxu1 %v2029_v62  ;;  %v6308_v62 = vld [vmem:[#allocation3 + $0x4] sm:$0xf] }
 0x47e   : > { %5104 = vmatprep.subr.bf16.mxu1 %v7310_v2  ;;  %v2174_v16 = vpop.permute.xlu1 %2173 }
 0x47f   : > { %v2186_v17 = vsel %vm1874_vm5, %v2174_v16, 0 }
 0x482   : > { %v2178_v23 = vpop.permute.xlu1 %2177 }
 0x483   : > { %v2192_v24 = vsel %vm1874_vm5, %v2178_v23, 0 }
 0x485   : > { %5105 = vmatpush3.bf16.xpose.msra.mxu1 %v2032_v1 }
 0x486   : > { %5106 = vmatprep.subr.bf16.mxu1 %v7310_v2  ;;  %v2170_v31 = vpop.permute.xlu1 %2169 }
 0x48d   : > { %5107 = vmatpush3.bf16.xpose.msra.mxu1 %v2035_v5 }
 0x48e   : > { %5124 = vmatprep.subr.bf16.mxu1 %v7310_v2 }
 0x494   : > { %5109 = vmatmul.mubr.msk.bf16.vlgmr.msra.gmra.mrb[20].mxu1 %vm1874_vm5, %v2009_v12 }
 0x495   : > { %5125 = vmatpush3.bf16.xpose.msra.mxu1 %v2183_v14  ;;  %5132 = vmatprep.mubr.msk.bf16.mxu1 %vm5692_vm0, %v7310_v2 }
 0x496   : > { %5126 = vmatprep.subr.bf16.mxu1 %v7310_v2 }
 0x49d   : > { %5127 = vmatpush3.bf16.xpose.msra.mxu1 %v2186_v17 }
 0x49e   : > { %5128 = vmatprep.subr.bf16.mxu1 %v7310_v2 }
 0x4a5   : > { %5129 = vmatpush3.bf16.xpose.msra.mxu1 %v2189_v21 }
 0x4a6   : > { %5130 = vmatprep.subr.bf16.mxu1 %v7310_v2 }
 0x4ad   : > { %5131 = vmatpush3.bf16.xpose.msra.mxu1 %v2192_v24 }
 0x4ae   : > { %5160 = vmatprep.subr.bf16.mxu1 %v7310_v2 }
 0x4b4   : > { %5133 = vmatmul.mubr.msk.bf16.vlgmr.msra.gmra.mrb[24].mxu1 %vm1874_vm5, %v2170_v31 }
 0x4b5   : > { %5168 = vmatprep.mubr.msk.bf16.mxu1 %vm5692_vm0, %v7310_v2 }
 0x547   : > { %v6286_v34 = vpop.f32.mrb[16].mxu1 }
 0x548   : > { %7342 = vst [vmem:[#allocation15_spill] sm:$0xff] %v6286_v34  ;;  %v5098_v36 = vpop.f32.mrb[17].mxu1 }
 0x549   : > { %v2004_v38 = vpop.f32.mrb[18].mxu1 }
 0x54a   : > { %v5099_v43 = vpop.f32.mrb[19].mxu1 }
 0x567   : > { %v2071_v39 = vpop.f32.mrb[20].mxu1 }
 0x568   : > { %v2077_v40 = vsel %vm1873_vm7, %v2071_v39, -1e+10  ;;  %v5110_v41 = vpop.f32.mrb[21].mxu1 }
 0x569   : > { %v2074_v45 = vpop.f32.mrb[22].mxu1  ;;  %v2080_v47 = vsel %vm1932_vm8, %v2077_v40, -inf }
 0x56a   : > { %2081 = vmax.xlane.f32.xlu1 %v2080_v47  ;;  %v5111_v50 = vpop.f32.mrb[23].mxu1 }
 0x587   : > { %v2228_v51 = vpop.f32.mrb[24].mxu1 }
 0x588   : > { %v2234_v52 = vsel %vm1873_vm7, %v2228_v51, -1e+10  ;;  %v5134_v57 = vpop.f32.mrb[25].mxu1 }
 0x589   : > { %v2231_v58 = vpop.f32.mrb[26].mxu1  ;;  %v2237_v59 = vsel %vm1932_vm8, %v2234_v52, -inf }
 0x58a   : > { %2238 = vmax.xlane.f32.xlu0 %v2237_v59  ;;  %v5135_v60 = vpop.f32.mrb[27].mxu1 }
 0x5a0   : > { %2114 = vrot.lane.b32.xlu0 %v6159_v44, %s7308_s1 }
 0x5a4   : > { %2267 = vrot.lane.b32.xlu0 %v6159_v44, %s7306_s5 }
 0x5a8   : > { %2271 = vrot.lane.b32.xlu0 %v6173_v9, %s7306_s5 }
 0x5ac   : > { %2324 = vrot.lane.b32.xlu0 %v6157_v42, %s7304_s0  ;;  %v6324_v42 = vld [vmem:[#allocation3 + $0x8] sm:$0xf] }
 0x5b0   : > { %2328 = vrot.lane.b32.xlu0 %v6171_v7, %s7304_s0 }
 0x5b4   : > { %2322 = vrot.lane.b32.xlu0 %v6185_v37, %s7304_s0 }
 0x5f7   : > { %v2082_v0 = vpop.xlane.xlu1 %2081 }
 0x5f8   : > { %v6311_v1 = vmax.f32 %v6308_v62, %v2082_v0 }
 0x5fa   : > { %2103 = vst.msk [vmem:[#allocation3 + $0x4] sm:$0xf] %vm1222_vm6, %v6311_v1  ;;  %2089 = vperm.xlu1 %5429, %v6311_v1  }
 0x5fe   : > { %2116 = vrot.lane.b32.xlu1 %v6166_v56, %s7308_s1 }
 0x602   : > { %2118 = vrot.lane.b32.xlu1 %v6173_v9, %s7308_s1 }
 0x606   : > { %2120 = vrot.lane.b32.xlu1 %v6180_v27, %s7308_s1 }
 0x617   : > { %v2239_v7 = vpop.xlane.xlu0 %2238 }
 0x618   : > { %v6327_v37 = vmax.f32 %v6324_v42, %v2239_v7 }
 0x61a   : > { %2260 = vst.msk [vmem:[#allocation3 + $0x8] sm:$0xf] %vm1222_vm6, %v6327_v37  ;;  %2246 = vperm.xlu1 %5429, %v6327_v37  }
 0x61b   : > { %v2115_v11 = vpop.permute.xlu0 %2114 }
 0x61c   : > { %5113 = vmatpush3.bf16.msra.mxu0 %v2115_v11 }
 0x61d   : > { %5114 = vmatprep.subr.bf16.mxu0 %v7310_v2 }
 0x61e   : > { %2269 = vrot.lane.b32.xlu1 %v6166_v56, %s7306_s5 }
 0x61f   : > { %v2268_v23 = vpop.permute.xlu0 %2267 }
 0x622   : > { %2273 = vrot.lane.b32.xlu1 %v6180_v27, %s7306_s5 }
 0x623   : > { %v2272_v43 = vpop.permute.xlu0 %2271 }
 0x626   : > { %2326 = vrot.lane.b32.xlu1 %v6164_v55, %s7304_s0 }
 0x627   : > { %v2325_v45 = vpop.permute.xlu0 %2324 }
 0x628   : > { %v2336_v47 = vsel %vm1874_vm5, %v2325_v45, 0 }
 0x62a   : > { %2330 = vrot.lane.b32.xlu1 %v6178_v25, %s7304_s0 }
 0x679   : > { %v2090_v12 = vpop.permute.xlu1 %2089 }
 0x67a   : > { %v2092_v14 = vsub.f32 %v2077_v40, %v2090_v12 }
 0x67c   : > { %v2093_v16 = vmul.f32 1.442695, %v2092_v14 }
 0x67d   : > { %v2117_v17 = vpop.permute.xlu1 %2116 }
 0x67e   : > { %5592 = vpow2.f32 %v2093_v16  ;;  %5115 = vmatpush3.bf16.msra.mxu0 %v2117_v17 }
 0x67f   : > { %5116 = vmatprep.subr.bf16.mxu0 %v7310_v2 }
 0x681   : > { %v2119_v19 = vpop.permute.xlu1 %2118 }
 0x682   : > { %5117 = vmatpush3.bf16.msra.mxu0 %v2119_v19 }
 0x683   : > { %5118 = vmatprep.subr.bf16.mxu0 %v7310_v2 }
 0x685   : > { %v2121_v21 = vpop.permute.xlu1 %2120 }
 0x686   : > { %5119 = vmatpush3.bf16.msra.mxu0 %v2121_v21 }
 0x687   : > { %5136 = vmatprep.subr.bf16.mxu0 %v7310_v2 }
 0x688   : > { %v6346_v55 = vpop.eup %5592 }
 0x689   : > { %v2109_v25 = vpack.c.bf16 %v6346_v55, %v6346_v55 }
 0x68b   : > { %5121 = vmatmul.mubr.msk.bf16.vlgmr.msra.gmra.mrb[28].mxu0 %vm1963_vm9, %v2109_v25 }
 0x68c   : > { %5137 = vmatpush3.bf16.msra.mxu0 %v2268_v23  ;;  %5144 = vmatprep.mubr.msk.bf16.mxu0 %vm5692_vm0, %v7310_v2 }
 0x68d   : > { %5138 = vmatprep.subr.bf16.mxu0 %v7310_v2 }
 0x699   : > { %v2247_v24 = vpop.permute.xlu1 %2246 }
 0x69a   : > { %v2249_v31 = vsub.f32 %v2234_v52, %v2247_v24  ;;  %v2329_v52 = vpop.permute.xlu0 %2328 }
 0x69b   : > { %v2342_v57 = vsel %vm1874_vm5, %v2329_v52, 0  ;;  %v5498_v52 = vld [vmem:[%s7287_s15] ss:$8 sps:$4 sm:$0xff]  }
 0x69c   : > { %v2250_v36 = vmul.f32 1.442695, %v2249_v31 }
 0x69d   : > { %v2270_v38 = vpop.permute.xlu1 %2269 }
 0x69e   : > { %5594 = vpow2.f32 %v2250_v36  ;;  %5139 = vmatpush3.bf16.msra.mxu0 %v2270_v38  ;;  %v2323_v60 = vpop.permute.xlu0 %2322  ;;  %v6383_v38 = vld [vmem:[#allocation3 + $0xc] sm:$0xf] }
 0x69f   : > { %5140 = vmatprep.subr.bf16.mxu0 %v7310_v2 }
 0x6a1   : > { %v2274_v39 = vpop.permute.xlu1 %2273 }
 0x6a2   : > { %5141 = vmatpush3.bf16.msra.mxu0 %v2272_v43 }
 0x6a3   : > { %5142 = vmatprep.subr.bf16.mxu0 %v7310_v2 }
 0x6a5   : > { %v2327_v50 = vpop.permute.xlu1 %2326 }
 0x6a6   : > { %5143 = vmatpush3.bf16.msra.mxu0 %v2274_v39  ;;  %v2339_v51 = vsel %vm1874_vm5, %v2327_v50, 0 }
 0x6a7   : > { %5148 = vmatprep.subr.bf16.mxu0 %v7310_v2 }
 0x6a8   : > { %v6357_v40 = vpop.eup %5594 }
 0x6a9   : > { %v2266_v41 = vpack.c.bf16 %v6357_v40, %v6357_v40  ;;  %v2331_v58 = vpop.permute.xlu1 %2330 }
 0x6aa   : > { %v2345_v59 = vsel %vm1874_vm5, %v2331_v58, 0  ;;  %v5503_v58 = vld [vmem:[%s7287_s15 + $0x14] ss:$8 sps:$4 sm:$0xff]  }
 0x6ab   : > { %5145 = vmatmul.mubr.msk.bf16.vlgmr.msra.gmra.mrb[32].mxu0 %vm1963_vm9, %v2266_v41 }
 0x6ac   : > { %5156 = vmatprep.mubr.msk.bf16.mxu0 %vm5692_vm0, %v7310_v2 }
 0x6af   : > { %5149 = vmatpush3.bf16.xpose.msra.mxu0 %v2336_v47 }
 0x6b0   : > { %5150 = vmatprep.subr.bf16.mxu0 %v7310_v2 }
 0x6b7   : > { %5151 = vmatpush3.bf16.xpose.msra.mxu0 %v2339_v51 }
 0x6b8   : > { %5152 = vmatprep.subr.bf16.mxu0 %v7310_v2 }
 0x6bf   : > { %5153 = vmatpush3.bf16.xpose.msra.mxu0 %v2342_v57 }
 0x6c0   : > { %5154 = vmatprep.subr.bf16.mxu0 %v7310_v2 }
 0x6c7   : > { %5155 = vmatpush3.bf16.xpose.msra.mxu0 %v2345_v59  ;;  %v5501_v59 = vld [vmem:[%s7287_s15 + $0x10] ss:$8 sps:$4 sm:$0xff]  }
 0x6c8   : > { %5184 = vmatprep.subr.bf16.mxu0 %v7310_v2 }
 0x6ce   : > { %5157 = vmatmul.mubr.msk.bf16.vlgmr.msra.gmra.mrb[36].mxu0 %vm1874_vm5, %v2323_v60  ;;  %v5506_v60 = vld [vmem:[%s7287_s15 + $0x24] ss:$8 sps:$4 sm:$0xff]  }
 0x6cf   : > { %5192 = vmatprep.mubr.msk.bf16.mxu0 %vm5692_vm0, %v7310_v2 }
 0x75e   : > { %v6375_v0 = vpop.f32.mrb[28].mxu0 }
 0x75f   : > { %v5122_v7 = vpop.f32.mrb[29].mxu0 }
 0x760   : > { %v2166_v11 = vpop.f32.mrb[30].mxu0  ;;  %v5504_v7 = vld [vmem:[%s7287_s15 + $0x20] ss:$8 sps:$4 sm:$0xff]  }
 0x761   : > { %v5123_v12 = vpop.f32.mrb[31].mxu0  ;;  %v5509_v11 = vld [vmem:[%s7287_s15 + $0x34] ss:$8 sps:$4 sm:$0xff]  }
 0x762   : > { %v5507_v12 = vld [vmem:[%s7287_s15 + $0x30] ss:$8 sps:$4 sm:$0xff]  }
 0x77e   : > { %v6377_v14 = vpop.f32.mrb[32].mxu0 }
 0x77f   : > { %v5146_v16 = vpop.f32.mrb[33].mxu0 }
 0x780   : > { %v2319_v17 = vpop.f32.mrb[34].mxu0  ;;  %v5512_v16 = vld [vmem:[%s7287_s15 + $0x44] ss:$8 sps:$4 sm:$0xff]  }
 0x781   : > { %v5147_v19 = vpop.f32.mrb[35].mxu0  ;;  %v5510_v17 = vld [vmem:[%s7287_s15 + $0x40] ss:$8 sps:$4 sm:$0xff]  }
 0x782   : > { %v5515_v19 = vld [vmem:[%s7287_s15 + $0x54] ss:$8 sps:$4 sm:$0xff]  }
 0x7a1   : > { %v2381_v21 = vpop.f32.mrb[36].mxu0 }
 0x7a2   : > { %v2387_v25 = vsel %vm1873_vm7, %v2381_v21, -1e+10  ;;  %v5158_v23 = vpop.f32.mrb[37].mxu0  ;;  %v5513_v21 = vld [vmem:[%s7287_s15 + $0x50] ss:$8 sps:$4 sm:$0xff]  }
 0x7a3   : > { %v2384_v24 = vpop.f32.mrb[38].mxu0  ;;  %v2390_v31 = vsel %vm1932_vm8, %v2387_v25, -inf  ;;  %v5516_v23 = vld [vmem:[%s7287_s15 + $0x60] ss:$8 sps:$4 sm:$0xff]  }
 0x7a4   : > { %2391 = vmax.xlane.f32.xlu1 %v2390_v31  ;;  %v5159_v36 = vpop.f32.mrb[39].mxu0  ;;  %v5521_v24 = vld [vmem:[%s7287_s15 + $0x74] ss:$8 sps:$4 sm:$0xff]   ;;  %v5519_v31 = vld [vmem:[%s7287_s15 + $0x70] ss:$8 sps:$4 sm:$0xff]  }
 0x7a5   : > { %v5524_v36 = vld [vmem:[%s7287_s15 + $0x84] ss:$8 sps:$4 sm:$0xff]  }
 0x831   : > { %v2392_v43 = vpop.xlane.xlu1 %2391 }
 0x832   : > { %v6386_v39 = vmax.f32 %v6383_v38, %v2392_v43  ;;  %v5522_v43 = vld [vmem:[%s7287_s15 + $0x80] ss:$8 sps:$4 sm:$0xff]  }
 0x834   : > { %2413 = vst.msk [vmem:[#allocation3 + $0xc] sm:$0xf] %vm1222_vm6, %v6386_v39  ;;  %2399 = vperm.xlu0 %5428, %v6386_v39  }
 0x838   : > { %2420 = vrot.lane.b32.xlu0 %v6159_v44, %s7304_s0 }
 0x83c   : > { %2422 = vrot.lane.b32.xlu0 %v6166_v56, %s7304_s0  ;;  %v5500_v56 = vld [vmem:[%s7287_s15 + $0x4] ss:$8 sps:$4 sm:$0xff]  }
 0x840   : > { %2424 = vrot.lane.b32.xlu0 %v6173_v9, %s7304_s0 }
 0x844   : > { %2426 = vrot.lane.b32.xlu0 %v6180_v27, %s7304_s0  ;;  %s927_s0 = scalar_lea.vmem %s7345_s30, %s7382_s29  ;;  %s7370_s30 = sshll.u32 %s7382_s29, 5 }
 0x8b3   : > { %v2400_v35 = vpop.permute.xlu0 %2399 }
 0x8b4   : > { %v2402_v45 = vsub.f32 %v2387_v25, %v2400_v35  ;;  %v5518_v25 = vld [vmem:[%s7287_s15 + $0x64] ss:$8 sps:$4 sm:$0xff]   ;;  %v5527_v35 = vld [vmem:[%s7287_s15 + $0x94] ss:$8 sps:$4 sm:$0xff]  }
 0x8b6   : > { %v2403_v47 = vmul.f32 1.442695, %v2402_v45  ;;  %v5525_v45 = vld [vmem:[%s7287_s15 + $0x90] ss:$8 sps:$4 sm:$0xff]  }
 0x8b7   : > { %v2421_v50 = vpop.permute.xlu0 %2420 }
 0x8b8   : > { %5596 = vpow2.f32 %v2403_v47  ;;  %5161 = vmatpush3.bf16.msra.mxu1 %v2421_v50  ;;  %v5530_v47 = vld [vmem:[%s7287_s15 + $0xa4] ss:$8 sps:$4 sm:$0xff]   ;;  %v5528_v50 = vld [vmem:[%s7287_s15 + $0xa0] ss:$8 sps:$4 sm:$0xff]  }
 0x8b9   : > { %5162 = vmatprep.subr.bf16.mxu1 %v7310_v2 }
 0x8bb   : > { %v2423_v51 = vpop.permute.xlu0 %2422 }
 0x8bc   : > { %5163 = vmatpush3.bf16.msra.mxu1 %v2423_v51  ;;  %v5533_v51 = vld [vmem:[%s7287_s15 + $0xb4] ss:$8 sps:$4 sm:$0xff]  }
 0x8bd   : > { %5164 = vmatprep.subr.bf16.mxu1 %v7310_v2 }
 0x8bf   : > { %v2425_v44 = vpop.permute.xlu0 %2424 }
 0x8c0   : > { %5165 = vmatpush3.bf16.msra.mxu1 %v2425_v44  ;;  %v5531_v44 = vld [vmem:[%s7287_s15 + $0xb0] ss:$8 sps:$4 sm:$0xff]  }
 0x8c1   : > { %5166 = vmatprep.subr.bf16.mxu1 %v7310_v2 }
 0x8c2   : > { %v6407_v9 = vpop.eup %5596 }
 0x8c3   : > { %v2427_v27 = vpop.permute.xlu0 %2426  ;;  %v2419_v57 = vpack.c.bf16 %v6407_v9, %v6407_v9 }
 0x8c4   : > { %5167 = vmatpush3.bf16.msra.mxu1 %v2427_v27  ;;  %v5534_v27 = vld [vmem:[%s7287_s15 + $0xc0] ss:$8 sps:$4 sm:$0xff]  }
 0x8c5   : > { %2703 = vmatprep.subr.bf16.mxu1 %v5500_v56  ;;  %v5536_v56 = vld [vmem:[%s7287_s15 + $0xc4] ss:$8 sps:$4 sm:$0xff]  }
 0x8c7   : > { %5169 = vmatmul.mubr.msk.bf16.vlgmr.msra.gmra.mrb[28].mxu1 %vm1963_vm9, %v2419_v57  ;;  %v5537_v57 = vld [vmem:[%s7287_s15 + $0xd0] ss:$8 sps:$4 sm:$0xff]  }
 0x8c8   : > { %2704 = vmatpush1.bf16.msra.mxu1 %v5498_v52  ;;  %2735 = vmatprep.mubr.bf16.mxu1 %v6100_v54  ;;  %v5539_v52 = vld [vmem:[%s7287_s15 + $0xd4] ss:$8 sps:$4 sm:$0xff]  }
 0x8c9   : > { %2705 = vmatprep.subr.bf16.mxu1 %v5503_v58  ;;  %v5542_v58 = vld [vmem:[%s7287_s15 + $0xe4] ss:$8 sps:$4 sm:$0xff]  }
 0x8cc   : > { %2706 = vmatpush1.bf16.msra.mxu1 %v5501_v59  ;;  %v5540_v59 = vld [vmem:[%s7287_s15 + $0xe0] ss:$8 sps:$4 sm:$0xff]  }
 0x8cd   : > { %2707 = vmatprep.subr.bf16.mxu1 %v5506_v60  ;;  %v5545_v60 = vld [vmem:[%s7287_s15 + $0xf4] ss:$8 sps:$4 sm:$0xff]  }
 0x8d0   : > { %2708 = vmatpush1.bf16.msra.mxu1 %v5504_v7  ;;  %v5543_v7 = vld [vmem:[%s7287_s15 + $0xf0] ss:$8 sps:$4 sm:$0xff]  }
 0x8d1   : > { %2709 = vmatprep.subr.bf16.mxu1 %v5509_v11 }
 0x8d4   : > { %2710 = vmatpush1.bf16.msra.mxu1 %v5507_v12 }
 0x8d5   : > { %2711 = vmatprep.subr.bf16.mxu1 %v5512_v16 }
 0x8d8   : > { %2712 = vmatpush1.bf16.msra.mxu1 %v5510_v17 }
 0x8d9   : > { %2713 = vmatprep.subr.bf16.mxu1 %v5515_v19  ;;  %v2531_v19 = vld [vmem:[%s7288_s16] sm:$0x3] }
 0x8dc   : > { %2714 = vmatpush1.bf16.msra.mxu1 %v5513_v21  ;;  %v2536_v21 = vrot.slane %v2531_v19, %v1615_v30 }
 0x8dd   : > { %2715 = vmatprep.subr.bf16.mxu1 %v5518_v25 }
 0x8e0   : > { %2716 = vmatpush1.bf16.msra.mxu1 %v5516_v23  ;;  %v2540_v23 = vrot.slane %v2531_v19, %v1619_v32 }
 0x8e1   : > { %2717 = vmatprep.subr.bf16.mxu1 %v5521_v24 }
 0x8e4   : > { %2718 = vmatpush1.bf16.msra.mxu1 %v5519_v31 }
 0x8e5   : > { %2719 = vmatprep.subr.bf16.mxu1 %v5524_v36 }
 0x8e8   : > { %2720 = vmatpush1.bf16.msra.mxu1 %v5522_v43 }
 0x8e9   : > { %2721 = vmatprep.subr.bf16.mxu1 %v5527_v35 }
 0x8ec   : > { %2722 = vmatpush1.bf16.msra.mxu1 %v5525_v45 }
 0x8ed   : > { %2723 = vmatprep.subr.bf16.mxu1 %v5530_v47 }
 0x8f0   : > { %2724 = vmatpush1.bf16.msra.mxu1 %v5528_v50 }
 0x8f1   : > { %2725 = vmatprep.subr.bf16.mxu1 %v5533_v51 }
 0x8f4   : > { %2726 = vmatpush1.bf16.msra.mxu1 %v5531_v44 }
 0x8f5   : > { %2727 = vmatprep.subr.bf16.mxu1 %v5536_v56 }
 0x8f8   : > { %2728 = vmatpush1.bf16.msra.mxu1 %v5534_v27 }
 0x8f9   : > { %2729 = vmatprep.subr.bf16.mxu1 %v5539_v52 }
 0x8fc   : > { %2730 = vmatpush1.bf16.msra.mxu1 %v5537_v57 }
 0x8fd   : > { %2731 = vmatprep.subr.bf16.mxu1 %v5542_v58 }
 0x900   : > { %2732 = vmatpush1.bf16.msra.mxu1 %v5540_v59 }
 0x901   : > { %2733 = vmatprep.subr.bf16.mxu1 %v5545_v60 }
 0x904   : > { %2734 = vmatpush1.bf16.msra.mxu1 %v5543_v7 }
 0x905   : > { %5172 = vmatprep.subr.bf16.mxu1 %v7310_v2 }
 0x907   : > { %2736 = vmatmul.mubr.bf16.vlgmr.msra.gmra.mrb[32].mxu1 %v6134_v22 }
 0x908   : > { %2745 = vmatprep.mubr.bf16.mxu1 %v6112_v3 }
 0x90f   : > { %2746 = vmatmul.mubr.bf16.gmra.mrb[36].mxu1 %v6132_v20 }
 0x910   : > { %2755 = vmatprep.mubr.bf16.mxu1 %v6121_v10 }
 0x917   : > { %2756 = vmatmul.mubr.bf16.gmra.mrb[40].mxu1 %v6140_v28 }
 0x918   : > { %2765 = vmatprep.mubr.bf16.mxu1 %v6130_v18 }
 0x91f   : > { %2766 = vmatmul.mubr.bf16.gmra.mrb[44].mxu1 %v6138_v26 }
 0x920   : > { %5180 = vmatprep.mubr.msk.bf16.mxu1 %vm5692_vm0, %v7310_v2 }
 0x99a   : > { %v6516_v11 = vpop.f32.mrb[28].mxu1 }
 0x99b   : > { %v5170_v12 = vpop.f32.mrb[29].mxu1 }
 0x99c   : > { %v2472_v16 = vpop.f32.mrb[30].mxu1 }
 0x99d   : > { %v5171_v17 = vpop.f32.mrb[31].mxu1 }
 0x9da   : > { %v2737_v25 = vpop.f32.mrb[32].mxu1 }
 0x9db   : > { %v2739_v24 = vpop.f32.mrb[33].mxu1  ;;  %v2738_v36 = vadd.f32 %v2737_v25, %v2536_v21 }
 0x9dc   : > { %v2741_v31 = vpop.f32.mrb[34].mxu1  ;;  %v2740_v45 = vadd.f32 %v2739_v24, %v2540_v23 }
 0x9dd   : > { %v2742_v43 = vadd.f32 %v2741_v31, %v2536_v21  ;;  %v2743_v35 = vpop.f32.mrb[35].mxu1 }
 0x9de   : > { %v2744_v47 = vadd.f32 %v2743_v35, %v2540_v23 }
 0x9df   : > { %v6525_v50 = vpack.c.bf16 %v2742_v43, %v2738_v36 }
 0x9e0   : > { %v6527_v51 = vpack.c.bf16 %v2744_v47, %v2740_v45 }
 0x9e1   : > { %v2800_v44 = vsel %vm1874_vm5, %v6525_v50, 0 }
 0x9e2   : > { %v2747_v56 = vpop.f32.mrb[36].mxu1  ;;  %5173 = vmatpush3.bf16.xpose.msra.mxu1 %v2800_v44  ;;  %5185 = vmatpush3.bf16.msra.mxu0 %v6527_v51 }
 0x9e3   : > { %v2749_v30 = vpop.f32.mrb[37].mxu1  ;;  %5174 = vmatprep.subr.bf16.mxu1 %v7310_v2  ;;  %5186 = vmatprep.subr.bf16.mxu0 %v7310_v2  ;;  %v2748_v27 = vadd.f32 %v2747_v56, %v2536_v21 }
 0x9e4   : > { %v2751_v32 = vpop.f32.mrb[38].mxu1  ;;  %v2750_v58 = vadd.f32 %v2749_v30, %v2540_v23  ;;  %v4645_v30 = vld [vmem:[%s7286_s14] ss:$0 sm:$0xff] }
 0x9e5   : > { %v2752_v52 = vadd.f32 %v2751_v32, %v2536_v21  ;;  %v2753_v57 = vpop.f32.mrb[39].mxu1 }
 0x9e6   : > { %v2754_v59 = vadd.f32 %v2753_v57, %v2540_v23 }
 0x9e7   : > { %v6534_v60 = vpack.c.bf16 %v2752_v52, %v2748_v27 }
 0x9e8   : > { %v6536_v7 = vpack.c.bf16 %v2754_v59, %v2750_v58 }
 0x9e9   : > { %v2803_v12 = vsel %vm1874_vm5, %v6534_v60, 0 }
 0x9ea   : > { %v2757_v16 = vpop.f32.mrb[40].mxu1  ;;  %5175 = vmatpush3.bf16.xpose.msra.mxu1 %v2803_v12  ;;  %5187 = vmatpush3.bf16.msra.mxu0 %v6536_v7  ;;  %v6556_v12 = vadd.f32 %v4645_v30, %v6107_v61 }
 0x9eb   : > { %v2759_v17 = vpop.f32.mrb[41].mxu1  ;;  %5176 = vmatprep.subr.bf16.mxu1 %v7310_v2  ;;  %5188 = vmatprep.subr.bf16.mxu0 %v7310_v2  ;;  %v2758_v25 = vadd.f32 %v2757_v16, %v2536_v21  ;;  %v6559_v16 = vadd.f32 %v4645_v30, %v6109_v63  ;;  %v6614_v63 = vld [vmem:[%s927_s0] ss:$0 sm:$0xff] }
 0x9ec   : > { %v2761_v19 = vpop.f32.mrb[42].mxu1  ;;  %v2760_v36 = vadd.f32 %v2759_v17, %v2540_v23  ;;  %7343 = vst [vmem:[#allocation16_spill] sm:$0xff] %v6556_v12  ;;  %vm2794_vm11 = vcmp.eq.s32.totalorder %v6146_v29, %v6614_v63  ;;  %vm2795_vm12 = vcmp.eq.s32.totalorder %v6617_v33, %v6614_v63  ;;  %v1950_v63 = vsel %vm1932_vm8, %v6257_v53, 0.0 }
 0x9ed   : > { %v2762_v24 = vadd.f32 %v2761_v19, %v2536_v21  ;;  %v2763_v31 = vpop.f32.mrb[43].mxu1  ;;  %7344 = vst [vmem:[#allocation17_spill] sm:$0xff] %v6559_v16  ;;  %v2255_v33 = vsel %vm1932_vm8, %v6357_v40, 0.0 }
 0x9ee   : > { %v2764_v43 = vadd.f32 %v2763_v31, %v2540_v23 }
 0x9ef   : > { %v6543_v35 = vpack.c.bf16 %v2762_v24, %v2758_v25 }
 0x9f0   : > { %v6545_v45 = vpack.c.bf16 %v2764_v43, %v2760_v36 }
 0x9f1   : > { %v2806_v47 = vsel %vm1874_vm5, %v6543_v35, 0 }
 0x9f2   : > { %v2767_v44 = vpop.f32.mrb[44].mxu1  ;;  %5177 = vmatpush3.bf16.xpose.msra.mxu1 %v2806_v47  ;;  %5189 = vmatpush3.bf16.msra.mxu0 %v6545_v45 }
 0x9f3   : > { %v2769_v56 = vpop.f32.mrb[45].mxu1  ;;  %5178 = vmatprep.subr.bf16.mxu1 %v7310_v2  ;;  %5190 = vmatprep.subr.bf16.mxu0 %v7310_v2  ;;  %v2768_v27 = vadd.f32 %v2767_v44, %v2536_v21 }
 0x9f4   : > { %v2771_v32 = vpop.f32.mrb[46].mxu1  ;;  %v2770_v58 = vadd.f32 %v2769_v56, %v2540_v23 }
 0x9f5   : > { %v2772_v52 = vadd.f32 %v2771_v32, %v2536_v21  ;;  %v2773_v57 = vpop.f32.mrb[47].mxu1  ;;  %v2786_v21 = vmul.f32 0.088388346, %v6556_v12  ;;  %v6631_v32 = vld [vmem:[#allocation7] sm:$0xff] }
 0x9f6   : > { %v2774_v59 = vadd.f32 %v2773_v57, %v2540_v23  ;;  %v2787_v23 = vmul.f32 0.088388346, %v6559_v16 }
 0x9f7   : > { %v6561_v17 = vpack.c.bf16 %v2772_v52, %v2768_v27  ;;  %v6633_v52 = vld [vmem:[#allocation7 + $0x8] sm:$0xff] }
 0x9f8   : > { %v6563_v19 = vpack.c.bf16 %v2774_v59, %v2770_v58  ;;  %v6572_v61 = vpack.c.bf16 %v2787_v23, %v2786_v21  ;;  %v6730_v59 = vld [vmem:[#allocation7 + $0x18] sm:$0xff] }
 0x9f9   : > { %v2809_v25 = vsel %vm1874_vm5, %v6561_v17, 0 }
 0x9fa   : > { %5179 = vmatpush3.bf16.xpose.msra.mxu1 %v2809_v25  ;;  %5191 = vmatpush3.bf16.msra.mxu0 %v6563_v19 }
 0x9fb   : > { %5196 = vmatprep.subr.bf16.mxu0 %v7310_v2  ;;  %5208 = vmatprep.subr.bf16.mxu1 %v7310_v2 }
 0xa01   : > { %5181 = vmatmul.mubr.msk.bf16.vlgmr.msra.gmra.mrb[48].mxu1 %vm1874_vm5, %v6572_v61 }
 0xa02   : > { %5216 = vmatprep.mubr.msk.bf16.mxu1 %vm5692_vm0, %v7310_v2 }
 0xad4   : > { %v2845_v24 = vpop.f32.mrb[48].mxu1 }
 0xad5   : > { %v2852_v31 = vsel %vm2794_vm11, %v2845_v24, -1e+10  ;;  %v5182_v36 = vpop.f32.mrb[49].mxu1 }
 0xad6   : > { %v2848_v43 = vpop.f32.mrb[50].mxu1  ;;  %v2856_v47 = vsel %vm1963_vm9, %v2852_v31, -inf }
 0xad7   : > { %v2853_v44 = vsel %vm2795_vm12, %v2848_v43, -1e+10  ;;  %2857 = vmax.xlane.f32.xlu0 %v2856_v47  ;;  %v5183_v56 = vpop.f32.mrb[51].mxu1 }
 0xad8   : > { %v2859_v30 = vsel %vm1963_vm9, %v2853_v44, -inf }
 0xad9   : > { %2860 = vmax.xlane.f32.xlu1 %v2859_v30 }
 0xb64   : > { %v2858_v27 = vpop.xlane.xlu0 %2857 }
 0xb65   : > { %v6636_v57 = vmax.f32 %v6631_v32, %v2858_v27 }
 0xb66   : > { %v2861_v58 = vpop.xlane.xlu1 %2860 }
 0xb67   : > { %2901 = vst.msk [vmem:[#allocation7] sm:$0xff] %vm1232_vm10, %v6636_v57  ;;  %v6643_v25 = vmax.f32 %v6633_v52, %v2861_v58  ;;  %2872 = vperm.xlu1 %5429, %v6636_v57  }
 0xb69   : > { %2902 = vst.msk [vmem:[#allocation7 + $0x8] sm:$0xff] %vm1232_vm10, %v6643_v25  ;;  %2877 = vperm.xlu0 %5428, %v6643_v25  }
 0xb6b   : > { %2965 = vrot.lane.b32.xlu1 %v6525_v50, %s7346_s4 }
 0xb6d   : > { %2959 = vrot.lane.b32.xlu0 %v6572_v61, %s7346_s4 }
 0xb6f   : > { %2967 = vrot.lane.b32.xlu1 %v6534_v60, %s7346_s4 }
 0xb71   : > { %3158 = vrot.lane.b32.xlu0 %v6543_v35, %s7347_s2 }
 0xb73   : > { %2969 = vrot.lane.b32.xlu1 %v6543_v35, %s7346_s4 }
 0xb75   : > { %3152 = vrot.lane.b32.xlu0 %v6572_v61, %s7347_s2 }
 0xb77   : > { %2971 = vrot.lane.b32.xlu1 %v6561_v17, %s7346_s4 }
 0xb7b   : > { %3154 = vrot.lane.b32.xlu1 %v6525_v50, %s7347_s2 }
 0xb7f   : > { %3156 = vrot.lane.b32.xlu1 %v6534_v60, %s7347_s2 }
 0xb83   : > { %3160 = vrot.lane.b32.xlu1 %v6561_v17, %s7347_s2 }
 0xbe6   : > { %v2873_v23 = vpop.permute.xlu1 %2872 }
 0xbe7   : > { %v2880_v24 = vsub.f32 %v2852_v31, %v2873_v23 }
 0xbe8   : > { %v2878_v36 = vpop.permute.xlu0 %2877 }
 0xbe9   : > { %v2882_v43 = vmul.f32 1.442695, %v2880_v24  ;;  %v2881_v47 = vsub.f32 %v2853_v44, %v2878_v36 }
 0xbea   : > { %v2966_v58 = vpop.permute.xlu1 %2965 }
 0xbeb   : > { %v2884_v56 = vmul.f32 1.442695, %v2881_v47  ;;  %5598 = vpow2.f32 %v2882_v43  ;;  %v2977_v41 = vsel %vm1874_vm5, %v2966_v58, 0 }
 0xbec   : > { %v2960_v43 = vpop.permute.xlu0 %2959 }
 0xbed   : > { %5600 = vpow2.f32 %v2884_v56 }
 0xbee   : > { %v2968_v31 = vpop.permute.xlu1 %2967 }
 0xbef   : > { %v2980_v44 = vsel %vm1874_vm5, %v2968_v31, 0 }
 0xbf0   : > { %v3159_v31 = vpop.permute.xlu0 %3158 }
 0xbf2   : > { %v2970_v23 = vpop.permute.xlu1 %2969 }
 0xbf3   : > { %v2983_v24 = vsel %vm1874_vm5, %v2970_v23, 0 }
 0xbf5   : > { %v6671_v30 = vpop.eup %5598 }
 0xbf6   : > { %v2972_v36 = vpop.permute.xlu1 %2971 }
 0xbf7   : > { %v6673_v27 = vpop.eup %5600 }
 0xbf8   : > { %v2913_v21 = vpack.c.bf16 %v6673_v27, %v6671_v30  ;;  %v2893_v40 = vsel %vm1963_vm9, %v6673_v27, 0.0  ;;  %v7355_v27 = vsub.f32 %v6631_v32, %v6636_v57 }
 0xbfa   : > { %5193 = vmatmul.mubr.msk.bf16.vlgmr.msra.gmra.mrb[40].mxu0 %vm1963_vm9, %v2913_v21  ;;  %v3155_v21 = vpop.permute.xlu1 %3154 }
 0xbfb   : > { %5197 = vmatpush3.bf16.xpose.msra.mxu0 %v2977_v41  ;;  %5204 = vmatprep.mubr.msk.bf16.mxu0 %vm5692_vm0, %v7310_v2  ;;  %v2986_v41 = vsel %vm1874_vm5, %v2972_v36, 0  ;;  %v3166_v47 = vsel %vm1874_vm5, %v3155_v21, 0  ;;  %v3153_v36 = vpop.permute.xlu0 %3152 }
 0xbfc   : > { %5198 = vmatprep.subr.bf16.mxu0 %v7310_v2 }
 0xbfe   : > { %v3157_v56 = vpop.permute.xlu1 %3156 }
 0xbff   : > { %v3169_v58 = vsel %vm1874_vm5, %v3157_v56, 0 }
 0xc02   : > { %v3161_v23 = vpop.permute.xlu1 %3160 }
 0xc03   : > { %5199 = vmatpush3.bf16.xpose.msra.mxu0 %v2980_v44  ;;  %v3172_v44 = vsel %vm1874_vm5, %v3159_v31, 0 }
 0xc04   : > { %5200 = vmatprep.subr.bf16.mxu0 %v7310_v2 }
 0xc0b   : > { %5201 = vmatpush3.bf16.xpose.msra.mxu0 %v2983_v24  ;;  %v3175_v24 = vsel %vm1874_vm5, %v3161_v23, 0 }
 0xc0c   : > { %5202 = vmatprep.subr.bf16.mxu0 %v7310_v2 }
 0xc13   : > { %5203 = vmatpush3.bf16.xpose.msra.mxu0 %v2986_v41 }
 0xc14   : > { %5220 = vmatprep.subr.bf16.mxu0 %v7310_v2 }
 0xc1a   : > { %5205 = vmatmul.mubr.msk.bf16.vlgmr.msra.gmra.mrb[44].mxu0 %vm1874_vm5, %v2960_v43 }
 0xc1b   : > { %5221 = vmatpush3.bf16.xpose.msra.mxu0 %v3166_v47  ;;  %5228 = vmatprep.mubr.msk.bf16.mxu0 %vm5692_vm0, %v7310_v2 }
 0xc1c   : > { %5222 = vmatprep.subr.bf16.mxu0 %v7310_v2 }
 0xc23   : > { %5223 = vmatpush3.bf16.xpose.msra.mxu0 %v3169_v58 }
 0xc24   : > { %5224 = vmatprep.subr.bf16.mxu0 %v7310_v2 }
 0xc2b   : > { %5225 = vmatpush3.bf16.xpose.msra.mxu0 %v3172_v44 }
 0xc2c   : > { %5226 = vmatprep.subr.bf16.mxu0 %v7310_v2 }
 0xc33   : > { %5227 = vmatpush3.bf16.xpose.msra.mxu0 %v3175_v24 }
 0xc34   : > { %5256 = vmatprep.subr.bf16.mxu0 %v7310_v2 }
 0xc3a   : > { %5229 = vmatmul.mubr.msk.bf16.vlgmr.msra.gmra.mrb[48].mxu0 %vm1874_vm5, %v3153_v36 }
 0xc3b   : > { %5264 = vmatprep.mubr.msk.bf16.mxu0 %vm5692_vm0, %v7310_v2 }
 0xccd   : > { %v6702_v41 = vpop.f32.mrb[40].mxu0 }
 0xcce   : > { %7348 = vst [vmem:[#allocation18_spill] sm:$0xff] %v6702_v41  ;;  %v5194_v21 = vpop.f32.mrb[41].mxu0 }
 0xccf   : > { %v6704_v43 = vpop.f32.mrb[42].mxu0 }
 0xcd0   : > { %7349 = vst [vmem:[#allocation19_spill] sm:$0xff] %v6704_v43  ;;  %v5195_v47 = vpop.f32.mrb[43].mxu0 }
 0xced   : > { %v3022_v56 = vpop.f32.mrb[44].mxu0 }
 0xcee   : > { %v3029_v58 = vsel %vm2794_vm11, %v3022_v56, -1e+10  ;;  %v5206_v31 = vpop.f32.mrb[45].mxu0 }
 0xcef   : > { %v3025_v44 = vpop.f32.mrb[46].mxu0  ;;  %v3034_v23 = vsel %vm1963_vm9, %v3029_v58, -inf }
 0xcf0   : > { %v3030_v24 = vsel %vm2795_vm12, %v3025_v44, -1e+10  ;;  %3035 = vmax.xlane.f32.xlu1 %v3034_v23  ;;  %v5207_v36 = vpop.f32.mrb[47].mxu0 }
 0xcf1   : > { %v3037_v21 = vsel %vm1963_vm9, %v3030_v24, -inf }
 0xcf2   : > { %3038 = vmax.xlane.f32.xlu0 %v3037_v21  ;;  %v6728_v21 = vld [vmem:[#allocation7 + $0x10] sm:$0xff] }
 0xd0d   : > { %v3211_v5 = vpop.f32.mrb[48].mxu0 }
 0xd0e   : > { %v6717_v47 = vsel %vm2794_vm11, %v3211_v5, -1e+10  ;;  %v5230_v56 = vpop.f32.mrb[49].mxu0 }
 0xd0f   : > { %v3214_v31 = vpop.f32.mrb[50].mxu0  ;;  %v3223_v49 = vsel %vm1963_vm9, %v6717_v47, -inf }
 0xd10   : > { %v6724_v44 = vsel %vm2795_vm12, %v3214_v31, -1e+10  ;;  %3224 = vmax.xlane.f32.xlu0 %v3223_v49  ;;  %v5231_v23 = vpop.f32.mrb[51].mxu0 }
 0xd11   : > { %v3226_v36 = vsel %vm1963_vm9, %v6724_v44, -inf }
 0xd14   : > { %3227 = vmax.xlane.f32.xlu0 %v3226_v36 }
 0xd7d   : > { %v3036_v5 = vpop.xlane.xlu1 %3035 }
 0xd7e   : > { %v6733_v56 = vmax.f32 %v6728_v21, %v3036_v5  ;;  %v6761_v5 = vld [vmem:[#allocation7 + $0x28] sm:$0xff] }
 0xd7f   : > { %v3039_v4 = vpop.xlane.xlu0 %3038 }
 0xd80   : > { %3079 = vst.msk [vmem:[#allocation7 + $0x10] sm:$0xff] %vm1232_vm10, %v6733_v56  ;;  %v6740_v49 = vmax.f32 %v6730_v59, %v3039_v4  ;;  %3050 = vperm.xlu1 %5429, %v6733_v56   ;;  %v6756_v4 = vld [vmem:[#allocation7 + $0x20] sm:$0xff] }
 0xd82   : > { %3080 = vst.msk [vmem:[#allocation7 + $0x18] sm:$0xff] %vm1232_vm10, %v6740_v49  ;;  %3055 = vperm.xlu0 %5428, %v6740_v49  }
 0xd84   : > { %3096 = vrot.lane.b32.xlu1 %v6527_v51, %s7346_s4 }
 0xd86   : > { %3102 = vrot.lane.b32.xlu0 %v6563_v19, %s7346_s4 }
 0xd88   : > { %3098 = vrot.lane.b32.xlu1 %v6536_v7, %s7346_s4 }
 0xd8c   : > { %3100 = vrot.lane.b32.xlu1 %v6545_v45, %s7346_s4 }
 0xd9d   : > { %v3225_v23 = vpop.xlane.xlu0 %3224 }
 0xd9e   : > { %v6759_v36 = vmax.f32 %v6756_v4, %v3225_v23 }
 0xda0   : > { %3268 = vst.msk [vmem:[#allocation7 + $0x20] sm:$0xff] %vm1232_vm10, %v6759_v36  ;;  %3239 = vperm.xlu1 %5429, %v6759_v36   ;;  %v7359_v32 = vsub.f32 %v6756_v4, %v6759_v36 }
 0xda1   : > { %v3228_v2 = vpop.xlane.xlu0 %3227 }
 0xda2   : > { %v6769_v16 = vmax.f32 %v6761_v5, %v3228_v2 }
 0xda4   : > { %3269 = vst.msk [vmem:[#allocation7 + $0x28] sm:$0xff] %vm1232_vm10, %v6769_v16  ;;  %3244 = vperm.xlu0 %5428, %v6769_v16   ;;  %3281 = vrot.lane.b32.xlu1 %v6527_v51, %s7347_s2 }
 0xda8   : > { %3283 = vrot.lane.b32.xlu0 %v6536_v7, %s7347_s2  ;;  %3285 = vrot.lane.b32.xlu1 %v6545_v45, %s7347_s2 }
 0xdac   : > { %3287 = vrot.lane.b32.xlu0 %v6563_v19, %s7347_s2  ;;  %3339 = vrot.lane.b32.xlu1 %v6525_v50, %s7350_s7  ;;  %v7351_v50 = vmov 0.0  }
 0xdb0   : > { %3341 = vrot.lane.b32.xlu0 %v6534_v60, %s7350_s7  ;;  %3343 = vrot.lane.b32.xlu1 %v6543_v35, %s7350_s7 }
 0xdb4   : > { %3345 = vrot.lane.b32.xlu0 %v6561_v17, %s7350_s7  ;;  %3337 = vrot.lane.b32.xlu1 %v6572_v61, %s7350_s7 }
 0xdff   : > { %v3051_v2 = vpop.permute.xlu1 %3050 }
 0xe00   : > { %v3058_v23 = vsub.f32 %v3029_v58, %v3051_v2 }
 0xe01   : > { %v3056_v12 = vpop.permute.xlu0 %3055 }
 0xe02   : > { %v3060_v31 = vmul.f32 1.442695, %v3058_v23  ;;  %v3059_v43 = vsub.f32 %v3030_v24, %v3056_v12 }
 0xe03   : > { %v3097_v41 = vpop.permute.xlu1 %3096 }
 0xe04   : > { %v3062_v34 = vmul.f32 1.442695, %v3059_v43  ;;  %5209 = vmatpush3.bf16.msra.mxu1 %v3097_v41  ;;  %5602 = vpow2.f32 %v3060_v31 }
 0xe05   : > { %5210 = vmatprep.subr.bf16.mxu1 %v7351_v50  ;;  %v3103_v61 = vpop.permute.xlu0 %3102 }
 0xe06   : > { %5604 = vpow2.f32 %v3062_v34 }
 0xe07   : > { %v3099_v60 = vpop.permute.xlu1 %3098 }
 0xe08   : > { %5211 = vmatpush3.bf16.msra.mxu1 %v3099_v60 }
 0xe09   : > { %5212 = vmatprep.subr.bf16.mxu1 %v7351_v50 }
 0xe0b   : > { %v3101_v35 = vpop.permute.xlu1 %3100 }
 0xe0c   : > { %5213 = vmatpush3.bf16.msra.mxu1 %v3101_v35 }
 0xe0d   : > { %5214 = vmatprep.subr.bf16.mxu1 %v7351_v50 }
 0xe0e   : > { %v6797_v17 = vpop.eup %5602 }
 0xe10   : > { %v6799_v58 = vpop.eup %5604  ;;  %5215 = vmatpush3.bf16.msra.mxu1 %v3103_v61 }
 0xe11   : > { %v3091_v12 = vpack.c.bf16 %v6799_v58, %v6797_v17  ;;  %5232 = vmatprep.subr.bf16.mxu1 %v7351_v50 }
 0xe13   : > { %5217 = vmatmul.mubr.msk.bf16.vlgmr.msra.gmra.mrb[52].mxu1 %vm1963_vm9, %v3091_v12 }
 0xe14   : > { %5240 = vmatprep.mubr.msk.bf16.mxu1 %vm5692_vm0, %v7351_v50 }
 0xe1f   : > { %v3240_v34 = vpop.permute.xlu1 %3239 }
 0xe20   : > { %v3247_v41 = vsub.f32 %v6717_v47, %v3240_v34 }
 0xe22   : > { %v3249_v43 = vmul.f32 1.442695, %v3247_v41 }
 0xe23   : > { %v3245_v24 = vpop.permute.xlu0 %3244  ;;  %v3282_v31 = vpop.permute.xlu1 %3281 }
 0xe24   : > { %v3248_v2 = vsub.f32 %v6724_v44, %v3245_v24  ;;  %5233 = vmatpush3.bf16.msra.mxu1 %v3282_v31  ;;  %5606 = vpow2.f32 %v3249_v43 }
 0xe25   : > { %5234 = vmatprep.subr.bf16.mxu1 %v7351_v50 }
 0xe26   : > { %v3251_v23 = vmul.f32 1.442695, %v3248_v2 }
 0xe27   : > { %v3284_v60 = vpop.permute.xlu0 %3283  ;;  %v3286_v35 = vpop.permute.xlu1 %3285 }
 0xe28   : > { %5608 = vpow2.f32 %v3251_v23  ;;  %5235 = vmatpush3.bf16.msra.mxu1 %v3284_v60 }
 0xe29   : > { %5236 = vmatprep.subr.bf16.mxu1 %v7351_v50 }
 0xe2b   : > { %v3288_v47 = vpop.permute.xlu0 %3287  ;;  %v3340_v34 = vpop.permute.xlu1 %3339 }
 0xe2c   : > { %5237 = vmatpush3.bf16.msra.mxu1 %v3286_v35  ;;  %v3351_v41 = vsel %vm1874_vm5, %v3340_v34, 0 }
 0xe2d   : > { %5238 = vmatprep.subr.bf16.mxu1 %v7351_v50 }
 0xe2e   : > { %v6812_v61 = vpop.eup %5606 }
 0xe2f   : > { %v3342_v43 = vpop.permute.xlu0 %3341  ;;  %v3344_v31 = vpop.permute.xlu1 %3343 }
 0xe30   : > { %5239 = vmatpush3.bf16.msra.mxu1 %v3288_v47  ;;  %v3354_v24 = vsel %vm1874_vm5, %v3342_v43, 0  ;;  %v3357_v2 = vsel %vm1874_vm5, %v3344_v31, 0 }
 0xe31   : > { %5244 = vmatprep.subr.bf16.mxu1 %v7351_v50 }
 0xe32   : > { %v6815_v44 = vpop.eup %5608 }
 0xe33   : > { %v3280_v12 = vpack.c.bf16 %v6815_v44, %v6812_v61  ;;  %v3346_v23 = vpop.permute.xlu0 %3345  ;;  %v3338_v35 = vpop.permute.xlu1 %3337  ;;  %v3261_v53 = vsel %vm1963_vm9, %v6815_v44, 0.0  ;;  %v3258_v44 = vsel %vm1963_vm9, %v6812_v61, 0.0  ;;  %v7358_v61 = vsub.f32 %v6324_v42, %v6327_v37 }
 0xe34   : > { %v3360_v60 = vsel %vm1874_vm5, %v3346_v23, 0 }
 0xe35   : > { %5241 = vmatmul.mubr.msk.bf16.vlgmr.msra.gmra.mrb[56].mxu1 %vm1963_vm9, %v3280_v12 }
 0xe36   : > { %5252 = vmatprep.mubr.msk.bf16.mxu1 %vm5692_vm0, %v7351_v50 }
 0xe39   : > { %5245 = vmatpush3.bf16.xpose.msra.mxu1 %v3351_v41 }
 0xe3a   : > { %5246 = vmatprep.subr.bf16.mxu1 %v7351_v50 }
 0xe41   : > { %5247 = vmatpush3.bf16.xpose.msra.mxu1 %v3354_v24 }
 0xe42   : > { %5248 = vmatprep.subr.bf16.mxu1 %v7351_v50 }
 0xe49   : > { %5249 = vmatpush3.bf16.xpose.msra.mxu1 %v3357_v2 }
 0xe4a   : > { %5250 = vmatprep.subr.bf16.mxu1 %v7351_v50 }
 0xe51   : > { %5251 = vmatpush3.bf16.xpose.msra.mxu1 %v3360_v60 }
 0xe52   : > { %5340 = vmatprep.subr.bf16.mxu1 %v7351_v50 }
 0xe58   : > { %5253 = vmatmul.mubr.msk.bf16.vlgmr.msra.gmra.mrb[60].mxu1 %vm1874_vm5, %v3338_v35 }
 0xe59   : > { %5356 = vmatprep.mubr.msk.bf16.mxu1 %vm5692_vm0, %v7351_v50 }
 0xee6   : > { %v6833_v47 = vpop.f32.mrb[52].mxu1 }
 0xee7   : > { %v5218_v12 = vpop.f32.mrb[53].mxu1 }
 0xee8   : > { %v6835_v34 = vpop.f32.mrb[54].mxu1 }
 0xee9   : > { %7352 = vst [vmem:[#allocation20_spill] sm:$0xff] %v6835_v34  ;;  %v5219_v41 = vpop.f32.mrb[55].mxu1 }
 0xf08   : > { %v6837_v43 = vpop.f32.mrb[56].mxu1 }
 0xf09   : > { %v5242_v24 = vpop.f32.mrb[57].mxu1 }
 0xf0a   : > { %v6839_v31 = vpop.f32.mrb[58].mxu1 }
 0xf0b   : > { %7353 = vst [vmem:[#allocation21_spill] sm:$0xff] %v6839_v31  ;;  %v5243_v2 = vpop.f32.mrb[59].mxu1  ;;  %v3406_v31 = vld [vmem:[#allocation7 + $0x30] sm:$0xff] }
 0xf2b   : > { %v3396_v23 = vpop.f32.mrb[60].mxu1 }
 0xf2c   : > { %v6844_v60 = vsel %vm2794_vm11, %v3396_v23, -1e+10  ;;  %v5254_v35 = vpop.f32.mrb[61].mxu1  ;;  %v6855_v23 = vld [vmem:[#allocation7 + $0x38] sm:$0xff] }
 0xf2d   : > { %v3399_v26 = vpop.f32.mrb[62].mxu1  ;;  %v3408_v12 = vsel %vm1963_vm9, %v6844_v60, -inf }
 0xf2e   : > { %v6851_v41 = vsel %vm2795_vm12, %v3399_v26, -1e+10  ;;  %3409 = vmax.xlane.f32.xlu0 %v3408_v12  ;;  %v5255_v24 = vpop.f32.mrb[63].mxu1  ;;  %v2242_v12 = vmul.f32 1.442695, %v7358_v61  ;;  %v5555_v61 = vld [vmem:[%s7291_s19 + $0x8] sm:$0xff]  }
 0xf2f   : > { %v3411_v2 = vsel %vm1963_vm9, %v6851_v41, -inf }
 0xf30   : > { %3412 = vmax.xlane.f32.xlu1 %v3411_v2 }
 0xfbb   : > { %v3410_v29 = vpop.xlane.xlu0 %3409 }
 0xfbc   : > { %v3414_v35 = vmax.f32 %v3406_v31, %v3410_v29 }
 0xfbd   : > { %v3413_v34 = vpop.xlane.xlu1 %3412 }
 0xfbe   : > { %v3416_v28 = vsub.f32 %v3406_v31, %v3414_v35  ;;  %3453 = vst.msk [vmem:[#allocation7 + $0x30] sm:$0xff] %vm1232_vm10, %v3414_v35  ;;  %v6859_v20 = vmax.f32 %v6855_v23, %v3413_v34  ;;  %3424 = vperm.xlu0 %5428, %v3414_v35   ;;  %v2866_v34 = vmul.f32 1.442695, %v7355_v27  ;;  %v5552_v27 = vld [vmem:[%s7292_s20 + $0x30] sm:$0xff]  }
 0xfc0   : > { %v3417_v26 = vsub.f32 %v6855_v23, %v6859_v20  ;;  %3454 = vst.msk [vmem:[#allocation7 + $0x38] sm:$0xff] %vm1232_vm10, %v6859_v20  ;;  %3429 = vperm.xlu1 %5429, %v6859_v20   ;;  %v5566_v20 = vld [vmem:[%s7293_s21 + $0x20] sm:$0xff]  }
 0xfc2   : > { %3466 = vrot.lane.b32.xlu0 %v6527_v51, %s7350_s7  ;;  %v2098_v51 = vsel %vm1932_vm8, %v6346_v55, 0.0  ;;  %v3069_v55 = vsel %vm1963_vm9, %v6797_v17, 0.0  ;;  %v7356_v17 = vsub.f32 %v6229_v46, %v6232_v48  ;;  %v3233_v46 = vmul.f32 1.442695, %v7359_v32 }
 0xfc3   : > { %v7360_v48 = vsub.f32 %v6383_v38, %v6386_v39 }
 0xfc4   : > { %3468 = vrot.lane.b32.xlu1 %v6536_v7, %s7350_s7  ;;  %v2408_v7 = vsel %vm1932_vm8, %v6407_v9, 0.0  ;;  %v1938_v31 = vmul.f32 1.442695, %v7356_v17  ;;  %v7361_v17 = vsub.f32 %v6761_v5, %v6769_v16  ;;  %v2253_v16 = vld [vmem:[#allocation4 + $0x8] sm:$0xf] }
 0xfc5   : > { %v2395_v57 = vmul.f32 1.442695, %v7360_v48  ;;  %v2406_v48 = vld [vmem:[#allocation4 + $0xc] sm:$0xf] }
 0xfc6   : > { %3470 = vrot.lane.b32.xlu0 %v6545_v45, %s7350_s7  ;;  %v2890_v45 = vsel %vm1963_vm9, %v6671_v30, 0.0  ;;  %v3072_v30 = vsel %vm1963_vm9, %v6799_v58, 0.0 }
 0xfc8   : > { %3472 = vrot.lane.b32.xlu1 %v6563_v19, %s7350_s7  ;;  %v7354_v19 = vsub.f32 %v6308_v62, %v6311_v1  ;;  %v7357_v62 = vsub.f32 %v6728_v21, %v6733_v56  ;;  %v3418_v21 = vmul.f32 1.442695, %v3416_v28 }
 0xfca   : > { %v2085_v9 = vmul.f32 1.442695, %v7354_v19  ;;  %v3044_v1 = vmul.f32 1.442695, %v7357_v62  ;;  %v1948_v62 = vld [vmem:[#allocation4] sm:$0xf] }
 0xfcc   : > { %5610 = vpow2.f32 %v2085_v9  ;;  %v5548_v9 = vld [vmem:[%s7292_s20 + $0x10] sm:$0xff]  }
 0xfcd   : > { %5612 = vpow2.f32 %v2866_v34  ;;  %v5553_v34 = vld [vmem:[%s7292_s20 + $0x38] sm:$0xff]  }
 0xfce   : > { %5614 = vpow2.f32 %v1938_v31  ;;  %v3235_v31 = vmul.f32 1.442695, %v7361_v17 }
 0xfcf   : > { %5616 = vpow2.f32 %v3044_v1 }
 0xfd0   : > { %5618 = vpow2.f32 %v2242_v12 }
 0xfd1   : > { %5620 = vpow2.f32 %v3233_v46  ;;  %v2096_v46 = vld [vmem:[#allocation4 + $0x4] sm:$0xf] }
 0xfd2   : > { %5622 = vpow2.f32 %v2395_v57 }
 0xfd3   : > { %5624 = vpow2.f32 %v3418_v21 }
 0xfd6   : > { %v6906_v58 = vpop.eup %5610 }
 0xfd7   : > { %v6920_v56 = vpop.eup %5612 }
 0xfd8   : > { %v6923_v42 = vpop.eup %5614 }
 0xfd9   : > { %v6926_v37 = vpop.eup %5616  ;;  %v1949_v12 = vmul.f32 %v6923_v42, %v1948_v62 }
 0xfda   : > { %v6929_v38 = vpop.eup %5618 }
 0xfe5   : > { %1951 = vadd.xlane.f32.xlu0 %v1950_v63 }
 0xfe9   : > { %2256 = vadd.xlane.f32.xlu0 %v2255_v33 }
 0xfec   : > { %2099 = vadd.xlane.f32.xlu1 %v2098_v51 }
 0xfed   : > { %2409 = vadd.xlane.f32.xlu0 %v2408_v7 }
 0xff0   : > { %2891 = vadd.xlane.f32.xlu1 %v2890_v45 }
 0xff1   : > { %3262 = vadd.xlane.f32.xlu0 %v3261_v53 }
 0xff4   : > { %2894 = vadd.xlane.f32.xlu1 %v2893_v40 }
 0xff8   : > { %3070 = vadd.xlane.f32.xlu1 %v3069_v55  ;;  %v5547_v55 = vld [vmem:[%s7292_s20 + $0x8] sm:$0xff]  }
 0xffc   : > { %3073 = vadd.xlane.f32.xlu1 %v3072_v30  ;;  %v5549_v30 = vld [vmem:[%s7292_s20 + $0x18] sm:$0xff]  }
0x1000   : > { %3259 = vadd.xlane.f32.xlu1 %v3258_v44  ;;  %v5550_v44 = vld [vmem:[%s7292_s20 + $0x20] sm:$0xff]  }
0x1007   : > { %2106 = vperm.xlu0 %5428, %v6906_v58  }
0x100b   : > { %2482 = vrot.lane.b32.xlu0 %v6375_v0, %s7350_s7  ;;  %v6932_v0 = vpop.eup %5620 }
0x100c   : > { %v6935_v28 = vpop.eup %5622 }
0x100d   : > { %v6938_v39 = vpop.eup %5624 }
0x100f   : > { %2905 = vperm.xlu0 %5428, %v6920_v56  }
0x1011   : > { %1959 = vperm.xlu1 %5429, %v6923_v42   ;;  %v5557_v42 = vld [vmem:[%s7291_s19 + $0x18] sm:$0xff]  }
0x1013   : > { %3083 = vperm.xlu0 %5428, %v6926_v37  }
0x1015   : > { %2263 = vperm.xlu1 %5429, %v6929_v38  }
0x1017   : > { %3272 = vperm.xlu0 %5428, %v6932_v0  }
0x1019   : > { %2416 = vperm.xlu1 %5429, %v6935_v28  }
0x101b   : > { %3457 = vperm.xlu0 %5428, %v6938_v39  }
0x103d   : > { %v3425_v4 = vpop.permute.xlu0 %3424 }
0x103e   : > { %v3432_v36 = vsub.f32 %v6844_v60, %v3425_v4  ;;  %v5546_v60 = vld [vmem:[%s7292_s20] sm:$0xff]   ;;  %v2097_v4 = vmul.f32 %v6906_v58, %v2096_v46 }
0x103f   : > { %v3430_v24 = vpop.permute.xlu1 %3429 }
0x1040   : > { %v3434_v2 = vmul.f32 1.442695, %v3432_v36  ;;  %v3433_v29 = vsub.f32 %v6851_v41, %v3430_v24  ;;  %v2407_v36 = vmul.f32 %v6935_v28, %v2406_v48  ;;  %v2886_v24 = vld [vmem:[#allocation8] sm:$0xff] }
0x1041   : > { %v3467_v35 = vpop.permute.xlu0 %3466  ;;  %v5571_v28 = vld [vmem:[%s7283_s11 + $0x8] sm:$0xff]  }
0x1042   : > { %5626 = vpow2.f32 %v3434_v2  ;;  %v3436_v63 = vmul.f32 1.442695, %v3433_v29  ;;  %5257 = vmatpush3.bf16.msra.mxu0 %v3467_v35  ;;  %v3255_v35 = vld [vmem:[#allocation8 + $0x28] sm:$0xff] }
0x1043   : > { %5258 = vmatprep.subr.bf16.mxu0 %v7351_v50  ;;  %v3469_v33 = vpop.permute.xlu1 %3468 }
0x1044   : > { %5628 = vpow2.f32 %v3436_v63 }
0x1045   : > { %v3471_v51 = vpop.permute.xlu0 %3470  ;;  %5630 = vpow2.f32 %v3235_v31  ;;  %v3066_v31 = vld [vmem:[#allocation8 + $0x18] sm:$0xff] }
0x1046   : > { %5259 = vmatpush3.bf16.msra.mxu0 %v3469_v33  ;;  %v2888_v33 = vmul.f32 %v6920_v56, %v2886_v24  ;;  %v5559_v56 = vld [vmem:[%s7291_s19 + $0x28] sm:$0xff]  }
0x1047   : > { %5260 = vmatprep.subr.bf16.mxu0 %v7351_v50  ;;  %v3473_v7 = vpop.permute.xlu1 %3472 }
0x104a   : > { %5261 = vmatpush3.bf16.msra.mxu0 %v3471_v51 }
0x104b   : > { %5262 = vmatprep.subr.bf16.mxu0 %v7351_v50 }
0x104c   : > { %v5627_v41 = vpop.eup %5626 }
0x104d   : > { %v3443_v45 = vsel %vm1963_vm9, %v5627_v41, 0.0 }
0x104e   : > { %v5629_v53 = vpop.eup %5628  ;;  %3444 = vadd.xlane.f32.xlu1 %v3443_v45  ;;  %5263 = vmatpush3.bf16.msra.mxu0 %v3473_v7 }
0x104f   : > { %v3465_v40 = vpack.c.bf16 %v5629_v53, %v5627_v41  ;;  %5268 = vmatprep.subr.bf16.mxu0 %v5546_v60  ;;  %v3446_v19 = vsel %vm1963_vm9, %v5629_v53, 0.0  ;;  %v2887_v41 = vld [vmem:[#allocation8 + $0x8] sm:$0xff] }
0x1051   : > { %5265 = vmatmul.mubr.msk.bf16.vlgmr.msra.gmra.mrb[52].mxu0 %vm1963_vm9, %v3465_v40  ;;  %v5572_v40 = vld [vmem:[%s7283_s11 + $0x10] sm:$0xff]  }
0x1052   : > { %3447 = vadd.xlane.f32.xlu1 %v3446_v19  ;;  %5269 = vmatpush3.bf16.msra.mxu0 %v5546_v60 }
0x1053   : > { %5284 = vmatprep.mubr.bf16.mxu0 %v6116_v8  ;;  %5270 = vmatprep.subr.bf16.mxu0 %v5547_v55  ;;  %v5551_v8 = vld [vmem:[%s7292_s20 + $0x28] sm:$0xff]  }
0x1056   : > { %5271 = vmatpush3.bf16.msra.mxu0 %v5547_v55 }
0x1057   : > { %5272 = vmatprep.subr.bf16.mxu0 %v5548_v9 }
0x105a   : > { %5273 = vmatpush3.bf16.msra.mxu0 %v5548_v9  ;;  %v3065_v9 = vld [vmem:[#allocation8 + $0x10] sm:$0xff] }
0x105b   : > { %5274 = vmatprep.subr.bf16.mxu0 %v5549_v30 }
0x105e   : > { %5275 = vmatpush3.bf16.msra.mxu0 %v5549_v30 }
0x105f   : > { %5276 = vmatprep.subr.bf16.mxu0 %v5550_v44 }
0x1062   : > { %5277 = vmatpush3.bf16.msra.mxu0 %v5550_v44 }
0x1063   : > { %2486 = vrot.lane.b32.xlu1 %v6377_v14, %s7347_s2  ;;  %5278 = vmatprep.subr.bf16.mxu0 %v5551_v8  ;;  %v5554_v14 = vld [vmem:[%s7291_s19] sm:$0xff]  }
0x1066   : > { %5279 = vmatpush3.bf16.msra.mxu0 %v5551_v8  ;;  %v5560_v8 = vld [vmem:[%s7291_s19 + $0x30] sm:$0xff]  }
0x1067   : > { %2490 = vrot.lane.b32.xlu1 %v6516_v11, %s7346_s4  ;;  %5280 = vmatprep.subr.bf16.mxu0 %v5552_v27  ;;  %v7362_v11 = vsub.f32 %v6633_v52, %v6643_v25  ;;  %v5556_v52 = vld [vmem:[%s7291_s19 + $0x10] sm:$0xff]   ;;  %v2254_v25 = vmul.f32 %v6929_v38, %v2253_v16 }
0x1069   : > { %v2868_v1 = vmul.f32 1.442695, %v7362_v11 }
0x106a   : > { %5281 = vmatpush3.bf16.msra.mxu0 %v5552_v27 }
0x106b   : > { %5282 = vmatprep.subr.bf16.mxu0 %v5553_v34  ;;  %5632 = vpow2.f32 %v2868_v1 }
0x106e   : > { %5283 = vmatpush3.bf16.msra.mxu0 %v5553_v34  ;;  %v3067_v34 = vmul.f32 %v6926_v37, %v3065_v9  ;;  %v5573_v37 = vld [vmem:[%s7283_s11 + $0x18] sm:$0xff]  }
0x106f   : > { %5292 = vmatprep.subr.bf16.mxu0 %v5554_v14 }
0x1071   : > { %5285 = vmatmul.mubr.bf16.vlgmr.msra.gmra.mrb[56].mxu0 %v6114_v6 }
0x1072   : > { %v1952_v32 = vpop.xlane.xlu0 %1951  ;;  %5288 = vmatprep.mubr.bf16.mxu0 %v6125_v15  ;;  %5293 = vmatpush3.bf16.msra.mxu0 %v5554_v14  ;;  %v7363_v15 = vsub.f32 %v6730_v59, %v6740_v49  ;;  %v5570_v59 = vld [vmem:[%s7283_s11] sm:$0xff]   ;;  %v7011_v49 = vpop.eup %5630 }
0x1073   : > { %v1953_v5 = vadd.f32 %v1952_v32, %v1949_v12  ;;  %5294 = vmatprep.subr.bf16.mxu0 %v5555_v61  ;;  %5341 = vmatpush3.bf16.msra.mxu1 %v5570_v59  ;;  %v3257_v60 = vmul.f32 %v7011_v49, %v3255_v35  ;;  %v3420_v59 = vmul.f32 1.442695, %v3417_v26  ;;  %v5577_v35 = vld [vmem:[%s7283_s11 + $0x38] sm:$0xff]  }
0x1074   : > { %v3046_v57 = vmul.f32 1.442695, %v7363_v15  ;;  %5342 = vmatprep.subr.bf16.mxu1 %v7351_v50 }
0x1075   : > { %1955 = vst.msk [vmem:[#allocation4] sm:$0xf] %vm1222_vm6, %v1953_v5  ;;  %v3254_v5 = vld [vmem:[#allocation8 + $0x20] sm:$0xff] }
0x1076   : > { %v2257_v6 = vpop.xlane.xlu0 %2256  ;;  %5295 = vmatpush3.bf16.msra.mxu0 %v5555_v61  ;;  %5634 = vpow2.f32 %v3046_v57  ;;  %v5561_v61 = vld [vmem:[%s7291_s19 + $0x38] sm:$0xff]   ;;  %v3256_v46 = vmul.f32 %v6932_v0, %v3254_v5  ;;  %v5574_v57 = vld [vmem:[%s7283_s11 + $0x20] sm:$0xff]  }
0x1077   : > { %v2258_v21 = vadd.f32 %v2257_v6, %v2254_v25  ;;  %5296 = vmatprep.subr.bf16.mxu0 %v5556_v52  ;;  %5343 = vmatpush3.bf16.msra.mxu1 %v5571_v28  ;;  %v5562_v25 = vld [vmem:[%s7293_s21] sm:$0xff]  }
0x1078   : > { %5344 = vmatprep.subr.bf16.mxu1 %v7351_v50 }
0x1079   : > { %2259 = vst.msk [vmem:[#allocation4 + $0x8] sm:$0xf] %vm1222_vm6, %v2258_v21  ;;  %5289 = vmatmul.mubr.bf16.gmra.mrb[60].mxu0 %v6123_v13  ;;  %v2100_v38 = vpop.xlane.xlu1 %2099  ;;  %v5558_v13 = vld [vmem:[%s7291_s19 + $0x20] sm:$0xff]  }
0x107a   : > { %v2101_v2 = vadd.f32 %v2100_v38, %v2097_v4  ;;  %v2410_v29 = vpop.xlane.xlu0 %2409  ;;  %5297 = vmatpush3.bf16.msra.mxu0 %v5556_v52  ;;  %5308 = vmatprep.mubr.bf16.mxu0 %v6100_v54  ;;  %v7023_v54 = vpop.eup %5632  ;;  %v5575_v38 = vld [vmem:[%s7283_s11 + $0x28] sm:$0xff]  }
0x107b   : > { %v2411_v58 = vadd.f32 %v2410_v29, %v2407_v36  ;;  %5298 = vmatprep.subr.bf16.mxu0 %v5557_v42  ;;  %v2889_v55 = vmul.f32 %v7023_v54, %v2887_v41  ;;  %5345 = vmatpush3.bf16.msra.mxu1 %v5572_v40  ;;  %v5564_v36 = vld [vmem:[%s7293_s21 + $0x10] sm:$0xff]  }
0x107c   : > { %v4043_v63 = vld [vmem:[#allocation4] sm:$0xf]  ;;  %2102 = vst.msk [vmem:[#allocation4 + $0x4] sm:$0xf] %vm1222_vm6, %v2101_v2  ;;  %5346 = vmatprep.subr.bf16.mxu1 %v7351_v50  ;;  %v5565_v2 = vld [vmem:[%s7293_s21 + $0x18] sm:$0xff]  }
0x107d   : > { %5636 = vrcp.f32 %v4043_v63  ;;  %2412 = vst.msk [vmem:[#allocation4 + $0xc] sm:$0xf] %vm1222_vm6, %v2411_v58  ;;  %v2892_v51 = vpop.xlane.xlu1 %2891  ;;  %v5568_v58 = vld [vmem:[%s7293_s21 + $0x30] sm:$0xff]  }
0x107e   : > { %v2896_v7 = vadd.f32 %v2892_v51, %v2888_v33  ;;  %v3263_v45 = vpop.xlane.xlu0 %3262  ;;  %5299 = vmatpush3.bf16.msra.mxu0 %v5557_v42  ;;  %v5563_v42 = vld [vmem:[%s7293_s21 + $0x8] sm:$0xff]   ;;  %v7365_v51 = vld [vmem:[#allocation14_spill] sm:$0xff]  ;;  %v7367_v41 = vld [vmem:[#allocation13_spill] sm:$0xff] }
0x107f   : > { %v3265_v53 = vadd.f32 %v3263_v45, %v3257_v60  ;;  %5300 = vmatprep.subr.bf16.mxu0 %v5558_v13  ;;  %5347 = vmatpush3.bf16.msra.mxu1 %v5573_v37  ;;  %v7366_v60 = vld [vmem:[#allocation20_spill] sm:$0xff] }
0x1080   : > { %2899 = vst.msk [vmem:[#allocation8] sm:$0xff] %vm1232_vm10, %v2896_v7  ;;  %v4057_v27 = vld [vmem:[#allocation4 + $0x8] sm:$0xf]  ;;  %v7043_v14 = vpop.eup %5634  ;;  %5348 = vmatprep.subr.bf16.mxu1 %v7351_v50 }
0x1081   : > { %3267 = vst.msk [vmem:[#allocation8 + $0x28] sm:$0xff] %vm1232_vm10, %v3265_v53  ;;  %v2895_v19 = vpop.xlane.xlu1 %2894  ;;  %v3068_v12 = vmul.f32 %v7043_v14, %v3066_v31  ;;  %v2479_v31 = vld [vmem:[#allocation5] sm:$0xf] }
0x1082   : > { %v2897_v30 = vadd.f32 %v2895_v19, %v2889_v55  ;;  %5301 = vmatpush3.bf16.msra.mxu0 %v5558_v13  ;;  %v3440_v55 = vld [vmem:[#allocation8 + $0x38] sm:$0xff] }
0x1083   : > { %v4050_v44 = vld [vmem:[#allocation4 + $0x4] sm:$0xf]  ;;  %5302 = vmatprep.subr.bf16.mxu0 %v5559_v56  ;;  %5349 = vmatpush3.bf16.msra.mxu1 %v5574_v57 }
0x1084   : > { %5638 = vrcp.f32 %v4050_v44  ;;  %2900 = vst.msk [vmem:[#allocation8 + $0x8] sm:$0xff] %vm1232_vm10, %v2897_v30  ;;  %v4064_v32 = vld [vmem:[#allocation4 + $0xc] sm:$0xf]  ;;  %5350 = vmatprep.subr.bf16.mxu1 %v7351_v50 }
0x1085   : > { %v3071_v17 = vpop.xlane.xlu1 %3070  ;;  %5640 = vrcp.f32 %v4057_v27 }
0x1086   : > { %v3075_v62 = vadd.f32 %v3071_v17, %v3067_v34  ;;  %5303 = vmatpush3.bf16.msra.mxu0 %v5559_v56  ;;  %v2107_v9 = vpop.permute.xlu0 %2106 }
0x1087   : > { %v5637_v11 = vpop.eup %5636  ;;  %v4193_v1 = vld [vmem:[#allocation8] sm:$0xff]  ;;  %5304 = vmatprep.subr.bf16.mxu0 %v5560_v8  ;;  %5351 = vmatpush3.bf16.msra.mxu1 %v5575_v38 }
0x1088   : > { %5642 = vrcp.f32 %v4193_v1  ;;  %3077 = vst.msk [vmem:[#allocation8 + $0x10] sm:$0xff] %vm1232_vm10, %v3075_v62  ;;  %4047 = vperm.xlu1 %5429, %v5637_v11   ;;  %5352 = vmatprep.subr.bf16.mxu1 %v7351_v50  ;;  %v4222_v13 = vld [vmem:[#allocation8 + $0x28] sm:$0xff]  ;;  %v7368_v11 = vld [vmem:[#allocation15_spill] sm:$0xff] }
0x1089   : > { %v3074_v16 = vpop.xlane.xlu1 %3073  ;;  %5644 = vrcp.f32 %v4064_v32 }
0x108a   : > { %v3076_v52 = vadd.f32 %v3074_v16, %v3068_v12  ;;  %5305 = vmatpush3.bf16.msra.mxu0 %v5560_v8  ;;  %v2483_v34 = vpop.permute.xlu0 %2482 }
0x108b   : > { %5306 = vmatprep.subr.bf16.mxu0 %v5561_v61  ;;  %v2493_v1 = vsel %vm1874_vm5, %v7368_v11, %v2483_v34 }
0x108c   : > { %3078 = vst.msk [vmem:[#allocation8 + $0x18] sm:$0xff] %vm1232_vm10, %v3076_v52 }
0x108d   : > { %v3260_v6 = vpop.xlane.xlu1 %3259 }
0x108e   : > { %v5639_v48 = vpop.eup %5638  ;;  %v3264_v15 = vadd.f32 %v3260_v6, %v3256_v46  ;;  %5307 = vmatpush3.bf16.msra.mxu0 %v5561_v61  ;;  %v7369_v46 = vld [vmem:[#allocation21_spill] sm:$0xff] }
0x108f   : > { %v4207_v21 = vld [vmem:[#allocation8 + $0x10] sm:$0xff]  ;;  %4054 = vperm.xlu1 %5429, %v5639_v48   ;;  %5316 = vmatprep.subr.bf16.mxu0 %v5562_v25  ;;  %v5641_v0 = vpop.eup %5640 }
0x1090   : > { %5646 = vrcp.f32 %v4207_v21  ;;  %3266 = vst.msk [vmem:[#allocation8 + $0x20] sm:$0xff] %vm1232_vm10, %v3264_v15 }
0x1091   : > { %5309 = vmatmul.mubr.bf16.vlgmr.msra.gmra.mrb[56].mxu0 %v6112_v3  ;;  %v1960_v7 = vpop.permute.xlu1 %1959 }
0x1092   : > { %v5643_v4 = vpop.eup %5642  ;;  %5317 = vmatpush3.bf16.msra.mxu0 %v5562_v25  ;;  %5312 = vmatprep.mubr.bf16.mxu0 %v6121_v10  ;;  %v5576_v10 = vld [vmem:[%s7283_s11 + $0x30] sm:$0xff]   ;;  %v2475_v27 = vsel %vm1874_vm5, %v1960_v7, %v2107_v9 }
0x1093   : > { %4061 = vperm.xlu1 %5429, %v5641_v0   ;;  %4199 = vperm.xlu0 %5428, %v5643_v4   ;;  %v5645_v3 = vpop.eup %5644  ;;  %v4208_v23 = vld [vmem:[#allocation8 + $0x18] sm:$0xff] }
0x1094   : > { %5318 = vmatprep.subr.bf16.mxu0 %v5563_v42  ;;  %5353 = vmatpush3.bf16.msra.mxu1 %v5576_v10  ;;  %v5578_v10 = vld [vmem:[%s7289_s17] sm:$0xff]  }
0x1095   : > { %5354 = vmatprep.subr.bf16.mxu1 %v7351_v50  ;;  %v2264_v45 = vpop.permute.xlu1 %2263 }
0x1096   : > { %5319 = vmatpush3.bf16.msra.mxu0 %v5563_v42 }
0x1097   : > { %v4221_v24 = vld [vmem:[#allocation8 + $0x20] sm:$0xff]  ;;  %4068 = vperm.xlu1 %5429, %v5645_v3   ;;  %5320 = vmatprep.subr.bf16.mxu0 %v5564_v36 }
0x1098   : > { %5648 = vrcp.f32 %v4221_v24  ;;  %5355 = vmatpush3.bf16.msra.mxu1 %v5577_v35 }
0x1099   : > { %5313 = vmatmul.mubr.bf16.gmra.mrb[60].mxu0 %v6130_v18  ;;  %5650 = vpow2.f32 %v3420_v59  ;;  %v4194_v18 = vld [vmem:[#allocation8 + $0x8] sm:$0xff]  ;;  %5360 = vmatprep.subr.bf16.mxu1 %v7351_v50  ;;  %v2417_v53 = vpop.permute.xlu1 %2416  ;;  %v5579_v59 = vld [vmem:[%s7289_s17 + $0x8] sm:$0xff]  }
0x109a   : > { %v5647_v29 = vpop.eup %5646  ;;  %5321 = vmatpush3.bf16.msra.mxu0 %v5564_v36  ;;  %5332 = vmatprep.mubr.bf16.mxu0 %v6134_v22  ;;  %5652 = vrcp.f32 %v4194_v18  ;;  %v5567_v22 = vld [vmem:[%s7293_s21 + $0x28] sm:$0xff]   ;;  %v4074_v36 = vld [vmem:[#allocation2] sm:$0xf] }
0x109b   : > { %2910 = vperm.xlu1 %5429, %v7023_v54   ;;  %4213 = vperm.xlu0 %5428, %v5647_v29   ;;  %5654 = vrcp.f32 %v4208_v23  ;;  %v7364_v54 = vld [vmem:[#allocation12_spill] sm:$0xff]  ;;  %v5582_v23 = vld [vmem:[%s7289_s17 + $0x20] sm:$0xff]  }
0x109c   : > { %5322 = vmatprep.subr.bf16.mxu0 %v5565_v2  ;;  %5656 = vrcp.f32 %v4222_v13  ;;  %v5585_v13 = vld [vmem:[%s7289_s17 + $0x38] sm:$0xff]  }
0x109e   : > { %5323 = vmatpush3.bf16.msra.mxu0 %v5565_v2  ;;  %v5580_v2 = vld [vmem:[%s7289_s17 + $0x10] sm:$0xff]  }
0x109f   : > { %3088 = vperm.xlu1 %5429, %v7043_v14   ;;  %5324 = vmatprep.subr.bf16.mxu0 %v5566_v20  ;;  %v2476_v14 = vsel %vm1963_vm9, %v2475_v27, %v2264_v45 }
0x10a2   : > { %v5649_v26 = vpop.eup %5648  ;;  %5325 = vmatpush3.bf16.msra.mxu0 %v5566_v20 }
0x10a3   : > { %3277 = vperm.xlu1 %5429, %v7011_v49   ;;  %4227 = vperm.xlu0 %5428, %v5649_v26   ;;  %v5651_v28 = vpop.eup %5650  ;;  %v5569_v49 = vld [vmem:[%s7293_s21 + $0x38] sm:$0xff]   ;;  %v5583_v26 = vld [vmem:[%s7289_s17 + $0x28] sm:$0xff]  }
0x10a4   : > { %5326 = vmatprep.subr.bf16.mxu0 %v5567_v22  ;;  %v5653_v63 = vpop.eup %5652  ;;  %v3442_v30 = vmul.f32 %v5651_v28, %v3440_v55 }
0x10a5   : > { %v5655_v33 = vpop.eup %5654 }
0x10a6   : > { %5327 = vmatpush3.bf16.msra.mxu0 %v5567_v22  ;;  %v5581_v22 = vld [vmem:[%s7289_s17 + $0x18] sm:$0xff]  }
0x10a7   : > { %3534 = vrot.lane.b32.xlu0 %v6833_v47, %s7350_s7  ;;  %3462 = vperm.xlu1 %5429, %v5651_v28   ;;  %v5657_v47 = vpop.eup %5656 }
0x10a8   : > { %5328 = vmatprep.subr.bf16.mxu0 %v5568_v58 }
0x10aa   : > { %5329 = vmatpush3.bf16.msra.mxu0 %v5568_v58  ;;  %v5584_v58 = vld [vmem:[%s7289_s17 + $0x30] sm:$0xff]  }
0x10ab   : > { %3542 = vrot.lane.b32.xlu0 %v6837_v43, %s7347_s2  ;;  %4204 = vperm.xlu1 %5429, %v5653_v63   ;;  %v3439_v43 = vld [vmem:[#allocation8 + $0x30] sm:$0xff] }
0x10ac   : > { %5330 = vmatprep.subr.bf16.mxu0 %v5569_v49  ;;  %v3441_v56 = vmul.f32 %v6938_v39, %v3439_v43  ;;  %v2478_v39 = vsel %vm2477_vm13, %v2476_v14, %v2417_v53  ;;  %v4788_v43 = vld [vmem:[%s7294_s22] ss:$0 sm:$0xff] }
0x10ad   : > { %v2480_v61 = vmul.f32 %v2479_v31, %v2478_v39 }
0x10ae   : > { %5331 = vmatpush3.bf16.msra.mxu0 %v5569_v49  ;;  %v7172_v49 = vpop.permute.xlu0 %2905 }
0x10af   : > { %4218 = vperm.xlu1 %5429, %v5655_v33  }
0x10b1   : > { %5333 = vmatmul.mubr.bf16.vlgmr.msra.gmra.mrb[56].mxu0 %v7364_v54 }
0x10b2   : > { %5336 = vmatprep.mubr.bf16.mxu0 %v7365_v51  ;;  %v3084_v33 = vpop.permute.xlu0 %3083 }
0x10b3   : > { %4232 = vperm.xlu1 %5429, %v5657_v47  }
0x10b6   : > { %v3273_v47 = vpop.permute.xlu0 %3272 }
0x10b7   : > { %3536 = vrot.lane.b32.xlu1 %v7366_v60, %s7350_s7  ;;  %s7204_s7 = scalar_lea.vmem %s7297_s25, %s7370_s30  ;;  %s7376_s30 = sshll.u32 %s7382_s29, 4 }
0x10b9   : > { %5337 = vmatmul.mubr.bf16.gmra.mrb[60].mxu0 %v7367_v41 }
0x10ba   : > { %v7180_v60 = vpop.permute.xlu0 %3457 }
0x10db   : > { %v3445_v40 = vpop.xlane.xlu1 %3444 }
0x10dc   : > { %v3449_v19 = vadd.f32 %v3445_v40, %v3441_v56 }
0x10de   : > { %3451 = vst.msk [vmem:[#allocation8 + $0x30] sm:$0xff] %vm1232_vm10, %v3449_v19 }
0x10df   : > { %v3448_v44 = vpop.xlane.xlu1 %3447 }
0x10e0   : > { %v3450_v8 = vadd.f32 %v3448_v44, %v3442_v30 }
0x10e2   : > { %3452 = vst.msk [vmem:[#allocation8 + $0x38] sm:$0xff] %vm1232_vm10, %v3450_v8  ;;  %v5662_v8 = vld [vmem:[%s6097_s8 + $0x8] sm:$0xff]  }
0x10e3   : > { %v2487_v17 = vpop.permute.xlu1 %2486  ;;  %v3986_v27 = vunpack.c.l.bf16 %v5662_v8  ;;  %v3987_v14 = vunpack.c.h.bf16 %v5662_v8 }
0x10e4   : > { %v2494_v37 = vsel %vm1963_vm9, %v2493_v1, %v2487_v17 }
0x10e5   : > { %v4235_v62 = vld [vmem:[#allocation8 + $0x30] sm:$0xff] }
0x10e6   : > { %5658 = vrcp.f32 %v4235_v62  ;;  %v5663_v62 = vld [vmem:[%s6097_s8] sm:$0xff]  }
0x10e7   : > { %v2491_v12 = vpop.permute.xlu1 %2490  ;;  %v3984_v11 = vunpack.c.l.bf16 %v5663_v62 }
0x10e8   : > { %v2495_v32 = vsel %vm2477_vm13, %v2494_v37, %v2491_v12 }
0x10e9   : > { %v4236_v16 = vld [vmem:[#allocation8 + $0x38] sm:$0xff]  ;;  %v2496_v5 = vadd.f32 %v2495_v32, %v2480_v61  ;;  %v3985_v61 = vunpack.c.h.bf16 %v5663_v62 }
0x10ea   : > { %5660 = vrcp.f32 %v4236_v16 }
0x10eb   : > { %2497 = vst [vmem:[#allocation5] sm:$0xf] %v2496_v5 }
0x10f0   : > { %v5659_v52 = vpop.eup %5658 }
0x10f1   : > { %4241 = vperm.xlu0 %5428, %v5659_v52  }
0x10f2   : > { %v4075_v0 = vld [vmem:[#allocation5] sm:$0xf] }
0x10f4   : > { %v5661_v25 = vpop.eup %5660 }
0x10f5   : > { %4246 = vperm.xlu1 %5429, %v5661_v25  }
0x10f9   : > { %3544 = vrot.lane.b32.xlu1 %v7369_v46, %s7347_s2 }
0x1107   : > { %v4048_v6 = vpop.permute.xlu1 %4047 }
0x110e   : > { %v4055_v48 = vpop.permute.xlu1 %4054 }
0x110f   : > { %v4071_v57 = vsel %vm1874_vm5, %v4048_v6, %v4055_v48 }
0x1112   : > { %v4062_v15 = vpop.permute.xlu1 %4061  ;;  %v7184_v7 = vpop.permute.xlu0 %4199 }
0x1113   : > { %v4072_v21 = vsel %vm1963_vm9, %v4071_v57, %v4062_v15 }
0x1116   : > { %v4069_v42 = vpop.permute.xlu1 %4068 }
0x1117   : > { %v4073_v4 = vsel %vm2477_vm13, %v4072_v21, %v4069_v42 }
0x1118   : > { %v4076_v38 = vmul.f32 %v4075_v0, %v4073_v4 }
0x111a   : > { %v7131_v3 = vadd.f32 %v4076_v38, %v4074_v36  ;;  %v7170_v28 = vpop.permute.xlu1 %2910  ;;  %v5664_v36 = vld [vmem:[%s6097_s8 + $0x18] sm:$0xff]  }
0x111c   : > { %v4078_v24 = vpack.c.bf16 %v7131_v3, %v7131_v3 }
0x111e   : > { %5357 = vmatmul.mubr.bf16.vlgmr.msra.gmra.mrb[64].mxu1 %v4078_v24  ;;  %v7174_v63 = vpop.permute.xlu1 %3088 }
0x111f   : > { %5361 = vmatpush3.bf16.msra.mxu1 %v5578_v10  ;;  %5376 = vmatprep.mubr.msk.bf16.mxu1 %vm5692_vm0, %v7351_v50  ;;  %v3990_v10 = vunpack.c.l.bf16 %v5664_v36 }
0x1120   : > { %5362 = vmatprep.subr.bf16.mxu1 %v7351_v50 }
0x1122   : > { %v7176_v54 = vpop.permute.xlu1 %3277 }
0x1123   : > { %5363 = vmatpush3.bf16.msra.mxu1 %v5579_v59  ;;  %v3991_v59 = vunpack.c.h.bf16 %v5664_v36 }
0x1124   : > { %v3515_v29 = vpop.f32.mrb[52].mxu0  ;;  %5364 = vmatprep.subr.bf16.mxu1 %v7351_v50 }
0x1125   : > { %v5266_v35 = vpop.f32.mrb[53].mxu0  ;;  %3550 = vrot.lane.b32.xlu0 %v3515_v29, %s7346_s4 }
0x1126   : > { %v3518_v20 = vpop.f32.mrb[54].mxu0  ;;  %v7178_v51 = vpop.permute.xlu1 %3462  ;;  %v5665_v35 = vld [vmem:[%s6097_s8 + $0x10] sm:$0xff]  }
0x1127   : > { %v5267_v18 = vpop.f32.mrb[55].mxu0  ;;  %3552 = vrot.lane.b32.xlu1 %v3518_v20, %s7346_s4  ;;  %5365 = vmatpush3.bf16.msra.mxu1 %v5580_v2  ;;  %v3988_v20 = vunpack.c.l.bf16 %v5665_v35  ;;  %s7375_s4 = sshll.u32 %s7382_s29, 2 }
0x1128   : > { %5366 = vmatprep.subr.bf16.mxu1 %v7351_v50  ;;  %s970_s1 = scalar_lea.vmem %s7295_s23, %s7375_s4 }
0x112a   : > { %v7182_v41 = vpop.permute.xlu1 %4204 }
0x112b   : > { %5367 = vmatpush3.bf16.msra.mxu1 %v5581_v22  ;;  %v3989_v22 = vunpack.c.h.bf16 %v5665_v35 }
0x112c   : > { %5368 = vmatprep.subr.bf16.mxu1 %v7351_v50 }
0x112e   : > { %v7188_v45 = vpop.permute.xlu1 %4218 }
0x112f   : > { %5369 = vmatpush3.bf16.msra.mxu1 %v5582_v23 }
0x1130   : > { %5370 = vmatprep.subr.bf16.mxu1 %v7351_v50 }
0x1132   : > { %v7195_v40 = vpop.permute.xlu1 %4232 }
0x1133   : > { %5371 = vmatpush3.bf16.msra.mxu1 %v5583_v26  ;;  %v3522_v26 = vsel %vm1874_vm5, %v7172_v49, %v3084_v33 }
0x1134   : > { %5372 = vmatprep.subr.bf16.mxu1 %v7351_v50 }
0x1136   : > { %v3537_v32 = vpop.permute.xlu1 %3536 }
0x1137   : > { %5373 = vmatpush3.bf16.msra.mxu1 %v5584_v58 }
0x1138   : > { %5374 = vmatprep.subr.bf16.mxu1 %v7351_v50  ;;  %v7186_v50 = vpop.permute.xlu0 %4213 }
0x113b   : > { %5375 = vmatpush3.bf16.msra.mxu1 %v5585_v13  ;;  %v3524_v13 = vsel %vm1963_vm9, %v3522_v26, %v3273_v47  ;;  %v7371_v47 = vld [vmem:[#allocation18_spill] sm:$0xff] }
0x113c   : > { %v7190_v53 = vpop.permute.xlu0 %4227 }
0x1140   : > { %v3535_v31 = vpop.permute.xlu0 %3534 }
0x1144   : > { %v3543_v57 = vpop.permute.xlu0 %3542 }
0x1174   : > { %v4247_v4 = vpop.permute.xlu1 %4246 }
0x1178   : > { %v3545_v33 = vpop.permute.xlu1 %3544 }
0x1184   : > { %v5334_v56 = vpop.f32.mrb[56].mxu0 }
0x1185   : > { %v3970_v55 = vadd.f32 %v5334_v56, %v4788_v43  ;;  %v3922_v19 = vpop.f32.mrb[57].mxu0  ;;  %v4242_v56 = vpop.permute.xlu0 %4241 }
0x1186   : > { %v3968_v9 = vadd.f32 %v4788_v43, %v3922_v19  ;;  %v5335_v30 = vpop.f32.mrb[58].mxu0 }
0x1187   : > { %v3978_v44 = vmax.f32 %v3970_v55, 0.0  ;;  %v3971_v34 = vadd.f32 %v5335_v30, %v4788_v43  ;;  %v3925_v17 = vpop.f32.mrb[59].mxu0 }
0x1188   : > { %v3976_v39 = vmax.f32 %v3968_v9, 0.0  ;;  %v3969_v1 = vadd.f32 %v4788_v43, %v3925_v17  ;;  %v3526_v9 = vsel %vm2477_vm13, %v3524_v13, %v7180_v60 }
0x1189   : > { %v3979_v37 = vmax.f32 %v3971_v34, 0.0  ;;  %v3994_v16 = vadd.f32 %v3986_v27, %v3978_v44  ;;  %v3556_v27 = vsel %vm1874_vm5, %v7371_v47, %v3535_v31  ;;  %v3530_v60 = vmul.f32 0.0, %v3526_v9 }
0x118a   : > { %v3977_v12 = vmax.f32 %v3969_v1, 0.0  ;;  %v3992_v52 = vadd.f32 %v3984_v11, %v3976_v39  ;;  %v3558_v17 = vsel %vm1963_vm9, %v3556_v27, %v3543_v57 }
0x118b   : > { %v3995_v5 = vadd.f32 %v3987_v14, %v3979_v37  ;;  %v4250_v37 = vsel %vm1874_vm5, %v7182_v41, %v7188_v45  ;;  %v4797_v41 = vld [vmem:[%s7284_s12] ss:$0 sm:$0xff] }
0x118c   : > { %v3993_v25 = vadd.f32 %v3985_v61, %v3977_v12  ;;  %v5338_v46 = vpop.f32.mrb[60].mxu0  ;;  %v4252_v12 = vsel %vm1963_vm9, %v4250_v37, %v7195_v40 }
0x118d   : > { %v4839_v6 = vpack.c.bf16 %v3995_v5, %v3994_v16  ;;  %v3974_v48 = vadd.f32 %v5338_v46, %v4788_v43  ;;  %v3938_v15 = vpop.f32.mrb[61].mxu0  ;;  %v7374_v46 = vld [vmem:[#allocation17_spill] sm:$0xff] }
0x118e   : > { %v4834_v21 = vpack.c.bf16 %v3993_v25, %v3992_v52  ;;  %v3972_v42 = vadd.f32 %v4788_v43, %v3938_v15  ;;  %v5339_v0 = vpop.f32.mrb[62].mxu0  ;;  %v7373_v52 = vld [vmem:[#allocation16_spill] sm:$0xff] }
0x118f   : > { %4851 = vst [vmem:[%s7204_s7 + $0x8] sm:$0xff] %v4839_v6   ;;  %v3982_v38 = vmax.f32 %v3974_v48, 0.0  ;;  %v3975_v24 = vadd.f32 %v5339_v0, %v4788_v43  ;;  %v3941_v2 = vpop.f32.mrb[63].mxu0 }
0x1190   : > { %4835 = vst [vmem:[%s7204_s7] sm:$0xff] %v4834_v21   ;;  %v3980_v29 = vmax.f32 %v3972_v42, 0.0  ;;  %v3973_v18 = vadd.f32 %v4788_v43, %v3941_v2  ;;  %v3523_v43 = vsel %vm1874_vm5, %v7170_v28, %v7174_v63  ;;  %v4249_v28 = vsel %vm1874_vm5, %v7184_v7, %v7186_v50  ;;  %v7372_v63 = vld [vmem:[#allocation19_spill] sm:$0xff] }
0x1191   : > { %v3983_v23 = vmax.f32 %v3975_v24, 0.0  ;;  %v3998_v55 = vadd.f32 %v3990_v10, %v3982_v38  ;;  %v3525_v49 = vsel %vm1963_vm9, %v3523_v43, %v7176_v54  ;;  %v3557_v54 = vsel %vm1874_vm5, %v7372_v63, %v3537_v32 }
0x1192   : > { %v3981_v58 = vmax.f32 %v3973_v18, 0.0  ;;  %v3996_v30 = vadd.f32 %v3988_v20, %v3980_v29  ;;  %v3527_v34 = vsel %vm2477_vm13, %v3525_v49, %v7178_v51  ;;  %v4251_v31 = vsel %vm1963_vm9, %v4249_v28, %v7190_v53 }
0x1193   : > { %v3999_v19 = vadd.f32 %v3991_v59, %v3983_v23  ;;  %v3531_v51 = vmul.f32 0.0, %v3527_v34  ;;  %v3559_v11 = vsel %vm1963_vm9, %v3557_v54, %v3545_v33  ;;  %v4253_v7 = vsel %vm2477_vm13, %v4251_v31, %v4242_v56 }
0x1194   : > { %v3997_v44 = vadd.f32 %v3989_v22, %v3981_v58  ;;  %v4254_v53 = vsel %vm2477_vm13, %v4252_v12, %v4247_v4  ;;  %v4806_v4 = vld [vmem:[%s7290_s18] ss:$0 sm:$0xff] }
0x1195   : > { %v4849_v8 = vpack.c.bf16 %v3999_v19, %v3998_v55 }
0x1196   : > { %v4844_v14 = vpack.c.bf16 %v3997_v44, %v3996_v30 }
0x1197   : > { %4853 = vst [vmem:[%s7204_s7 + $0x18] sm:$0xff] %v4849_v8   ;;  %v3551_v39 = vpop.permute.xlu0 %3550 }
0x1198   : > { %4852 = vst [vmem:[%s7204_s7 + $0x10] sm:$0xff] %v4844_v14   ;;  %v3560_v62 = vsel %vm2477_vm13, %v3558_v17, %v3551_v39  ;;  %s975_s7 = scalar_lea.vmem %s7296_s24, %s7376_s30 }
0x1199   : > { %v3562_v1 = vadd.f32 %v3560_v62, %v3530_v60  ;;  %v3553_v61 = vpop.permute.xlu1 %3552 }
0x119a   : > { %v3561_v50 = vsel %vm2477_vm13, %v3559_v11, %v3553_v61 }
0x119b   : > { %v4259_v32 = vmul.f32 %v4253_v7, %v3562_v1  ;;  %v3563_v16 = vadd.f32 %v3561_v50, %v3531_v51 }
0x119d   : > { %v4260_v5 = vmul.f32 %v4254_v53, %v3563_v16  ;;  %v4261_v25 = vadd.f32 %v4259_v32, %v7373_v52 }
0x119f   : > { %v4262_v6 = vadd.f32 %v4260_v5, %v7374_v46 }
0x11a1   : > { %v4263_v48 = vpack.c.bf16 %v4262_v6, %v4261_v25 }
0x11a3   : > { %5377 = vmatmul.mubr.bf16.vlgmr.msra.gmra.mrb[68].mxu1 %v4263_v48 }
0x11f1   : > { %v4184_v45 = vpop.f32.mrb[64].mxu1 }
0x11f2   : > { %v4185_v15 = vadd.f32 %v4797_v41, %v4184_v45  ;;  %v5358_v40 = vpop.f32.mrb[65].mxu1 }
0x11f3   : > { %v4187_v57 = vpop.f32.mrb[66].mxu1 }
0x11f4   : > { %v4190_v21 = vmax.f32 %v4185_v15, 0.0  ;;  %v5359_v42 = vpop.f32.mrb[67].mxu1 }
0x11f6   : > { %v4191_v0 = vadd.f32 %v4190_v21, %v7131_v3 }
0x11f8   : > { %4192 = vst [vmem:[%s970_s1] sm:$0xf] %v4191_v0 }
0x1276   : > { %v4369_v38 = vpop.f32.mrb[68].mxu1 }
0x1277   : > { %v4370_v36 = vadd.f32 %v4806_v4, %v4369_v38  ;;  %v5378_v10 = vpop.f32.mrb[69].mxu1 }
0x1278   : > { %v4372_v24 = vpop.f32.mrb[70].mxu1 }
0x1279   : > { %v4376_v59 = vmax.f32 %v4370_v36, 0.0  ;;  %v4373_v2 = vadd.f32 %v4806_v4, %v4372_v24  ;;  %v5379_v29 = vpop.f32.mrb[71].mxu1 }
0x127b   : > { %v4378_v35 = vadd.f32 %v4376_v59, %v4261_v25  ;;  %v4377_v20 = vmax.f32 %v4373_v2, 0.0 }
0x127d   : > { %4380 = vst [vmem:[%s975_s7] sm:$0xff] %v4378_v35  ;;  %v4379_v3 = vadd.f32 %v4377_v20, %v4262_v6 }
0x127f   : > { %4381 = vst [vmem:[%s975_s7 + $0x8] sm:$0xff] %v4379_v3 }
0x1280 PF: > { %s36_s6 = sadd.s32 1, %s5688_s6   ;;  %s7377_s29 = sld [smem:[#allocation10_spill]] }
0x1281   : > { %p33_p5 = scmp.ge.s32.totalorder %s36_s6, 4   ;;  %s7378_s2 = sld [smem:[#allocation11_spill]] }
0x1283   :  { %35 = sbr.rel (!%p33_p5) target bundleno = 11 (0xb), region = 204 }

</bundles_post_ra>
